<compile_context>
chip_gen: v5e
topology: v5e:2x2
jax: 0.10.0
libtpu: 0.0.40
codegen_flags: <defaults>
</compile_context>

<pallas_src>
import jax
import jax.numpy as jnp
from jax.experimental import pallas as pl
from jax.experimental.pallas import tpu as pltpu


# ----------------------------------------------------------------------------
# in-kernel helpers
# ----------------------------------------------------------------------------
def _shifted(arr, dk, l_idx):
    """s[l] = arr[l + dk] if 0 <= l + dk < L else 0   (shift along axis 0)."""
    if dk == 0:
        return arr
    L = arr.shape[0]
    rolled = pltpu.roll(arr, shift=(-dk) % L, axis=0)
    valid = (l_idx + dk >= 0) & (l_idx + dk <= L - 1)
    return jnp.where(valid, rolled, jnp.zeros_like(rolled))


def _bn_relu_pool(y, aff_ref, y_ref):
    """Folded BatchNorm affine + ReLU + MaxPool1d(2, 2) along axis 0."""
    L = y.shape[0]
    y = jnp.maximum(y * aff_ref[0:1, :] + aff_ref[1:2, :], 0.0)
    y_ref[...] = y
    even = y_ref[pl.ds(0, L // 2, stride=2), :]   # rows 0, 2, 4, ...
    odd = y_ref[pl.ds(1, L // 2, stride=2), :]    # rows 1, 3, 5, ...
    return jnp.maximum(even, odd)


# ----------------------------------------------------------------------------
# fused conv stack: 3 x (Conv1d(k=5, pad=2) + BN(eval) + ReLU + MaxPool(2, 2))
# ----------------------------------------------------------------------------
def conv_stack_kernel(x_ref, w1_ref, a1_ref, w2_ref, a2_ref, w3_ref, a3_ref,
                      out_ref, y1_ref, y2_ref, y3_ref):
    def stage1(x):
        # small Cin (13): per-tap matmuls, shift the (L, Cout) products instead
        # of building an unaligned 13-lane window.
        L, _ = x.shape
        K, _, cout = w1_ref.shape
        pad = (K - 1) // 2
        xb = x.astype(jnp.bfloat16)
        l_idx = jax.lax.broadcasted_iota(jnp.int32, (L, cout), 0)
        acc = jnp.zeros((L, cout), jnp.float32)
        for k in range(K):
            z = jnp.dot(xb, w1_ref[k], preferred_element_type=jnp.float32)
            acc = acc + _shifted(z, k - pad, l_idx)
        return _bn_relu_pool(acc, a1_ref, y1_ref)

    def stage_packed(x, w_ref, aff_ref, y_ref):
        # tap-packed window (L, K*Cin) -> ONE 320-deep matmul (good MXU fill).
        L, cin = x.shape
        K = w_ref.shape[0] // cin
        pad = (K - 1) // 2
        l_idx = jax.lax.broadcasted_iota(jnp.int32, (L, cin), 0)
        taps = [_shifted(x, k - pad, l_idx) for k in range(K)]
        win = jnp.concatenate(taps, axis=-1).astype(jnp.bfloat16)
        y = jnp.dot(win, w_ref[...], preferred_element_type=jnp.float32)
        return _bn_relu_pool(y, aff_ref, y_ref)

    h = stage1(x_ref[0])                      # (T/2, 64)
    h = stage_packed(h, w2_ref, a2_ref, y2_ref)   # (T/4, 64)
    h = stage_packed(h, w3_ref, a3_ref, y3_ref)   # (T/8, 128)
    out_ref[...] = h[None]


def conv_stack(x, w1, aff1, w2, aff2, w3, aff3):
    B, T, F = x.shape
    assert T % 8 == 0 and T >= 8
    c1 = w1.shape[2]
    c2 = w2.shape[1]
    c3 = w3.shape[1]

    def const_spec(arr):
        return pl.BlockSpec(arr.shape, lambda b, n=arr.ndim: (0,) * n)

    return pl.pallas_call(
        conv_stack_kernel,
        out_shape=jax.ShapeDtypeStruct((B, T // 8, c3), jnp.float32),
        grid=(B,),
        in_specs=[pl.BlockSpec((1, T, F), lambda b: (b, 0, 0)),
                  const_spec(w1), const_spec(aff1),
                  const_spec(w2), const_spec(aff2),
                  const_spec(w3), const_spec(aff3)],
        out_specs=pl.BlockSpec((1, T // 8, c3), lambda b: (b, 0, 0)),
        scratch_shapes=[pltpu.VMEM((T, c1), jnp.float32),
                        pltpu.VMEM((T // 2, c2), jnp.float32),
                        pltpu.VMEM((T // 4, c3), jnp.float32)],
        compiler_params=pltpu.CompilerParams(
            dimension_semantics=("parallel",)),
    )(x, w1, aff1, w2, aff2, w3, aff3)


# ----------------------------------------------------------------------------
# one bidirectional LSTM layer: grid=(2,) over direction (PyTorch gates i,f,g,o)
# ----------------------------------------------------------------------------
def lstm_bidir_kernel(xg_ref, wih_ref, whh_ref, b_ref, out_ref, gx_ref):
    d = pl.program_id(0)                        # 0 = forward, 1 = backward
    G, B, T, _ = xg_ref.shape
    H = whh_ref.shape[1]

    if G == 1:
        x = xg_ref[0]                                   # (B, T, Din)
    else:
        x = jnp.concatenate([xg_ref[g] for g in range(G)], axis=-1)
    Din = x.shape[-1]

    wih = wih_ref[0]                                    # (Din, 4H) bf16
    whh = whh_ref[0]                                    # (H, 4H)  bf16
    bias = b_ref[0]                                     # (1, 4H)  f32

    # hoisted input projection for all timesteps (one big matmul)
    gx = jnp.dot(x.reshape(B * T, Din).astype(jnp.bfloat16), wih,
                 preferred_element_type=jnp.float32) + bias
    gx_ref[...] = gx.reshape(B, T, 4 * H)

    h = jnp.zeros((B, H), jnp.float32)
    c = jnp.zeros((B, H), jnp.float32)
    for t in range(T):                                  # fully unrolled (T small)
        tt = t + d * (T - 1 - 2 * t)                    # fwd: t, bwd: T-1-t
        gxt = gx_ref[:, pl.ds(tt, 1), :][:, 0, :]       # (B, 4H)
        gates = gxt + jnp.dot(h.astype(jnp.bfloat16), whh,
                              preferred_element_type=jnp.float32)
        i_g = jax.nn.sigmoid(gates[:, 0 * H:1 * H])
        f_g = jax.nn.sigmoid(gates[:, 1 * H:2 * H])
        g_g = jnp.tanh(gates[:, 2 * H:3 * H])
        o_g = jax.nn.sigmoid(gates[:, 3 * H:4 * H])
        c = f_g * c + i_g * g_g
        h = o_g * jnp.tanh(c)
        out_ref[:, :, pl.ds(tt, 1), :] = h[None, :, None, :]   # direct write


def lstm_bidir(xg, wih, whh, bias):
    G, B, T, Dg = xg.shape
    H = whh.shape[1]
    Din = wih.shape[1]
    return pl.pallas_call(
        lstm_bidir_kernel,
        out_shape=jax.ShapeDtypeStruct((2, B, T, H), jnp.float32),
        grid=(2,),
        in_specs=[pl.BlockSpec((G, B, T, Dg), lambda d: (0, 0, 0, 0)),
                  pl.BlockSpec((1, Din, 4 * H), lambda d: (d, 0, 0)),
                  pl.BlockSpec((1, H, 4 * H), lambda d: (d, 0, 0)),
                  pl.BlockSpec((1, 1, 4 * H), lambda d: (d, 0, 0))],
        out_specs=pl.BlockSpec((1, B, T, H), lambda d: (d, 0, 0, 0)),
        scratch_shapes=[pltpu.VMEM((B, T, 4 * H), jnp.float32)],
        compiler_params=pltpu.CompilerParams(
            dimension_semantics=("parallel",)),
    )(xg, wih, whh, bias)


# ----------------------------------------------------------------------------
# attention (Linear(2H,1) + softmax over time + weighted sum) + final Linear
# ----------------------------------------------------------------------------
def attn_fc_kernel(h_ref, wa_ref, ba_ref, wf_ref, bf_ref, out_ref):
    x = jnp.concatenate([h_ref[0], h_ref[1]], axis=-1)            # (B, T, 2H)
    scores = jnp.einsum("btd,dk->btk", x.astype(jnp.bfloat16), wa_ref[...],
                        preferred_element_type=jnp.float32) + ba_ref[...]
    scores = scores - jnp.max(scores, axis=1, keepdims=True)
    e = jnp.exp(scores)
    attn = e / jnp.sum(e, axis=1, keepdims=True)                  # softmax(dim=1)
    ctx = jnp.sum(attn * x, axis=1)                               # (B, 2H)
    out_ref[...] = (jnp.dot(ctx.astype(jnp.bfloat16), wf_ref[...],
                            preferred_element_type=jnp.float32) + bf_ref[...])


def attn_fc(hg, wa, ba, wf, bf):
    _, B, _, _ = hg.shape
    C = wf.shape[1]
    vmem = pl.BlockSpec(memory_space=pltpu.MemorySpace.VMEM)
    return pl.pallas_call(
        attn_fc_kernel,
        out_shape=jax.ShapeDtypeStruct((B, C), jnp.float32),
        in_specs=[vmem] * 5,
        out_specs=pl.BlockSpec(memory_space=pltpu.MemorySpace.VMEM),
    )(hg, wa, ba, wf, bf)


# ----------------------------------------------------------------------------
# parameters (deterministic synthetic init) and full forward
# ----------------------------------------------------------------------------
def init_params(key, input_size=13, hidden_size=64, num_layers=2, num_classes=7):
    keys = iter(jax.random.split(key, 64))

    def nrm(shape, s=0.1):
        return (s * jax.random.normal(next(keys), shape)).astype(jnp.float32)

    eps = 1e-5
    p = {}
    # TODO(synk): BatchNorm1d is modeled in eval/inference mode only (running
    # stats folded into a per-channel affine); training-mode batch statistics
    # are not modeled.
    for idx, (cin, cout) in enumerate([(input_size, 64), (64, 64), (64, 128)], 1):
        w = nrm((5, cin, cout))
        b = nrm((cout,))
        gamma = 1.0 + nrm((cout,))
        beta = nrm((cout,))
        rmean = nrm((cout,))
        rvar = (1.0 + 0.1 * jnp.abs(jax.random.normal(next(keys), (cout,)))
                ).astype(jnp.float32)
        scale = gamma / jnp.sqrt(rvar + eps)
        shift = (b - rmean) * scale + beta
        if idx == 1:
            p["w1"] = w.astype(jnp.bfloat16)                         # (K, Cin, Cout)
        else:
            p[f"w{idx}"] = w.reshape(5 * cin, cout).astype(jnp.bfloat16)  # (K*Cin, Cout)
        p[f"aff{idx}"] = jnp.stack([scale, shift], axis=0)           # (2, Cout) f32

    H = hidden_size
    layers = []
    din = 128
    for _ in range(num_layers):
        wih = jnp.stack([nrm((din, 4 * H)), nrm((din, 4 * H))], 0).astype(jnp.bfloat16)
        whh = jnp.stack([nrm((H, 4 * H)), nrm((H, 4 * H))], 0).astype(jnp.bfloat16)
        bias = jnp.stack(
            [(nrm((4 * H,)) + nrm((4 * H,))).reshape(1, 4 * H),
             (nrm((4 * H,)) + nrm((4 * H,))).reshape(1, 4 * H)], 0)  # (2, 1, 4H)
        layers.append({"wih": wih, "whh": whh, "b": bias})
        din = 2 * H
    p["lstm"] = layers

    p["wa"] = nrm((2 * H, 1)).astype(jnp.bfloat16)
    p["ba"] = nrm((1, 1))
    p["wf"] = nrm((2 * H, num_classes)).astype(jnp.bfloat16)
    p["bf"] = nrm((1, num_classes))
    return p


def cnn_lstm_forward(x, params):
    # x: (B, T, input_size), channels-last throughout (PyTorch transposes to NCL)
    h = conv_stack(x, params["w1"], params["aff1"], params["w2"], params["aff2"],
                   params["w3"], params["aff3"])          # (B, T/8, 128)
    hg = h[None]                                          # (1, B, T/8, 128)
    for layer in params["lstm"]:
        hg = lstm_bidir(hg, layer["wih"], layer["whh"], layer["b"])  # (2,B,T/8,H)
    return attn_fc(hg, params["wa"], params["ba"], params["wf"], params["bf"])


if __name__ == "__main__":
    key = jax.random.PRNGKey(0)
    k_x, k_p = jax.random.split(key)

    B, T, F = 2, 32, 13              # seq length divisible by 8 (three /2 pools)
    x = jax.random.normal(k_x, (B, T, F), dtype=jnp.float32)
    params = init_params(k_p)

    fwd = jax.jit(lambda inp: cnn_lstm_forward(inp, params))
    out = fwd(x)
    jax.block_until_ready(out)
    assert out.shape == (B, 7), out.shape
    assert bool(jnp.all(jnp.isfinite(out)))
    print("KERNEL_OK")
</pallas_src>

<mosaic_0001>
module attributes {stable_mosaic.version = 11 : i64} {
  func.func @lstm_bidir_kernel(%arg0: i32, %arg1: memref<1x2x4x128xf32, #tpu.memory_space<vmem>>, %arg2: memref<1x128x256xbf16, #tpu.memory_space<vmem>>, %arg3: memref<1x64x256xbf16, #tpu.memory_space<vmem>>, %arg4: memref<1x1x256xf32, #tpu.memory_space<vmem>>, %arg5: memref<1x2x4x64xf32, #tpu.memory_space<vmem>>, %arg6: memref<2x4x256xf32, #tpu.memory_space<vmem>>) attributes {dimension_semantics = [#tpu.dimension_semantics<parallel>], iteration_bounds = array<i64: 2>, scalar_prefetch = 0 : i64, scratch_operands = 1 : i64, tpu.core_type = #tpu.core_type<tc>, window_params = [{pipeline_mode = #tpu.pipeline_mode<synchronous>, transform_indices = @transform_0, window_bounds = array<i64: 1, 2, 4, 128>}, {transform_indices = @transform_1, window_bounds = array<i64: 1, 128, 256>}, {transform_indices = @transform_2, window_bounds = array<i64: 1, 64, 256>}, {transform_indices = @transform_3, window_bounds = array<i64: 1, 1, 256>}, {transform_indices = @transform_4, window_bounds = array<i64: 1, 2, 4, 64>}]} {
    %c0 = arith.constant 0 : index
    %c0_0 = arith.constant 0 : index
    %c0_1 = arith.constant 0 : index
    %c0_2 = arith.constant 0 : index
    %0 = vector.load %arg1[%c0, %c0_0, %c0_1, %c0_2] : memref<1x2x4x128xf32, #tpu.memory_space<vmem>>, vector<1x2x4x128xf32>
    %1 = vector.shape_cast %0 : vector<1x2x4x128xf32> to vector<2x4x128xf32>
    %c0_3 = arith.constant 0 : index
    %c0_4 = arith.constant 0 : index
    %c0_5 = arith.constant 0 : index
    %2 = vector.load %arg2[%c0_3, %c0_4, %c0_5] : memref<1x128x256xbf16, #tpu.memory_space<vmem>>, vector<1x128x256xbf16>
    %3 = vector.shape_cast %2 : vector<1x128x256xbf16> to vector<128x256xbf16>
    %c0_6 = arith.constant 0 : index
    %c0_7 = arith.constant 0 : index
    %c0_8 = arith.constant 0 : index
    %4 = vector.load %arg3[%c0_6, %c0_7, %c0_8] : memref<1x64x256xbf16, #tpu.memory_space<vmem>>, vector<1x64x256xbf16>
    %5 = vector.shape_cast %4 : vector<1x64x256xbf16> to vector<64x256xbf16>
    %c0_9 = arith.constant 0 : index
    %c0_10 = arith.constant 0 : index
    %c0_11 = arith.constant 0 : index
    %6 = vector.load %arg4[%c0_9, %c0_10, %c0_11] : memref<1x1x256xf32, #tpu.memory_space<vmem>>, vector<1x1x256xf32>
    %7 = vector.shape_cast %6 : vector<1x1x256xf32> to vector<1x256xf32>
    %8 = vector.shape_cast %1 : vector<2x4x128xf32> to vector<8x128xf32>
    %9 = arith.truncf %8 : vector<8x128xf32> to vector<8x128xbf16>
    %cst = arith.constant dense<0.000000e+00> : vector<8x256xf32>
    %10 = tpu.matmul %9, %3, %cst {dimension_numbers = #tpu.dot_dimension_numbers<[1], [0], [0], [1], [0, 0, 1, 1], [], []>} : vector<8x128xbf16>, vector<128x256xbf16>, vector<8x256xf32> -> vector<8x256xf32>
    %11 = vector.broadcast %7 : vector<1x256xf32> to vector<8x256xf32>
    %12 = arith.addf %10, %11 : vector<8x256xf32>
    %13 = vector.shape_cast %12 : vector<8x256xf32> to vector<2x4x256xf32>
    %c0_12 = arith.constant 0 : index
    %c0_13 = arith.constant 0 : index
    %c0_14 = arith.constant 0 : index
    %14 = vector.load %arg6[%c0_12, %c0_13, %c0_14] : memref<2x4x256xf32, #tpu.memory_space<vmem>>, vector<2x4x256xf32>
    tpu.vector_store %arg6[%c0_12, %c0_13, %c0_14], %13 {strides = array<i32>} : memref<2x4x256xf32, #tpu.memory_space<vmem>>, vector<2x4x256xf32>,
    %cst_15 = arith.constant 0.000000e+00 : f32
    %15 = vector.broadcast %cst_15 : f32 to vector<2x64xf32>
    %cst_16 = arith.constant 0.000000e+00 : f32
    %16 = vector.broadcast %cst_16 : f32 to vector<2x64xf32>
    %c3_i32 = arith.constant 3 : i32
    %17 = arith.muli %arg0, %c3_i32 : i32
    %c0_i32 = arith.constant 0 : i32
    %18 = arith.addi %c0_i32, %17 : i32
    %c0_17 = arith.constant 0 : index
    %19 = arith.index_cast %18 : i32 to index
    %c0_18 = arith.constant 0 : index
    %20 = vector.load %arg6[%c0_17, %19, %c0_18] : memref<2x4x256xf32, #tpu.memory_space<vmem>>, vector<2x1x256xf32>
    %21 = vector.shape_cast %20 : vector<2x1x256xf32> to vector<2x256xf32>
    %22 = arith.truncf %15 : vector<2x64xf32> to vector<2x64xbf16>
    %cst_19 = arith.constant dense<0.000000e+00> : vector<2x256xf32>
    %23 = tpu.matmul %22, %5, %cst_19 {dimension_numbers = #tpu.dot_dimension_numbers<[1], [0], [0], [1], [0, 0, 1, 1], [], []>} : vector<2x64xbf16>, vector<64x256xbf16>, vector<2x256xf32> -> vector<2x256xf32>
    %24 = arith.addf %21, %23 : vector<2x256xf32>
    %25 = vector.extract_strided_slice %24 {offsets = [0, 0], sizes = [2, 64], strides = [1, 1]} : vector<2x256xf32> to vector<2x64xf32>
    %26 = arith.negf %25 : vector<2x64xf32>
    %27 = math.exp %26 : vector<2x64xf32>
    %cst_20 = arith.constant 1.000000e+00 : f32
    %28 = vector.broadcast %cst_20 : f32 to vector<2x64xf32>
    %29 = arith.addf %28, %27 : vector<2x64xf32>
    %30 = arith.divf %28, %29 : vector<2x64xf32>
    %31 = vector.extract_strided_slice %24 {offsets = [0, 64], sizes = [2, 64], strides = [1, 1]} : vector<2x256xf32> to vector<2x64xf32>
    %32 = arith.negf %31 : vector<2x64xf32>
    %33 = math.exp %32 : vector<2x64xf32>
    %cst_21 = arith.constant 1.000000e+00 : f32
    %34 = vector.broadcast %cst_21 : f32 to vector<2x64xf32>
    %35 = arith.addf %34, %33 : vector<2x64xf32>
    %36 = arith.divf %34, %35 : vector<2x64xf32>
    %37 = vector.extract_strided_slice %24 {offsets = [0, 128], sizes = [2, 64], strides = [1, 1]} : vector<2x256xf32> to vector<2x64xf32>
    %38 = math.tanh %37 : vector<2x64xf32>
    %39 = vector.extract_strided_slice %24 {offsets = [0, 192], sizes = [2, 64], strides = [1, 1]} : vector<2x256xf32> to vector<2x64xf32>
    %40 = arith.negf %39 : vector<2x64xf32>
    %41 = math.exp %40 : vector<2x64xf32>
    %cst_22 = arith.constant 1.000000e+00 : f32
    %42 = vector.broadcast %cst_22 : f32 to vector<2x64xf32>
    %43 = arith.addf %42, %41 : vector<2x64xf32>
    %44 = arith.divf %42, %43 : vector<2x64xf32>
    %45 = arith.mulf %36, %16 : vector<2x64xf32>
    %46 = arith.mulf %30, %38 : vector<2x64xf32>
    %47 = arith.addf %45, %46 : vector<2x64xf32>
    %48 = math.tanh %47 : vector<2x64xf32>
    %49 = arith.mulf %44, %48 : vector<2x64xf32>
    %50 = vector.shape_cast %49 : vector<2x64xf32> to vector<1x2x1x64xf32>
    %c0_23 = arith.constant 0 : index
    %c0_24 = arith.constant 0 : index
    %51 = arith.index_cast %18 : i32 to index
    %c0_25 = arith.constant 0 : index
    %52 = vector.load %arg5[%c0_23, %c0_24, %51, %c0_25] : memref<1x2x4x64xf32, #tpu.memory_space<vmem>>, vector<1x2x1x64xf32>
    tpu.vector_store %arg5[%c0_23, %c0_24, %51, %c0_25], %50 {strides = array<i32>} : memref<1x2x4x64xf32, #tpu.memory_space<vmem>>, vector<1x2x1x64xf32>,
    %c1_i32 = arith.constant 1 : i32
    %53 = arith.muli %arg0, %c1_i32 : i32
    %c1_i32_26 = arith.constant 1 : i32
    %54 = arith.addi %c1_i32_26, %53 : i32
    %c0_27 = arith.constant 0 : index
    %55 = arith.index_cast %54 : i32 to index
    %c0_28 = arith.constant 0 : index
    %56 = vector.load %arg6[%c0_27, %55, %c0_28] : memref<2x4x256xf32, #tpu.memory_space<vmem>>, vector<2x1x256xf32>
    %57 = vector.shape_cast %56 : vector<2x1x256xf32> to vector<2x256xf32>
    %58 = arith.truncf %49 : vector<2x64xf32> to vector<2x64xbf16>
    %cst_29 = arith.constant dense<0.000000e+00> : vector<2x256xf32>
    %59 = tpu.matmul %58, %5, %cst_29 {dimension_numbers = #tpu.dot_dimension_numbers<[1], [0], [0], [1], [0, 0, 1, 1], [], []>} : vector<2x64xbf16>, vector<64x256xbf16>, vector<2x256xf32> -> vector<2x256xf32>
    %60 = arith.addf %57, %59 : vector<2x256xf32>
    %61 = vector.extract_strided_slice %60 {offsets = [0, 0], sizes = [2, 64], strides = [1, 1]} : vector<2x256xf32> to vector<2x64xf32>
    %62 = arith.negf %61 : vector<2x64xf32>
    %63 = math.exp %62 : vector<2x64xf32>
    %cst_30 = arith.constant 1.000000e+00 : f32
    %64 = vector.broadcast %cst_30 : f32 to vector<2x64xf32>
    %65 = arith.addf %64, %63 : vector<2x64xf32>
    %66 = arith.divf %64, %65 : vector<2x64xf32>
    %67 = vector.extract_strided_slice %60 {offsets = [0, 64], sizes = [2, 64], strides = [1, 1]} : vector<2x256xf32> to vector<2x64xf32>
    %68 = arith.negf %67 : vector<2x64xf32>
    %69 = math.exp %68 : vector<2x64xf32>
    %cst_31 = arith.constant 1.000000e+00 : f32
    %70 = vector.broadcast %cst_31 : f32 to vector<2x64xf32>
    %71 = arith.addf %70, %69 : vector<2x64xf32>
    %72 = arith.divf %70, %71 : vector<2x64xf32>
    %73 = vector.extract_strided_slice %60 {offsets = [0, 128], sizes = [2, 64], strides = [1, 1]} : vector<2x256xf32> to vector<2x64xf32>
    %74 = math.tanh %73 : vector<2x64xf32>
    %75 = vector.extract_strided_slice %60 {offsets = [0, 192], sizes = [2, 64], strides = [1, 1]} : vector<2x256xf32> to vector<2x64xf32>
    %76 = arith.negf %75 : vector<2x64xf32>
    %77 = math.exp %76 : vector<2x64xf32>
    %cst_32 = arith.constant 1.000000e+00 : f32
    %78 = vector.broadcast %cst_32 : f32 to vector<2x64xf32>
    %79 = arith.addf %78, %77 : vector<2x64xf32>
    %80 = arith.divf %78, %79 : vector<2x64xf32>
    %81 = arith.mulf %72, %47 : vector<2x64xf32>
    %82 = arith.mulf %66, %74 : vector<2x64xf32>
    %83 = arith.addf %81, %82 : vector<2x64xf32>
    %84 = math.tanh %83 : vector<2x64xf32>
    %85 = arith.mulf %80, %84 : vector<2x64xf32>
    %86 = vector.shape_cast %85 : vector<2x64xf32> to vector<1x2x1x64xf32>
    %c0_33 = arith.constant 0 : index
    %c0_34 = arith.constant 0 : index
    %87 = arith.index_cast %54 : i32 to index
    %c0_35 = arith.constant 0 : index
    %88 = vector.load %arg5[%c0_33, %c0_34, %87, %c0_35] : memref<1x2x4x64xf32, #tpu.memory_space<vmem>>, vector<1x2x1x64xf32>
    tpu.vector_store %arg5[%c0_33, %c0_34, %87, %c0_35], %86 {strides = array<i32>} : memref<1x2x4x64xf32, #tpu.memory_space<vmem>>, vector<1x2x1x64xf32>,
    %c-1_i32 = arith.constant -1 : i32
    %89 = arith.muli %arg0, %c-1_i32 : i32
    %c2_i32 = arith.constant 2 : i32
    %90 = arith.addi %c2_i32, %89 : i32
    %c0_36 = arith.constant 0 : index
    %91 = arith.index_cast %90 : i32 to index
    %c0_37 = arith.constant 0 : index
    %92 = vector.load %arg6[%c0_36, %91, %c0_37] : memref<2x4x256xf32, #tpu.memory_space<vmem>>, vector<2x1x256xf32>
    %93 = vector.shape_cast %92 : vector<2x1x256xf32> to vector<2x256xf32>
    %94 = arith.truncf %85 : vector<2x64xf32> to vector<2x64xbf16>
    %cst_38 = arith.constant dense<0.000000e+00> : vector<2x256xf32>
    %95 = tpu.matmul %94, %5, %cst_38 {dimension_numbers = #tpu.dot_dimension_numbers<[1], [0], [0], [1], [0, 0, 1, 1], [], []>} : vector<2x64xbf16>, vector<64x256xbf16>, vector<2x256xf32> -> vector<2x256xf32>
    %96 = arith.addf %93, %95 : vector<2x256xf32>
    %97 = vector.extract_strided_slice %96 {offsets = [0, 0], sizes = [2, 64], strides = [1, 1]} : vector<2x256xf32> to vector<2x64xf32>
    %98 = arith.negf %97 : vector<2x64xf32>
    %99 = math.exp %98 : vector<2x64xf32>
    %cst_39 = arith.constant 1.000000e+00 : f32
    %100 = vector.broadcast %cst_39 : f32 to vector<2x64xf32>
    %101 = arith.addf %100, %99 : vector<2x64xf32>
    %102 = arith.divf %100, %101 : vector<2x64xf32>
    %103 = vector.extract_strided_slice %96 {offsets = [0, 64], sizes = [2, 64], strides = [1, 1]} : vector<2x256xf32> to vector<2x64xf32>
    %104 = arith.negf %103 : vector<2x64xf32>
    %105 = math.exp %104 : vector<2x64xf32>
    %cst_40 = arith.constant 1.000000e+00 : f32
    %106 = vector.broadcast %cst_40 : f32 to vector<2x64xf32>
    %107 = arith.addf %106, %105 : vector<2x64xf32>
    %108 = arith.divf %106, %107 : vector<2x64xf32>
    %109 = vector.extract_strided_slice %96 {offsets = [0, 128], sizes = [2, 64], strides = [1, 1]} : vector<2x256xf32> to vector<2x64xf32>
    %110 = math.tanh %109 : vector<2x64xf32>
    %111 = vector.extract_strided_slice %96 {offsets = [0, 192], sizes = [2, 64], strides = [1, 1]} : vector<2x256xf32> to vector<2x64xf32>
    %112 = arith.negf %111 : vector<2x64xf32>
    %113 = math.exp %112 : vector<2x64xf32>
    %cst_41 = arith.constant 1.000000e+00 : f32
    %114 = vector.broadcast %cst_41 : f32 to vector<2x64xf32>
    %115 = arith.addf %114, %113 : vector<2x64xf32>
    %116 = arith.divf %114, %115 : vector<2x64xf32>
    %117 = arith.mulf %108, %83 : vector<2x64xf32>
    %118 = arith.mulf %102, %110 : vector<2x64xf32>
    %119 = arith.addf %117, %118 : vector<2x64xf32>
    %120 = math.tanh %119 : vector<2x64xf32>
    %121 = arith.mulf %116, %120 : vector<2x64xf32>
    %122 = vector.shape_cast %121 : vector<2x64xf32> to vector<1x2x1x64xf32>
    %c0_42 = arith.constant 0 : index
    %c0_43 = arith.constant 0 : index
    %123 = arith.index_cast %90 : i32 to index
    %c0_44 = arith.constant 0 : index
    %124 = vector.load %arg5[%c0_42, %c0_43, %123, %c0_44] : memref<1x2x4x64xf32, #tpu.memory_space<vmem>>, vector<1x2x1x64xf32>
    tpu.vector_store %arg5[%c0_42, %c0_43, %123, %c0_44], %122 {strides = array<i32>} : memref<1x2x4x64xf32, #tpu.memory_space<vmem>>, vector<1x2x1x64xf32>,
    %c-3_i32 = arith.constant -3 : i32
    %125 = arith.muli %arg0, %c-3_i32 : i32
    %c3_i32_45 = arith.constant 3 : i32
    %126 = arith.addi %c3_i32_45, %125 : i32
    %c0_46 = arith.constant 0 : index
    %127 = arith.index_cast %126 : i32 to index
    %c0_47 = arith.constant 0 : index
    %128 = vector.load %arg6[%c0_46, %127, %c0_47] : memref<2x4x256xf32, #tpu.memory_space<vmem>>, vector<2x1x256xf32>
    %129 = vector.shape_cast %128 : vector<2x1x256xf32> to vector<2x256xf32>
    %130 = arith.truncf %121 : vector<2x64xf32> to vector<2x64xbf16>
    %cst_48 = arith.constant dense<0.000000e+00> : vector<2x256xf32>
    %131 = tpu.matmul %130, %5, %cst_48 {dimension_numbers = #tpu.dot_dimension_numbers<[1], [0], [0], [1], [0, 0, 1, 1], [], []>} : vector<2x64xbf16>, vector<64x256xbf16>, vector<2x256xf32> -> vector<2x256xf32>
    %132 = arith.addf %129, %131 : vector<2x256xf32>
    %133 = vector.extract_strided_slice %132 {offsets = [0, 0], sizes = [2, 64], strides = [1, 1]} : vector<2x256xf32> to vector<2x64xf32>
    %134 = arith.negf %133 : vector<2x64xf32>
    %135 = math.exp %134 : vector<2x64xf32>
    %cst_49 = arith.constant 1.000000e+00 : f32
    %136 = vector.broadcast %cst_49 : f32 to vector<2x64xf32>
    %137 = arith.addf %136, %135 : vector<2x64xf32>
    %138 = arith.divf %136, %137 : vector<2x64xf32>
    %139 = vector.extract_strided_slice %132 {offsets = [0, 64], sizes = [2, 64], strides = [1, 1]} : vector<2x256xf32> to vector<2x64xf32>
    %140 = arith.negf %139 : vector<2x64xf32>
    %141 = math.exp %140 : vector<2x64xf32>
    %cst_50 = arith.constant 1.000000e+00 : f32
    %142 = vector.broadcast %cst_50 : f32 to vector<2x64xf32>
    %143 = arith.addf %142, %141 : vector<2x64xf32>
    %144 = arith.divf %142, %143 : vector<2x64xf32>
    %145 = vector.extract_strided_slice %132 {offsets = [0, 128], sizes = [2, 64], strides = [1, 1]} : vector<2x256xf32> to vector<2x64xf32>
    %146 = math.tanh %145 : vector<2x64xf32>
    %147 = vector.extract_strided_slice %132 {offsets = [0, 192], sizes = [2, 64], strides = [1, 1]} : vector<2x256xf32> to vector<2x64xf32>
    %148 = arith.negf %147 : vector<2x64xf32>
    %149 = math.exp %148 : vector<2x64xf32>
    %cst_51 = arith.constant 1.000000e+00 : f32
    %150 = vector.broadcast %cst_51 : f32 to vector<2x64xf32>
    %151 = arith.addf %150, %149 : vector<2x64xf32>
    %152 = arith.divf %150, %151 : vector<2x64xf32>
    %153 = arith.mulf %144, %119 : vector<2x64xf32>
    %154 = arith.mulf %138, %146 : vector<2x64xf32>
    %155 = arith.addf %153, %154 : vector<2x64xf32>
    %156 = math.tanh %155 : vector<2x64xf32>
    %157 = arith.mulf %152, %156 : vector<2x64xf32>
    %158 = vector.shape_cast %157 : vector<2x64xf32> to vector<1x2x1x64xf32>
    %c0_52 = arith.constant 0 : index
    %c0_53 = arith.constant 0 : index
    %159 = arith.index_cast %126 : i32 to index
    %c0_54 = arith.constant 0 : index
    %160 = vector.load %arg5[%c0_52, %c0_53, %159, %c0_54] : memref<1x2x4x64xf32, #tpu.memory_space<vmem>>, vector<1x2x1x64xf32>
    tpu.vector_store %arg5[%c0_52, %c0_53, %159, %c0_54], %158 {strides = array<i32>} : memref<1x2x4x64xf32, #tpu.memory_space<vmem>>, vector<1x2x1x64xf32>,
    return
  }
  func.func @transform_0(%arg0: i32) -> (i32, i32, i32, i32) {
    %c0_i32 = arith.constant 0 : i32
    %c0_i32_0 = arith.constant 0 : i32
    %c0_i32_1 = arith.constant 0 : i32
    %c0_i32_2 = arith.constant 0 : i32
    %c0_i32_3 = arith.constant 0 : i32
    return %c0_i32, %c0_i32_0, %c0_i32_1, %c0_i32_2 : i32, i32, i32, i32
  }
  func.func @transform_1(%arg0: i32) -> (i32, i32, i32) {
    %c0_i32 = arith.constant 0 : i32
    %c0_i32_0 = arith.constant 0 : i32
    %c0_i32_1 = arith.constant 0 : i32
    return %arg0, %c0_i32, %c0_i32_0 : i32, i32, i32
  }
  func.func @transform_2(%arg0: i32) -> (i32, i32, i32) {
    %c0_i32 = arith.constant 0 : i32
    %c0_i32_0 = arith.constant 0 : i32
    %c0_i32_1 = arith.constant 0 : i32
    return %arg0, %c0_i32, %c0_i32_0 : i32, i32, i32
  }
  func.func @transform_3(%arg0: i32) -> (i32, i32, i32) {
    %c0_i32 = arith.constant 0 : i32
    %c0_i32_0 = arith.constant 0 : i32
    %c0_i32_1 = arith.constant 0 : i32
    return %arg0, %c0_i32, %c0_i32_0 : i32, i32, i32
  }
  func.func @transform_4(%arg0: i32) -> (i32, i32, i32, i32) {
    %c0_i32 = arith.constant 0 : i32
    %c0_i32_0 = arith.constant 0 : i32
    %c0_i32_1 = arith.constant 0 : i32
    %c0_i32_2 = arith.constant 0 : i32
    return %arg0, %c0_i32, %c0_i32_0, %c0_i32_1 : i32, i32, i32, i32
  }
}

module attributes {stable_mosaic.version = 11 : i64} {
  func.func @lstm_bidir_kernel(%arg0: i32, %arg1: memref<2x2x4x64xf32, #tpu.memory_space<vmem>>, %arg2: memref<1x128x256xbf16, #tpu.memory_space<vmem>>, %arg3: memref<1x64x256xbf16, #tpu.memory_space<vmem>>, %arg4: memref<1x1x256xf32, #tpu.memory_space<vmem>>, %arg5: memref<1x2x4x64xf32, #tpu.memory_space<vmem>>, %arg6: memref<2x4x256xf32, #tpu.memory_space<vmem>>) attributes {dimension_semantics = [#tpu.dimension_semantics<parallel>], iteration_bounds = array<i64: 2>, scalar_prefetch = 0 : i64, scratch_operands = 1 : i64, tpu.core_type = #tpu.core_type<tc>, window_params = [{pipeline_mode = #tpu.pipeline_mode<synchronous>, transform_indices = @transform_0, window_bounds = array<i64: 2, 2, 4, 64>}, {transform_indices = @transform_1, window_bounds = array<i64: 1, 128, 256>}, {transform_indices = @transform_2, window_bounds = array<i64: 1, 64, 256>}, {transform_indices = @transform_3, window_bounds = array<i64: 1, 1, 256>}, {transform_indices = @transform_4, window_bounds = array<i64: 1, 2, 4, 64>}]} {
    %c0 = arith.constant 0 : index
    %c0_0 = arith.constant 0 : index
    %c0_1 = arith.constant 0 : index
    %c0_2 = arith.constant 0 : index
    %0 = vector.load %arg1[%c0, %c0_0, %c0_1, %c0_2] : memref<2x2x4x64xf32, #tpu.memory_space<vmem>>, vector<1x2x4x64xf32>
    %1 = vector.shape_cast %0 : vector<1x2x4x64xf32> to vector<2x4x64xf32>
    %c1 = arith.constant 1 : index
    %c0_3 = arith.constant 0 : index
    %c0_4 = arith.constant 0 : index
    %c0_5 = arith.constant 0 : index
    %2 = vector.load %arg1[%c1, %c0_3, %c0_4, %c0_5] : memref<2x2x4x64xf32, #tpu.memory_space<vmem>>, vector<1x2x4x64xf32>
    %3 = vector.shape_cast %2 : vector<1x2x4x64xf32> to vector<2x4x64xf32>
    %4 = tpu.concatenate %1, %3 in 2 : vector<2x4x64xf32>, vector<2x4x64xf32> -> vector<2x4x128xf32>
    %c0_6 = arith.constant 0 : index
    %c0_7 = arith.constant 0 : index
    %c0_8 = arith.constant 0 : index
    %5 = vector.load %arg2[%c0_6, %c0_7, %c0_8] : memref<1x128x256xbf16, #tpu.memory_space<vmem>>, vector<1x128x256xbf16>
    %6 = vector.shape_cast %5 : vector<1x128x256xbf16> to vector<128x256xbf16>
    %c0_9 = arith.constant 0 : index
    %c0_10 = arith.constant 0 : index
    %c0_11 = arith.constant 0 : index
    %7 = vector.load %arg3[%c0_9, %c0_10, %c0_11] : memref<1x64x256xbf16, #tpu.memory_space<vmem>>, vector<1x64x256xbf16>
    %8 = vector.shape_cast %7 : vector<1x64x256xbf16> to vector<64x256xbf16>
    %c0_12 = arith.constant 0 : index
    %c0_13 = arith.constant 0 : index
    %c0_14 = arith.constant 0 : index
    %9 = vector.load %arg4[%c0_12, %c0_13, %c0_14] : memref<1x1x256xf32, #tpu.memory_space<vmem>>, vector<1x1x256xf32>
    %10 = vector.shape_cast %9 : vector<1x1x256xf32> to vector<1x256xf32>
    %11 = vector.shape_cast %4 : vector<2x4x128xf32> to vector<8x128xf32>
    %12 = arith.truncf %11 : vector<8x128xf32> to vector<8x128xbf16>
    %cst = arith.constant dense<0.000000e+00> : vector<8x256xf32>
    %13 = tpu.matmul %12, %6, %cst {dimension_numbers = #tpu.dot_dimension_numbers<[1], [0], [0], [1], [0, 0, 1, 1], [], []>} : vector<8x128xbf16>, vector<128x256xbf16>, vector<8x256xf32> -> vector<8x256xf32>
    %14 = vector.broadcast %10 : vector<1x256xf32> to vector<8x256xf32>
    %15 = arith.addf %13, %14 : vector<8x256xf32>
    %16 = vector.shape_cast %15 : vector<8x256xf32> to vector<2x4x256xf32>
    %c0_15 = arith.constant 0 : index
    %c0_16 = arith.constant 0 : index
    %c0_17 = arith.constant 0 : index
    %17 = vector.load %arg6[%c0_15, %c0_16, %c0_17] : memref<2x4x256xf32, #tpu.memory_space<vmem>>, vector<2x4x256xf32>
    tpu.vector_store %arg6[%c0_15, %c0_16, %c0_17], %16 {strides = array<i32>} : memref<2x4x256xf32, #tpu.memory_space<vmem>>, vector<2x4x256xf32>,
    %cst_18 = arith.constant 0.000000e+00 : f32
    %18 = vector.broadcast %cst_18 : f32 to vector<2x64xf32>
    %cst_19 = arith.constant 0.000000e+00 : f32
    %19 = vector.broadcast %cst_19 : f32 to vector<2x64xf32>
    %c3_i32 = arith.constant 3 : i32
    %20 = arith.muli %arg0, %c3_i32 : i32
    %c0_i32 = arith.constant 0 : i32
    %21 = arith.addi %c0_i32, %20 : i32
    %c0_20 = arith.constant 0 : index
    %22 = arith.index_cast %21 : i32 to index
    %c0_21 = arith.constant 0 : index
    %23 = vector.load %arg6[%c0_20, %22, %c0_21] : memref<2x4x256xf32, #tpu.memory_space<vmem>>, vector<2x1x256xf32>
    %24 = vector.shape_cast %23 : vector<2x1x256xf32> to vector<2x256xf32>
    %25 = arith.truncf %18 : vector<2x64xf32> to vector<2x64xbf16>
    %cst_22 = arith.constant dense<0.000000e+00> : vector<2x256xf32>
    %26 = tpu.matmul %25, %8, %cst_22 {dimension_numbers = #tpu.dot_dimension_numbers<[1], [0], [0], [1], [0, 0, 1, 1], [], []>} : vector<2x64xbf16>, vector<64x256xbf16>, vector<2x256xf32> -> vector<2x256xf32>
    %27 = arith.addf %24, %26 : vector<2x256xf32>
    %28 = vector.extract_strided_slice %27 {offsets = [0, 0], sizes = [2, 64], strides = [1, 1]} : vector<2x256xf32> to vector<2x64xf32>
    %29 = arith.negf %28 : vector<2x64xf32>
    %30 = math.exp %29 : vector<2x64xf32>
    %cst_23 = arith.constant 1.000000e+00 : f32
    %31 = vector.broadcast %cst_23 : f32 to vector<2x64xf32>
    %32 = arith.addf %31, %30 : vector<2x64xf32>
    %33 = arith.divf %31, %32 : vector<2x64xf32>
    %34 = vector.extract_strided_slice %27 {offsets = [0, 64], sizes = [2, 64], strides = [1, 1]} : vector<2x256xf32> to vector<2x64xf32>
    %35 = arith.negf %34 : vector<2x64xf32>
    %36 = math.exp %35 : vector<2x64xf32>
    %cst_24 = arith.constant 1.000000e+00 : f32
    %37 = vector.broadcast %cst_24 : f32 to vector<2x64xf32>
    %38 = arith.addf %37, %36 : vector<2x64xf32>
    %39 = arith.divf %37, %38 : vector<2x64xf32>
    %40 = vector.extract_strided_slice %27 {offsets = [0, 128], sizes = [2, 64], strides = [1, 1]} : vector<2x256xf32> to vector<2x64xf32>
    %41 = math.tanh %40 : vector<2x64xf32>
    %42 = vector.extract_strided_slice %27 {offsets = [0, 192], sizes = [2, 64], strides = [1, 1]} : vector<2x256xf32> to vector<2x64xf32>
    %43 = arith.negf %42 : vector<2x64xf32>
    %44 = math.exp %43 : vector<2x64xf32>
    %cst_25 = arith.constant 1.000000e+00 : f32
    %45 = vector.broadcast %cst_25 : f32 to vector<2x64xf32>
    %46 = arith.addf %45, %44 : vector<2x64xf32>
    %47 = arith.divf %45, %46 : vector<2x64xf32>
    %48 = arith.mulf %39, %19 : vector<2x64xf32>
    %49 = arith.mulf %33, %41 : vector<2x64xf32>
    %50 = arith.addf %48, %49 : vector<2x64xf32>
    %51 = math.tanh %50 : vector<2x64xf32>
    %52 = arith.mulf %47, %51 : vector<2x64xf32>
    %53 = vector.shape_cast %52 : vector<2x64xf32> to vector<1x2x1x64xf32>
    %c0_26 = arith.constant 0 : index
    %c0_27 = arith.constant 0 : index
    %54 = arith.index_cast %21 : i32 to index
    %c0_28 = arith.constant 0 : index
    %55 = vector.load %arg5[%c0_26, %c0_27, %54, %c0_28] : memref<1x2x4x64xf32, #tpu.memory_space<vmem>>, vector<1x2x1x64xf32>
    tpu.vector_store %arg5[%c0_26, %c0_27, %54, %c0_28], %53 {strides = array<i32>} : memref<1x2x4x64xf32, #tpu.memory_space<vmem>>, vector<1x2x1x64xf32>,
    %c1_i32 = arith.constant 1 : i32
    %56 = arith.muli %arg0, %c1_i32 : i32
    %c1_i32_29 = arith.constant 1 : i32
    %57 = arith.addi %c1_i32_29, %56 : i32
    %c0_30 = arith.constant 0 : index
    %58 = arith.index_cast %57 : i32 to index
    %c0_31 = arith.constant 0 : index
    %59 = vector.load %arg6[%c0_30, %58, %c0_31] : memref<2x4x256xf32, #tpu.memory_space<vmem>>, vector<2x1x256xf32>
    %60 = vector.shape_cast %59 : vector<2x1x256xf32> to vector<2x256xf32>
    %61 = arith.truncf %52 : vector<2x64xf32> to vector<2x64xbf16>
    %cst_32 = arith.constant dense<0.000000e+00> : vector<2x256xf32>
    %62 = tpu.matmul %61, %8, %cst_32 {dimension_numbers = #tpu.dot_dimension_numbers<[1], [0], [0], [1], [0, 0, 1, 1], [], []>} : vector<2x64xbf16>, vector<64x256xbf16>, vector<2x256xf32> -> vector<2x256xf32>
    %63 = arith.addf %60, %62 : vector<2x256xf32>
    %64 = vector.extract_strided_slice %63 {offsets = [0, 0], sizes = [2, 64], strides = [1, 1]} : vector<2x256xf32> to vector<2x64xf32>
    %65 = arith.negf %64 : vector<2x64xf32>
    %66 = math.exp %65 : vector<2x64xf32>
    %cst_33 = arith.constant 1.000000e+00 : f32
    %67 = vector.broadcast %cst_33 : f32 to vector<2x64xf32>
    %68 = arith.addf %67, %66 : vector<2x64xf32>
    %69 = arith.divf %67, %68 : vector<2x64xf32>
    %70 = vector.extract_strided_slice %63 {offsets = [0, 64], sizes = [2, 64], strides = [1, 1]} : vector<2x256xf32> to vector<2x64xf32>
    %71 = arith.negf %70 : vector<2x64xf32>
    %72 = math.exp %71 : vector<2x64xf32>
    %cst_34 = arith.constant 1.000000e+00 : f32
    %73 = vector.broadcast %cst_34 : f32 to vector<2x64xf32>
    %74 = arith.addf %73, %72 : vector<2x64xf32>
    %75 = arith.divf %73, %74 : vector<2x64xf32>
    %76 = vector.extract_strided_slice %63 {offsets = [0, 128], sizes = [2, 64], strides = [1, 1]} : vector<2x256xf32> to vector<2x64xf32>
    %77 = math.tanh %76 : vector<2x64xf32>
    %78 = vector.extract_strided_slice %63 {offsets = [0, 192], sizes = [2, 64], strides = [1, 1]} : vector<2x256xf32> to vector<2x64xf32>
    %79 = arith.negf %78 : vector<2x64xf32>
    %80 = math.exp %79 : vector<2x64xf32>
    %cst_35 = arith.constant 1.000000e+00 : f32
    %81 = vector.broadcast %cst_35 : f32 to vector<2x64xf32>
    %82 = arith.addf %81, %80 : vector<2x64xf32>
    %83 = arith.divf %81, %82 : vector<2x64xf32>
    %84 = arith.mulf %75, %50 : vector<2x64xf32>
    %85 = arith.mulf %69, %77 : vector<2x64xf32>
    %86 = arith.addf %84, %85 : vector<2x64xf32>
    %87 = math.tanh %86 : vector<2x64xf32>
    %88 = arith.mulf %83, %87 : vector<2x64xf32>
    %89 = vector.shape_cast %88 : vector<2x64xf32> to vector<1x2x1x64xf32>
    %c0_36 = arith.constant 0 : index
    %c0_37 = arith.constant 0 : index
    %90 = arith.index_cast %57 : i32 to index
    %c0_38 = arith.constant 0 : index
    %91 = vector.load %arg5[%c0_36, %c0_37, %90, %c0_38] : memref<1x2x4x64xf32, #tpu.memory_space<vmem>>, vector<1x2x1x64xf32>
    tpu.vector_store %arg5[%c0_36, %c0_37, %90, %c0_38], %89 {strides = array<i32>} : memref<1x2x4x64xf32, #tpu.memory_space<vmem>>, vector<1x2x1x64xf32>,
    %c-1_i32 = arith.constant -1 : i32
    %92 = arith.muli %arg0, %c-1_i32 : i32
    %c2_i32 = arith.constant 2 : i32
    %93 = arith.addi %c2_i32, %92 : i32
    %c0_39 = arith.constant 0 : index
    %94 = arith.index_cast %93 : i32 to index
    %c0_40 = arith.constant 0 : index
    %95 = vector.load %arg6[%c0_39, %94, %c0_40] : memref<2x4x256xf32, #tpu.memory_space<vmem>>, vector<2x1x256xf32>
    %96 = vector.shape_cast %95 : vector<2x1x256xf32> to vector<2x256xf32>
    %97 = arith.truncf %88 : vector<2x64xf32> to vector<2x64xbf16>
    %cst_41 = arith.constant dense<0.000000e+00> : vector<2x256xf32>
    %98 = tpu.matmul %97, %8, %cst_41 {dimension_numbers = #tpu.dot_dimension_numbers<[1], [0], [0], [1], [0, 0, 1, 1], [], []>} : vector<2x64xbf16>, vector<64x256xbf16>, vector<2x256xf32> -> vector<2x256xf32>
    %99 = arith.addf %96, %98 : vector<2x256xf32>
    %100 = vector.extract_strided_slice %99 {offsets = [0, 0], sizes = [2, 64], strides = [1, 1]} : vector<2x256xf32> to vector<2x64xf32>
    %101 = arith.negf %100 : vector<2x64xf32>
    %102 = math.exp %101 : vector<2x64xf32>
    %cst_42 = arith.constant 1.000000e+00 : f32
    %103 = vector.broadcast %cst_42 : f32 to vector<2x64xf32>
    %104 = arith.addf %103, %102 : vector<2x64xf32>
    %105 = arith.divf %103, %104 : vector<2x64xf32>
    %106 = vector.extract_strided_slice %99 {offsets = [0, 64], sizes = [2, 64], strides = [1, 1]} : vector<2x256xf32> to vector<2x64xf32>
    %107 = arith.negf %106 : vector<2x64xf32>
    %108 = math.exp %107 : vector<2x64xf32>
    %cst_43 = arith.constant 1.000000e+00 : f32
    %109 = vector.broadcast %cst_43 : f32 to vector<2x64xf32>
    %110 = arith.addf %109, %108 : vector<2x64xf32>
    %111 = arith.divf %109, %110 : vector<2x64xf32>
    %112 = vector.extract_strided_slice %99 {offsets = [0, 128], sizes = [2, 64], strides = [1, 1]} : vector<2x256xf32> to vector<2x64xf32>
    %113 = math.tanh %112 : vector<2x64xf32>
    %114 = vector.extract_strided_slice %99 {offsets = [0, 192], sizes = [2, 64], strides = [1, 1]} : vector<2x256xf32> to vector<2x64xf32>
    %115 = arith.negf %114 : vector<2x64xf32>
    %116 = math.exp %115 : vector<2x64xf32>
    %cst_44 = arith.constant 1.000000e+00 : f32
    %117 = vector.broadcast %cst_44 : f32 to vector<2x64xf32>
    %118 = arith.addf %117, %116 : vector<2x64xf32>
    %119 = arith.divf %117, %118 : vector<2x64xf32>
    %120 = arith.mulf %111, %86 : vector<2x64xf32>
    %121 = arith.mulf %105, %113 : vector<2x64xf32>
    %122 = arith.addf %120, %121 : vector<2x64xf32>
    %123 = math.tanh %122 : vector<2x64xf32>
    %124 = arith.mulf %119, %123 : vector<2x64xf32>
    %125 = vector.shape_cast %124 : vector<2x64xf32> to vector<1x2x1x64xf32>
    %c0_45 = arith.constant 0 : index
    %c0_46 = arith.constant 0 : index
    %126 = arith.index_cast %93 : i32 to index
    %c0_47 = arith.constant 0 : index
    %127 = vector.load %arg5[%c0_45, %c0_46, %126, %c0_47] : memref<1x2x4x64xf32, #tpu.memory_space<vmem>>, vector<1x2x1x64xf32>
    tpu.vector_store %arg5[%c0_45, %c0_46, %126, %c0_47], %125 {strides = array<i32>} : memref<1x2x4x64xf32, #tpu.memory_space<vmem>>, vector<1x2x1x64xf32>,
    %c-3_i32 = arith.constant -3 : i32
    %128 = arith.muli %arg0, %c-3_i32 : i32
    %c3_i32_48 = arith.constant 3 : i32
    %129 = arith.addi %c3_i32_48, %128 : i32
    %c0_49 = arith.constant 0 : index
    %130 = arith.index_cast %129 : i32 to index
    %c0_50 = arith.constant 0 : index
    %131 = vector.load %arg6[%c0_49, %130, %c0_50] : memref<2x4x256xf32, #tpu.memory_space<vmem>>, vector<2x1x256xf32>
    %132 = vector.shape_cast %131 : vector<2x1x256xf32> to vector<2x256xf32>
    %133 = arith.truncf %124 : vector<2x64xf32> to vector<2x64xbf16>
    %cst_51 = arith.constant dense<0.000000e+00> : vector<2x256xf32>
    %134 = tpu.matmul %133, %8, %cst_51 {dimension_numbers = #tpu.dot_dimension_numbers<[1], [0], [0], [1], [0, 0, 1, 1], [], []>} : vector<2x64xbf16>, vector<64x256xbf16>, vector<2x256xf32> -> vector<2x256xf32>
    %135 = arith.addf %132, %134 : vector<2x256xf32>
    %136 = vector.extract_strided_slice %135 {offsets = [0, 0], sizes = [2, 64], strides = [1, 1]} : vector<2x256xf32> to vector<2x64xf32>
    %137 = arith.negf %136 : vector<2x64xf32>
    %138 = math.exp %137 : vector<2x64xf32>
    %cst_52 = arith.constant 1.000000e+00 : f32
    %139 = vector.broadcast %cst_52 : f32 to vector<2x64xf32>
    %140 = arith.addf %139, %138 : vector<2x64xf32>
    %141 = arith.divf %139, %140 : vector<2x64xf32>
    %142 = vector.extract_strided_slice %135 {offsets = [0, 64], sizes = [2, 64], strides = [1, 1]} : vector<2x256xf32> to vector<2x64xf32>
    %143 = arith.negf %142 : vector<2x64xf32>
    %144 = math.exp %143 : vector<2x64xf32>
    %cst_53 = arith.constant 1.000000e+00 : f32
    %145 = vector.broadcast %cst_53 : f32 to vector<2x64xf32>
    %146 = arith.addf %145, %144 : vector<2x64xf32>
    %147 = arith.divf %145, %146 : vector<2x64xf32>
    %148 = vector.extract_strided_slice %135 {offsets = [0, 128], sizes = [2, 64], strides = [1, 1]} : vector<2x256xf32> to vector<2x64xf32>
    %149 = math.tanh %148 : vector<2x64xf32>
    %150 = vector.extract_strided_slice %135 {offsets = [0, 192], sizes = [2, 64], strides = [1, 1]} : vector<2x256xf32> to vector<2x64xf32>
    %151 = arith.negf %150 : vector<2x64xf32>
    %152 = math.exp %151 : vector<2x64xf32>
    %cst_54 = arith.constant 1.000000e+00 : f32
    %153 = vector.broadcast %cst_54 : f32 to vector<2x64xf32>
    %154 = arith.addf %153, %152 : vector<2x64xf32>
    %155 = arith.divf %153, %154 : vector<2x64xf32>
    %156 = arith.mulf %147, %122 : vector<2x64xf32>
    %157 = arith.mulf %141, %149 : vector<2x64xf32>
    %158 = arith.addf %156, %157 : vector<2x64xf32>
    %159 = math.tanh %158 : vector<2x64xf32>
    %160 = arith.mulf %155, %159 : vector<2x64xf32>
    %161 = vector.shape_cast %160 : vector<2x64xf32> to vector<1x2x1x64xf32>
    %c0_55 = arith.constant 0 : index
    %c0_56 = arith.constant 0 : index
    %162 = arith.index_cast %129 : i32 to index
    %c0_57 = arith.constant 0 : index
    %163 = vector.load %arg5[%c0_55, %c0_56, %162, %c0_57] : memref<1x2x4x64xf32, #tpu.memory_space<vmem>>, vector<1x2x1x64xf32>
    tpu.vector_store %arg5[%c0_55, %c0_56, %162, %c0_57], %161 {strides = array<i32>} : memref<1x2x4x64xf32, #tpu.memory_space<vmem>>, vector<1x2x1x64xf32>,
    return
  }
  func.func @transform_0(%arg0: i32) -> (i32, i32, i32, i32) {
    %c0_i32 = arith.constant 0 : i32
    %c0_i32_0 = arith.constant 0 : i32
    %c0_i32_1 = arith.constant 0 : i32
    %c0_i32_2 = arith.constant 0 : i32
    %c0_i32_3 = arith.constant 0 : i32
    return %c0_i32, %c0_i32_0, %c0_i32_1, %c0_i32_2 : i32, i32, i32, i32
  }
  func.func @transform_1(%arg0: i32) -> (i32, i32, i32) {
    %c0_i32 = arith.constant 0 : i32
    %c0_i32_0 = arith.constant 0 : i32
    %c0_i32_1 = arith.constant 0 : i32
    return %arg0, %c0_i32, %c0_i32_0 : i32, i32, i32
  }
  func.func @transform_2(%arg0: i32) -> (i32, i32, i32) {
    %c0_i32 = arith.constant 0 : i32
    %c0_i32_0 = arith.constant 0 : i32
    %c0_i32_1 = arith.constant 0 : i32
    return %arg0, %c0_i32, %c0_i32_0 : i32, i32, i32
  }
  func.func @transform_3(%arg0: i32) -> (i32, i32, i32) {
    %c0_i32 = arith.constant 0 : i32
    %c0_i32_0 = arith.constant 0 : i32
    %c0_i32_1 = arith.constant 0 : i32
    return %arg0, %c0_i32, %c0_i32_0 : i32, i32, i32
  }
  func.func @transform_4(%arg0: i32) -> (i32, i32, i32, i32) {
    %c0_i32 = arith.constant 0 : i32
    %c0_i32_0 = arith.constant 0 : i32
    %c0_i32_1 = arith.constant 0 : i32
    %c0_i32_2 = arith.constant 0 : i32
    return %arg0, %c0_i32, %c0_i32_0, %c0_i32_1 : i32, i32, i32, i32
  }
}

module attributes {stable_mosaic.version = 11 : i64} {
  func.func @conv_stack_kernel(%arg0: i32, %arg1: memref<1x32x13xf32, #tpu.memory_space<vmem>>, %arg2: memref<5x13x64xbf16, #tpu.memory_space<vmem>>, %arg3: memref<2x64xf32, #tpu.memory_space<vmem>>, %arg4: memref<320x64xbf16, #tpu.memory_space<vmem>>, %arg5: memref<2x64xf32, #tpu.memory_space<vmem>>, %arg6: memref<320x128xbf16, #tpu.memory_space<vmem>>, %arg7: memref<2x128xf32, #tpu.memory_space<vmem>>, %arg8: memref<1x4x128xf32, #tpu.memory_space<vmem>>, %arg9: memref<32x64xf32, #tpu.memory_space<vmem>>, %arg10: memref<16x64xf32, #tpu.memory_space<vmem>>, %arg11: memref<8x128xf32, #tpu.memory_space<vmem>>) attributes {dimension_semantics = [#tpu.dimension_semantics<parallel>], iteration_bounds = array<i64: 2>, scalar_prefetch = 0 : i64, scratch_operands = 3 : i64, tpu.core_type = #tpu.core_type<tc>, window_params = [{transform_indices = @transform_0, window_bounds = array<i64: 1, 32, 13>}, {pipeline_mode = #tpu.pipeline_mode<synchronous>, transform_indices = @transform_1, window_bounds = array<i64: 5, 13, 64>}, {pipeline_mode = #tpu.pipeline_mode<synchronous>, transform_indices = @transform_2, window_bounds = array<i64: 2, 64>}, {pipeline_mode = #tpu.pipeline_mode<synchronous>, transform_indices = @transform_3, window_bounds = array<i64: 320, 64>}, {pipeline_mode = #tpu.pipeline_mode<synchronous>, transform_indices = @transform_4, window_bounds = array<i64: 2, 64>}, {pipeline_mode = #tpu.pipeline_mode<synchronous>, transform_indices = @transform_5, window_bounds = array<i64: 320, 128>}, {pipeline_mode = #tpu.pipeline_mode<synchronous>, transform_indices = @transform_6, window_bounds = array<i64: 2, 128>}, {transform_indices = @transform_7, window_bounds = array<i64: 1, 4, 128>}]} {
    %c0 = arith.constant 0 : index
    %c0_0 = arith.constant 0 : index
    %c0_1 = arith.constant 0 : index
    %0 = vector.load %arg1[%c0, %c0_0, %c0_1] : memref<1x32x13xf32, #tpu.memory_space<vmem>>, vector<1x32x13xf32>
    %1 = vector.shape_cast %0 : vector<1x32x13xf32> to vector<32x13xf32>
    %2 = arith.truncf %1 : vector<32x13xf32> to vector<32x13xbf16>
    %3 = tpu.iota {dimensions = array<i32: 0>} : vector<32x64xi32>
    %cst = arith.constant 0.000000e+00 : f32
    %4 = vector.broadcast %cst : f32 to vector<32x64xf32>
    %c0_2 = arith.constant 0 : index
    %c0_3 = arith.constant 0 : index
    %c0_4 = arith.constant 0 : index
    %5 = vector.load %arg2[%c0_2, %c0_3, %c0_4] : memref<5x13x64xbf16, #tpu.memory_space<vmem>>, vector<1x13x64xbf16>
    %6 = vector.shape_cast %5 : vector<1x13x64xbf16> to vector<13x64xbf16>
    %cst_5 = arith.constant dense<0.000000e+00> : vector<32x64xf32>
    %7 = tpu.matmul %2, %6, %cst_5 {dimension_numbers = #tpu.dot_dimension_numbers<[1], [0], [0], [1], [0, 0, 1, 1], [], []>} : vector<32x13xbf16>, vector<13x64xbf16>, vector<32x64xf32> -> vector<32x64xf32>
    %c2_i32 = arith.constant 2 : i32
    %8 = tpu.dynamic_rotate %7 by %c2_i32 dim 0 : vector<32x64xf32>, i32 -> vector<32x64xf32>
    %c-2_i32 = arith.constant -2 : i32
    %9 = vector.broadcast %c-2_i32 : i32 to vector<32x64xi32>
    %10 = arith.addi %3, %9 : vector<32x64xi32>
    %c0_i32 = arith.constant 0 : i32
    %11 = vector.broadcast %c0_i32 : i32 to vector<32x64xi32>
    %12 = arith.cmpi sge, %10, %11 : vector<32x64xi32>
    %c-2_i32_6 = arith.constant -2 : i32
    %13 = vector.broadcast %c-2_i32_6 : i32 to vector<32x64xi32>
    %14 = arith.addi %3, %13 : vector<32x64xi32>
    %c31_i32 = arith.constant 31 : i32
    %15 = vector.broadcast %c31_i32 : i32 to vector<32x64xi32>
    %16 = arith.cmpi sle, %14, %15 : vector<32x64xi32>
    %17 = arith.andi %12, %16 : vector<32x64xi1>
    %cst_7 = arith.constant 0.000000e+00 : f32
    %18 = vector.broadcast %cst_7 : f32 to vector<32x64xf32>
    %19 = arith.select %17, %8, %18 : vector<32x64xi1>, vector<32x64xf32>
    %20 = arith.addf %4, %19 : vector<32x64xf32>
    %c1 = arith.constant 1 : index
    %c0_8 = arith.constant 0 : index
    %c0_9 = arith.constant 0 : index
    %21 = vector.load %arg2[%c1, %c0_8, %c0_9] : memref<5x13x64xbf16, #tpu.memory_space<vmem>>, vector<1x13x64xbf16>
    %22 = vector.shape_cast %21 : vector<1x13x64xbf16> to vector<13x64xbf16>
    %cst_10 = arith.constant dense<0.000000e+00> : vector<32x64xf32>
    %23 = tpu.matmul %2, %22, %cst_10 {dimension_numbers = #tpu.dot_dimension_numbers<[1], [0], [0], [1], [0, 0, 1, 1], [], []>} : vector<32x13xbf16>, vector<13x64xbf16>, vector<32x64xf32> -> vector<32x64xf32>
    %c1_i32 = arith.constant 1 : i32
    %24 = tpu.dynamic_rotate %23 by %c1_i32 dim 0 : vector<32x64xf32>, i32 -> vector<32x64xf32>
    %c-1_i32 = arith.constant -1 : i32
    %25 = vector.broadcast %c-1_i32 : i32 to vector<32x64xi32>
    %26 = arith.addi %3, %25 : vector<32x64xi32>
    %c0_i32_11 = arith.constant 0 : i32
    %27 = vector.broadcast %c0_i32_11 : i32 to vector<32x64xi32>
    %28 = arith.cmpi sge, %26, %27 : vector<32x64xi32>
    %c-1_i32_12 = arith.constant -1 : i32
    %29 = vector.broadcast %c-1_i32_12 : i32 to vector<32x64xi32>
    %30 = arith.addi %3, %29 : vector<32x64xi32>
    %c31_i32_13 = arith.constant 31 : i32
    %31 = vector.broadcast %c31_i32_13 : i32 to vector<32x64xi32>
    %32 = arith.cmpi sle, %30, %31 : vector<32x64xi32>
    %33 = arith.andi %28, %32 : vector<32x64xi1>
    %cst_14 = arith.constant 0.000000e+00 : f32
    %34 = vector.broadcast %cst_14 : f32 to vector<32x64xf32>
    %35 = arith.select %33, %24, %34 : vector<32x64xi1>, vector<32x64xf32>
    %36 = arith.addf %20, %35 : vector<32x64xf32>
    %c2 = arith.constant 2 : index
    %c0_15 = arith.constant 0 : index
    %c0_16 = arith.constant 0 : index
    %37 = vector.load %arg2[%c2, %c0_15, %c0_16] : memref<5x13x64xbf16, #tpu.memory_space<vmem>>, vector<1x13x64xbf16>
    %38 = vector.shape_cast %37 : vector<1x13x64xbf16> to vector<13x64xbf16>
    %cst_17 = arith.constant dense<0.000000e+00> : vector<32x64xf32>
    %39 = tpu.matmul %2, %38, %cst_17 {dimension_numbers = #tpu.dot_dimension_numbers<[1], [0], [0], [1], [0, 0, 1, 1], [], []>} : vector<32x13xbf16>, vector<13x64xbf16>, vector<32x64xf32> -> vector<32x64xf32>
    %40 = arith.addf %36, %39 : vector<32x64xf32>
    %c3 = arith.constant 3 : index
    %c0_18 = arith.constant 0 : index
    %c0_19 = arith.constant 0 : index
    %41 = vector.load %arg2[%c3, %c0_18, %c0_19] : memref<5x13x64xbf16, #tpu.memory_space<vmem>>, vector<1x13x64xbf16>
    %42 = vector.shape_cast %41 : vector<1x13x64xbf16> to vector<13x64xbf16>
    %cst_20 = arith.constant dense<0.000000e+00> : vector<32x64xf32>
    %43 = tpu.matmul %2, %42, %cst_20 {dimension_numbers = #tpu.dot_dimension_numbers<[1], [0], [0], [1], [0, 0, 1, 1], [], []>} : vector<32x13xbf16>, vector<13x64xbf16>, vector<32x64xf32> -> vector<32x64xf32>
    %c31_i32_21 = arith.constant 31 : i32
    %44 = tpu.dynamic_rotate %43 by %c31_i32_21 dim 0 : vector<32x64xf32>, i32 -> vector<32x64xf32>
    %c1_i32_22 = arith.constant 1 : i32
    %45 = vector.broadcast %c1_i32_22 : i32 to vector<32x64xi32>
    %46 = arith.addi %3, %45 : vector<32x64xi32>
    %c0_i32_23 = arith.constant 0 : i32
    %47 = vector.broadcast %c0_i32_23 : i32 to vector<32x64xi32>
    %48 = arith.cmpi sge, %46, %47 : vector<32x64xi32>
    %c1_i32_24 = arith.constant 1 : i32
    %49 = vector.broadcast %c1_i32_24 : i32 to vector<32x64xi32>
    %50 = arith.addi %3, %49 : vector<32x64xi32>
    %c31_i32_25 = arith.constant 31 : i32
    %51 = vector.broadcast %c31_i32_25 : i32 to vector<32x64xi32>
    %52 = arith.cmpi sle, %50, %51 : vector<32x64xi32>
    %53 = arith.andi %48, %52 : vector<32x64xi1>
    %cst_26 = arith.constant 0.000000e+00 : f32
    %54 = vector.broadcast %cst_26 : f32 to vector<32x64xf32>
    %55 = arith.select %53, %44, %54 : vector<32x64xi1>, vector<32x64xf32>
    %56 = arith.addf %40, %55 : vector<32x64xf32>
    %c4 = arith.constant 4 : index
    %c0_27 = arith.constant 0 : index
    %c0_28 = arith.constant 0 : index
    %57 = vector.load %arg2[%c4, %c0_27, %c0_28] : memref<5x13x64xbf16, #tpu.memory_space<vmem>>, vector<1x13x64xbf16>
    %58 = vector.shape_cast %57 : vector<1x13x64xbf16> to vector<13x64xbf16>
    %cst_29 = arith.constant dense<0.000000e+00> : vector<32x64xf32>
    %59 = tpu.matmul %2, %58, %cst_29 {dimension_numbers = #tpu.dot_dimension_numbers<[1], [0], [0], [1], [0, 0, 1, 1], [], []>} : vector<32x13xbf16>, vector<13x64xbf16>, vector<32x64xf32> -> vector<32x64xf32>
    %c30_i32 = arith.constant 30 : i32
    %60 = tpu.dynamic_rotate %59 by %c30_i32 dim 0 : vector<32x64xf32>, i32 -> vector<32x64xf32>
    %c2_i32_30 = arith.constant 2 : i32
    %61 = vector.broadcast %c2_i32_30 : i32 to vector<32x64xi32>
    %62 = arith.addi %3, %61 : vector<32x64xi32>
    %c0_i32_31 = arith.constant 0 : i32
    %63 = vector.broadcast %c0_i32_31 : i32 to vector<32x64xi32>
    %64 = arith.cmpi sge, %62, %63 : vector<32x64xi32>
    %c2_i32_32 = arith.constant 2 : i32
    %65 = vector.broadcast %c2_i32_32 : i32 to vector<32x64xi32>
    %66 = arith.addi %3, %65 : vector<32x64xi32>
    %c31_i32_33 = arith.constant 31 : i32
    %67 = vector.broadcast %c31_i32_33 : i32 to vector<32x64xi32>
    %68 = arith.cmpi sle, %66, %67 : vector<32x64xi32>
    %69 = arith.andi %64, %68 : vector<32x64xi1>
    %cst_34 = arith.constant 0.000000e+00 : f32
    %70 = vector.broadcast %cst_34 : f32 to vector<32x64xf32>
    %71 = arith.select %69, %60, %70 : vector<32x64xi1>, vector<32x64xf32>
    %72 = arith.addf %56, %71 : vector<32x64xf32>
    %c0_35 = arith.constant 0 : index
    %c0_36 = arith.constant 0 : index
    %73 = vector.load %arg3[%c0_35, %c0_36] : memref<2x64xf32, #tpu.memory_space<vmem>>, vector<1x64xf32>
    %74 = vector.broadcast %73 : vector<1x64xf32> to vector<32x64xf32>
    %75 = arith.mulf %72, %74 : vector<32x64xf32>
    %c1_37 = arith.constant 1 : index
    %c0_38 = arith.constant 0 : index
    %76 = vector.load %arg3[%c1_37, %c0_38] : memref<2x64xf32, #tpu.memory_space<vmem>>, vector<1x64xf32>
    %77 = vector.broadcast %76 : vector<1x64xf32> to vector<32x64xf32>
    %78 = arith.addf %75, %77 : vector<32x64xf32>
    %cst_39 = arith.constant 0.000000e+00 : f32
    %79 = vector.broadcast %cst_39 : f32 to vector<32x64xf32>
    %80 = arith.maximumf %78, %79 : vector<32x64xf32>
    %c0_40 = arith.constant 0 : index
    %c0_41 = arith.constant 0 : index
    %81 = vector.load %arg9[%c0_40, %c0_41] : memref<32x64xf32, #tpu.memory_space<vmem>>, vector<32x64xf32>
    tpu.vector_store %arg9[%c0_40, %c0_41], %80 {strides = array<i32>} : memref<32x64xf32, #tpu.memory_space<vmem>>, vector<32x64xf32>,
    %c0_42 = arith.constant 0 : index
    %c0_43 = arith.constant 0 : index
    %82 = tpu.strided_load %arg9[%c0_42, %c0_43] {strides = array<i32: 2, 1>} : memref<32x64xf32, #tpu.memory_space<vmem>>, vector<16x64xf32>
    %c1_44 = arith.constant 1 : index
    %c0_45 = arith.constant 0 : index
    %83 = tpu.strided_load %arg9[%c1_44, %c0_45] {strides = array<i32: 2, 1>} : memref<32x64xf32, #tpu.memory_space<vmem>>, vector<16x64xf32>
    %84 = arith.maximumf %82, %83 : vector<16x64xf32>
    %85 = tpu.iota {dimensions = array<i32: 0>} : vector<16x64xi32>
    %c2_i32_46 = arith.constant 2 : i32
    %86 = tpu.dynamic_rotate %84 by %c2_i32_46 dim 0 : vector<16x64xf32>, i32 -> vector<16x64xf32>
    %c-2_i32_47 = arith.constant -2 : i32
    %87 = vector.broadcast %c-2_i32_47 : i32 to vector<16x64xi32>
    %88 = arith.addi %85, %87 : vector<16x64xi32>
    %c0_i32_48 = arith.constant 0 : i32
    %89 = vector.broadcast %c0_i32_48 : i32 to vector<16x64xi32>
    %90 = arith.cmpi sge, %88, %89 : vector<16x64xi32>
    %c-2_i32_49 = arith.constant -2 : i32
    %91 = vector.broadcast %c-2_i32_49 : i32 to vector<16x64xi32>
    %92 = arith.addi %85, %91 : vector<16x64xi32>
    %c15_i32 = arith.constant 15 : i32
    %93 = vector.broadcast %c15_i32 : i32 to vector<16x64xi32>
    %94 = arith.cmpi sle, %92, %93 : vector<16x64xi32>
    %95 = arith.andi %90, %94 : vector<16x64xi1>
    %cst_50 = arith.constant 0.000000e+00 : f32
    %96 = vector.broadcast %cst_50 : f32 to vector<16x64xf32>
    %97 = arith.select %95, %86, %96 : vector<16x64xi1>, vector<16x64xf32>
    %c1_i32_51 = arith.constant 1 : i32
    %98 = tpu.dynamic_rotate %84 by %c1_i32_51 dim 0 : vector<16x64xf32>, i32 -> vector<16x64xf32>
    %c-1_i32_52 = arith.constant -1 : i32
    %99 = vector.broadcast %c-1_i32_52 : i32 to vector<16x64xi32>
    %100 = arith.addi %85, %99 : vector<16x64xi32>
    %c0_i32_53 = arith.constant 0 : i32
    %101 = vector.broadcast %c0_i32_53 : i32 to vector<16x64xi32>
    %102 = arith.cmpi sge, %100, %101 : vector<16x64xi32>
    %c-1_i32_54 = arith.constant -1 : i32
    %103 = vector.broadcast %c-1_i32_54 : i32 to vector<16x64xi32>
    %104 = arith.addi %85, %103 : vector<16x64xi32>
    %c15_i32_55 = arith.constant 15 : i32
    %105 = vector.broadcast %c15_i32_55 : i32 to vector<16x64xi32>
    %106 = arith.cmpi sle, %104, %105 : vector<16x64xi32>
    %107 = arith.andi %102, %106 : vector<16x64xi1>
    %cst_56 = arith.constant 0.000000e+00 : f32
    %108 = vector.broadcast %cst_56 : f32 to vector<16x64xf32>
    %109 = arith.select %107, %98, %108 : vector<16x64xi1>, vector<16x64xf32>
    %c15_i32_57 = arith.constant 15 : i32
    %110 = tpu.dynamic_rotate %84 by %c15_i32_57 dim 0 : vector<16x64xf32>, i32 -> vector<16x64xf32>
    %c1_i32_58 = arith.constant 1 : i32
    %111 = vector.broadcast %c1_i32_58 : i32 to vector<16x64xi32>
    %112 = arith.addi %85, %111 : vector<16x64xi32>
    %c0_i32_59 = arith.constant 0 : i32
    %113 = vector.broadcast %c0_i32_59 : i32 to vector<16x64xi32>
    %114 = arith.cmpi sge, %112, %113 : vector<16x64xi32>
    %c1_i32_60 = arith.constant 1 : i32
    %115 = vector.broadcast %c1_i32_60 : i32 to vector<16x64xi32>
    %116 = arith.addi %85, %115 : vector<16x64xi32>
    %c15_i32_61 = arith.constant 15 : i32
    %117 = vector.broadcast %c15_i32_61 : i32 to vector<16x64xi32>
    %118 = arith.cmpi sle, %116, %117 : vector<16x64xi32>
    %119 = arith.andi %114, %118 : vector<16x64xi1>
    %cst_62 = arith.constant 0.000000e+00 : f32
    %120 = vector.broadcast %cst_62 : f32 to vector<16x64xf32>
    %121 = arith.select %119, %110, %120 : vector<16x64xi1>, vector<16x64xf32>
    %c14_i32 = arith.constant 14 : i32
    %122 = tpu.dynamic_rotate %84 by %c14_i32 dim 0 : vector<16x64xf32>, i32 -> vector<16x64xf32>
    %c2_i32_63 = arith.constant 2 : i32
    %123 = vector.broadcast %c2_i32_63 : i32 to vector<16x64xi32>
    %124 = arith.addi %85, %123 : vector<16x64xi32>
    %c0_i32_64 = arith.constant 0 : i32
    %125 = vector.broadcast %c0_i32_64 : i32 to vector<16x64xi32>
    %126 = arith.cmpi sge, %124, %125 : vector<16x64xi32>
    %c2_i32_65 = arith.constant 2 : i32
    %127 = vector.broadcast %c2_i32_65 : i32 to vector<16x64xi32>
    %128 = arith.addi %85, %127 : vector<16x64xi32>
    %c15_i32_66 = arith.constant 15 : i32
    %129 = vector.broadcast %c15_i32_66 : i32 to vector<16x64xi32>
    %130 = arith.cmpi sle, %128, %129 : vector<16x64xi32>
    %131 = arith.andi %126, %130 : vector<16x64xi1>
    %cst_67 = arith.constant 0.000000e+00 : f32
    %132 = vector.broadcast %cst_67 : f32 to vector<16x64xf32>
    %133 = arith.select %131, %122, %132 : vector<16x64xi1>, vector<16x64xf32>
    %134 = tpu.concatenate %97, %109, %84, %121, %133 in 1 : vector<16x64xf32>, vector<16x64xf32>, vector<16x64xf32>, vector<16x64xf32>, vector<16x64xf32> -> vector<16x320xf32>
    %135 = arith.truncf %134 : vector<16x320xf32> to vector<16x320xbf16>
    %c0_68 = arith.constant 0 : index
    %c0_69 = arith.constant 0 : index
    %136 = vector.load %arg4[%c0_68, %c0_69] : memref<320x64xbf16, #tpu.memory_space<vmem>>, vector<320x64xbf16>
    %cst_70 = arith.constant dense<0.000000e+00> : vector<16x64xf32>
    %137 = tpu.matmul %135, %136, %cst_70 {dimension_numbers = #tpu.dot_dimension_numbers<[1], [0], [0], [1], [0, 0, 1, 1], [], []>} : vector<16x320xbf16>, vector<320x64xbf16>, vector<16x64xf32> -> vector<16x64xf32>
    %c0_71 = arith.constant 0 : index
    %c0_72 = arith.constant 0 : index
    %138 = vector.load %arg5[%c0_71, %c0_72] : memref<2x64xf32, #tpu.memory_space<vmem>>, vector<1x64xf32>
    %139 = vector.broadcast %138 : vector<1x64xf32> to vector<16x64xf32>
    %140 = arith.mulf %137, %139 : vector<16x64xf32>
    %c1_73 = arith.constant 1 : index
    %c0_74 = arith.constant 0 : index
    %141 = vector.load %arg5[%c1_73, %c0_74] : memref<2x64xf32, #tpu.memory_space<vmem>>, vector<1x64xf32>
    %142 = vector.broadcast %141 : vector<1x64xf32> to vector<16x64xf32>
    %143 = arith.addf %140, %142 : vector<16x64xf32>
    %cst_75 = arith.constant 0.000000e+00 : f32
    %144 = vector.broadcast %cst_75 : f32 to vector<16x64xf32>
    %145 = arith.maximumf %143, %144 : vector<16x64xf32>
    %c0_76 = arith.constant 0 : index
    %c0_77 = arith.constant 0 : index
    %146 = vector.load %arg10[%c0_76, %c0_77] : memref<16x64xf32, #tpu.memory_space<vmem>>, vector<16x64xf32>
    tpu.vector_store %arg10[%c0_76, %c0_77], %145 {strides = array<i32>} : memref<16x64xf32, #tpu.memory_space<vmem>>, vector<16x64xf32>,
    %c0_78 = arith.constant 0 : index
    %c0_79 = arith.constant 0 : index
    %147 = tpu.strided_load %arg10[%c0_78, %c0_79] {strides = array<i32: 2, 1>} : memref<16x64xf32, #tpu.memory_space<vmem>>, vector<8x64xf32>
    %c1_80 = arith.constant 1 : index
    %c0_81 = arith.constant 0 : index
    %148 = tpu.strided_load %arg10[%c1_80, %c0_81] {strides = array<i32: 2, 1>} : memref<16x64xf32, #tpu.memory_space<vmem>>, vector<8x64xf32>
    %149 = arith.maximumf %147, %148 : vector<8x64xf32>
    %150 = tpu.iota {dimensions = array<i32: 0>} : vector<8x64xi32>
    %c2_i32_82 = arith.constant 2 : i32
    %151 = tpu.dynamic_rotate %149 by %c2_i32_82 dim 0 : vector<8x64xf32>, i32 -> vector<8x64xf32>
    %c-2_i32_83 = arith.constant -2 : i32
    %152 = vector.broadcast %c-2_i32_83 : i32 to vector<8x64xi32>
    %153 = arith.addi %150, %152 : vector<8x64xi32>
    %c0_i32_84 = arith.constant 0 : i32
    %154 = vector.broadcast %c0_i32_84 : i32 to vector<8x64xi32>
    %155 = arith.cmpi sge, %153, %154 : vector<8x64xi32>
    %c-2_i32_85 = arith.constant -2 : i32
    %156 = vector.broadcast %c-2_i32_85 : i32 to vector<8x64xi32>
    %157 = arith.addi %150, %156 : vector<8x64xi32>
    %c7_i32 = arith.constant 7 : i32
    %158 = vector.broadcast %c7_i32 : i32 to vector<8x64xi32>
    %159 = arith.cmpi sle, %157, %158 : vector<8x64xi32>
    %160 = arith.andi %155, %159 : vector<8x64xi1>
    %cst_86 = arith.constant 0.000000e+00 : f32
    %161 = vector.broadcast %cst_86 : f32 to vector<8x64xf32>
    %162 = arith.select %160, %151, %161 : vector<8x64xi1>, vector<8x64xf32>
    %c1_i32_87 = arith.constant 1 : i32
    %163 = tpu.dynamic_rotate %149 by %c1_i32_87 dim 0 : vector<8x64xf32>, i32 -> vector<8x64xf32>
    %c-1_i32_88 = arith.constant -1 : i32
    %164 = vector.broadcast %c-1_i32_88 : i32 to vector<8x64xi32>
    %165 = arith.addi %150, %164 : vector<8x64xi32>
    %c0_i32_89 = arith.constant 0 : i32
    %166 = vector.broadcast %c0_i32_89 : i32 to vector<8x64xi32>
    %167 = arith.cmpi sge, %165, %166 : vector<8x64xi32>
    %c-1_i32_90 = arith.constant -1 : i32
    %168 = vector.broadcast %c-1_i32_90 : i32 to vector<8x64xi32>
    %169 = arith.addi %150, %168 : vector<8x64xi32>
    %c7_i32_91 = arith.constant 7 : i32
    %170 = vector.broadcast %c7_i32_91 : i32 to vector<8x64xi32>
    %171 = arith.cmpi sle, %169, %170 : vector<8x64xi32>
    %172 = arith.andi %167, %171 : vector<8x64xi1>
    %cst_92 = arith.constant 0.000000e+00 : f32
    %173 = vector.broadcast %cst_92 : f32 to vector<8x64xf32>
    %174 = arith.select %172, %163, %173 : vector<8x64xi1>, vector<8x64xf32>
    %c7_i32_93 = arith.constant 7 : i32
    %175 = tpu.dynamic_rotate %149 by %c7_i32_93 dim 0 : vector<8x64xf32>, i32 -> vector<8x64xf32>
    %c1_i32_94 = arith.constant 1 : i32
    %176 = vector.broadcast %c1_i32_94 : i32 to vector<8x64xi32>
    %177 = arith.addi %150, %176 : vector<8x64xi32>
    %c0_i32_95 = arith.constant 0 : i32
    %178 = vector.broadcast %c0_i32_95 : i32 to vector<8x64xi32>
    %179 = arith.cmpi sge, %177, %178 : vector<8x64xi32>
    %c1_i32_96 = arith.constant 1 : i32
    %180 = vector.broadcast %c1_i32_96 : i32 to vector<8x64xi32>
    %181 = arith.addi %150, %180 : vector<8x64xi32>
    %c7_i32_97 = arith.constant 7 : i32
    %182 = vector.broadcast %c7_i32_97 : i32 to vector<8x64xi32>
    %183 = arith.cmpi sle, %181, %182 : vector<8x64xi32>
    %184 = arith.andi %179, %183 : vector<8x64xi1>
    %cst_98 = arith.constant 0.000000e+00 : f32
    %185 = vector.broadcast %cst_98 : f32 to vector<8x64xf32>
    %186 = arith.select %184, %175, %185 : vector<8x64xi1>, vector<8x64xf32>
    %c6_i32 = arith.constant 6 : i32
    %187 = tpu.dynamic_rotate %149 by %c6_i32 dim 0 : vector<8x64xf32>, i32 -> vector<8x64xf32>
    %c2_i32_99 = arith.constant 2 : i32
    %188 = vector.broadcast %c2_i32_99 : i32 to vector<8x64xi32>
    %189 = arith.addi %150, %188 : vector<8x64xi32>
    %c0_i32_100 = arith.constant 0 : i32
    %190 = vector.broadcast %c0_i32_100 : i32 to vector<8x64xi32>
    %191 = arith.cmpi sge, %189, %190 : vector<8x64xi32>
    %c2_i32_101 = arith.constant 2 : i32
    %192 = vector.broadcast %c2_i32_101 : i32 to vector<8x64xi32>
    %193 = arith.addi %150, %192 : vector<8x64xi32>
    %c7_i32_102 = arith.constant 7 : i32
    %194 = vector.broadcast %c7_i32_102 : i32 to vector<8x64xi32>
    %195 = arith.cmpi sle, %193, %194 : vector<8x64xi32>
    %196 = arith.andi %191, %195 : vector<8x64xi1>
    %cst_103 = arith.constant 0.000000e+00 : f32
    %197 = vector.broadcast %cst_103 : f32 to vector<8x64xf32>
    %198 = arith.select %196, %187, %197 : vector<8x64xi1>, vector<8x64xf32>
    %199 = tpu.concatenate %162, %174, %149, %186, %198 in 1 : vector<8x64xf32>, vector<8x64xf32>, vector<8x64xf32>, vector<8x64xf32>, vector<8x64xf32> -> vector<8x320xf32>
    %200 = arith.truncf %199 : vector<8x320xf32> to vector<8x320xbf16>
    %c0_104 = arith.constant 0 : index
    %c0_105 = arith.constant 0 : index
    %201 = vector.load %arg6[%c0_104, %c0_105] : memref<320x128xbf16, #tpu.memory_space<vmem>>, vector<320x128xbf16>
    %cst_106 = arith.constant dense<0.000000e+00> : vector<8x128xf32>
    %202 = tpu.matmul %200, %201, %cst_106 {dimension_numbers = #tpu.dot_dimension_numbers<[1], [0], [0], [1], [0, 0, 1, 1], [], []>} : vector<8x320xbf16>, vector<320x128xbf16>, vector<8x128xf32> -> vector<8x128xf32>
    %c0_107 = arith.constant 0 : index
    %c0_108 = arith.constant 0 : index
    %203 = vector.load %arg7[%c0_107, %c0_108] : memref<2x128xf32, #tpu.memory_space<vmem>>, vector<1x128xf32>
    %204 = vector.broadcast %203 : vector<1x128xf32> to vector<8x128xf32>
    %205 = arith.mulf %202, %204 : vector<8x128xf32>
    %c1_109 = arith.constant 1 : index
    %c0_110 = arith.constant 0 : index
    %206 = vector.load %arg7[%c1_109, %c0_110] : memref<2x128xf32, #tpu.memory_space<vmem>>, vector<1x128xf32>
    %207 = vector.broadcast %206 : vector<1x128xf32> to vector<8x128xf32>
    %208 = arith.addf %205, %207 : vector<8x128xf32>
    %cst_111 = arith.constant 0.000000e+00 : f32
    %209 = vector.broadcast %cst_111 : f32 to vector<8x128xf32>
    %210 = arith.maximumf %208, %209 : vector<8x128xf32>
    %c0_112 = arith.constant 0 : index
    %c0_113 = arith.constant 0 : index
    %211 = vector.load %arg11[%c0_112, %c0_113] : memref<8x128xf32, #tpu.memory_space<vmem>>, vector<8x128xf32>
    tpu.vector_store %arg11[%c0_112, %c0_113], %210 {strides = array<i32>} : memref<8x128xf32, #tpu.memory_space<vmem>>, vector<8x128xf32>,
    %c0_114 = arith.constant 0 : index
    %c0_115 = arith.constant 0 : index
    %212 = tpu.strided_load %arg11[%c0_114, %c0_115] {strides = array<i32: 2, 1>} : memref<8x128xf32, #tpu.memory_space<vmem>>, vector<4x128xf32>
    %c1_116 = arith.constant 1 : index
    %c0_117 = arith.constant 0 : index
    %213 = tpu.strided_load %arg11[%c1_116, %c0_117] {strides = array<i32: 2, 1>} : memref<8x128xf32, #tpu.memory_space<vmem>>, vector<4x128xf32>
    %214 = arith.maximumf %212, %213 : vector<4x128xf32>
    %215 = vector.shape_cast %214 : vector<4x128xf32> to vector<1x4x128xf32>
    %c0_118 = arith.constant 0 : index
    %c0_119 = arith.constant 0 : index
    %c0_120 = arith.constant 0 : index
    %216 = vector.load %arg8[%c0_118, %c0_119, %c0_120] : memref<1x4x128xf32, #tpu.memory_space<vmem>>, vector<1x4x128xf32>
    tpu.vector_store %arg8[%c0_118, %c0_119, %c0_120], %215 {strides = array<i32>} : memref<1x4x128xf32, #tpu.memory_space<vmem>>, vector<1x4x128xf32>,
    return
  }
  func.func @transform_0(%arg0: i32) -> (i32, i32, i32) {
    %c0_i32 = arith.constant 0 : i32
    %c0_i32_0 = arith.constant 0 : i32
    %c0_i32_1 = arith.constant 0 : i32
    return %arg0, %c0_i32, %c0_i32_0 : i32, i32, i32
  }
  func.func @transform_1(%arg0: i32) -> (i32, i32, i32) {
    %c0_i32 = arith.constant 0 : i32
    %c0_i32_0 = arith.constant 0 : i32
    %c0_i32_1 = arith.constant 0 : i32
    %c0_i32_2 = arith.constant 0 : i32
    return %c0_i32, %c0_i32_0, %c0_i32_1 : i32, i32, i32
  }
  func.func @transform_2(%arg0: i32) -> (i32, i32) {
    %c0_i32 = arith.constant 0 : i32
    %c0_i32_0 = arith.constant 0 : i32
    %c0_i32_1 = arith.constant 0 : i32
    return %c0_i32, %c0_i32_0 : i32, i32
  }
  func.func @transform_3(%arg0: i32) -> (i32, i32) {
    %c0_i32 = arith.constant 0 : i32
    %c0_i32_0 = arith.constant 0 : i32
    %c0_i32_1 = arith.constant 0 : i32
    return %c0_i32, %c0_i32_0 : i32, i32
  }
  func.func @transform_4(%arg0: i32) -> (i32, i32) {
    %c0_i32 = arith.constant 0 : i32
    %c0_i32_0 = arith.constant 0 : i32
    %c0_i32_1 = arith.constant 0 : i32
    return %c0_i32, %c0_i32_0 : i32, i32
  }
  func.func @transform_5(%arg0: i32) -> (i32, i32) {
    %c0_i32 = arith.constant 0 : i32
    %c0_i32_0 = arith.constant 0 : i32
    %c0_i32_1 = arith.constant 0 : i32
    return %c0_i32, %c0_i32_0 : i32, i32
  }
  func.func @transform_6(%arg0: i32) -> (i32, i32) {
    %c0_i32 = arith.constant 0 : i32
    %c0_i32_0 = arith.constant 0 : i32
    %c0_i32_1 = arith.constant 0 : i32
    return %c0_i32, %c0_i32_0 : i32, i32
  }
  func.func @transform_7(%arg0: i32) -> (i32, i32, i32) {
    %c0_i32 = arith.constant 0 : i32
    %c0_i32_0 = arith.constant 0 : i32
    %c0_i32_1 = arith.constant 0 : i32
    return %arg0, %c0_i32, %c0_i32_0 : i32, i32, i32
  }
}

module attributes {stable_mosaic.version = 11 : i64} {
  func.func @attn_fc_kernel(%arg0: memref<2x2x4x64xf32, #tpu.memory_space<vmem>>, %arg1: memref<128x1xbf16, #tpu.memory_space<vmem>>, %arg2: memref<1x1xf32, #tpu.memory_space<vmem>>, %arg3: memref<128x7xbf16, #tpu.memory_space<vmem>>, %arg4: memref<1x7xf32, #tpu.memory_space<vmem>>, %arg5: memref<2x7xf32, #tpu.memory_space<vmem>>) attributes {dimension_semantics = [], scalar_prefetch = 0 : i64, scratch_operands = 0 : i64, tpu.core_type = #tpu.core_type<tc>} {
    %c0 = arith.constant 0 : index
    %c0_0 = arith.constant 0 : index
    %c0_1 = arith.constant 0 : index
    %c0_2 = arith.constant 0 : index
    %0 = vector.load %arg0[%c0, %c0_0, %c0_1, %c0_2] : memref<2x2x4x64xf32, #tpu.memory_space<vmem>>, vector<1x2x4x64xf32>
    %1 = vector.shape_cast %0 : vector<1x2x4x64xf32> to vector<2x4x64xf32>
    %c1 = arith.constant 1 : index
    %c0_3 = arith.constant 0 : index
    %c0_4 = arith.constant 0 : index
    %c0_5 = arith.constant 0 : index
    %2 = vector.load %arg0[%c1, %c0_3, %c0_4, %c0_5] : memref<2x2x4x64xf32, #tpu.memory_space<vmem>>, vector<1x2x4x64xf32>
    %3 = vector.shape_cast %2 : vector<1x2x4x64xf32> to vector<2x4x64xf32>
    %4 = tpu.concatenate %1, %3 in 2 : vector<2x4x64xf32>, vector<2x4x64xf32> -> vector<2x4x128xf32>
    %5 = arith.truncf %4 : vector<2x4x128xf32> to vector<2x4x128xbf16>
    %c0_6 = arith.constant 0 : index
    %c0_7 = arith.constant 0 : index
    %6 = vector.load %arg1[%c0_6, %c0_7] : memref<128x1xbf16, #tpu.memory_space<vmem>>, vector<128x1xbf16>
    "tpu.trace_start"() <{level = 10 : i32, message = "btd,dk->btk"}> : () -> ()
    %cst = arith.constant dense<0.000000e+00> : vector<2x4x1xf32>
    %7 = tpu.matmul %5, %6, %cst {dimension_numbers = #tpu.dot_dimension_numbers<[2], [0], [0, 1], [1], [0, 0, 0, 1, 1, 1], [], []>} : vector<2x4x128xbf16>, vector<128x1xbf16>, vector<2x4x1xf32> -> vector<2x4x1xf32>
    "tpu.trace_stop"() : () -> ()
    %c0_8 = arith.constant 0 : index
    %c0_9 = arith.constant 0 : index
    %8 = vector.load %arg2[%c0_8, %c0_9] : memref<1x1xf32, #tpu.memory_space<vmem>>, vector<1x1xf32>
    %9 = vector.shape_cast %8 : vector<1x1xf32> to vector<1x1x1xf32>
    %10 = vector.broadcast %9 : vector<1x1x1xf32> to vector<2x4x1xf32>
    %11 = arith.addf %7, %10 : vector<2x4x1xf32>
    %cst_10 = arith.constant dense<0xFF800000> : vector<2x1xf32>
    %12 = vector.multi_reduction <maximumf>, %11, %cst_10 [1] : vector<2x4x1xf32> to vector<2x1xf32>
    %13 = vector.shape_cast %12 : vector<2x1xf32> to vector<2x1x1xf32>
    %14 = vector.broadcast %13 : vector<2x1x1xf32> to vector<2x4x1xf32>
    %15 = arith.subf %11, %14 : vector<2x4x1xf32>
    %16 = math.exp %15 : vector<2x4x1xf32>
    %cst_11 = arith.constant dense<0.000000e+00> : vector<2x1xf32>
    %17 = vector.multi_reduction <add>, %16, %cst_11 [1] : vector<2x4x1xf32> to vector<2x1xf32>
    %18 = vector.shape_cast %17 : vector<2x1xf32> to vector<2x1x1xf32>
    %19 = vector.broadcast %18 : vector<2x1x1xf32> to vector<2x4x1xf32>
    %20 = arith.divf %16, %19 : vector<2x4x1xf32>
    %21 = vector.broadcast %20 : vector<2x4x1xf32> to vector<2x4x128xf32>
    %22 = arith.mulf %21, %4 : vector<2x4x128xf32>
    %cst_12 = arith.constant dense<0.000000e+00> : vector<2x128xf32>
    %23 = vector.multi_reduction <add>, %22, %cst_12 [1] : vector<2x4x128xf32> to vector<2x128xf32>
    %24 = arith.truncf %23 : vector<2x128xf32> to vector<2x128xbf16>
    %c0_13 = arith.constant 0 : index
    %c0_14 = arith.constant 0 : index
    %25 = vector.load %arg3[%c0_13, %c0_14] : memref<128x7xbf16, #tpu.memory_space<vmem>>, vector<128x7xbf16>
    %cst_15 = arith.constant dense<0.000000e+00> : vector<2x7xf32>
    %26 = tpu.matmul %24, %25, %cst_15 {dimension_numbers = #tpu.dot_dimension_numbers<[1], [0], [0], [1], [0, 0, 1, 1], [], []>} : vector<2x128xbf16>, vector<128x7xbf16>, vector<2x7xf32> -> vector<2x7xf32>
    %c0_16 = arith.constant 0 : index
    %c0_17 = arith.constant 0 : index
    %27 = vector.load %arg4[%c0_16, %c0_17] : memref<1x7xf32, #tpu.memory_space<vmem>>, vector<1x7xf32>
    %28 = vector.broadcast %27 : vector<1x7xf32> to vector<2x7xf32>
    %29 = arith.addf %26, %28 : vector<2x7xf32>
    %c0_18 = arith.constant 0 : index
    %c0_19 = arith.constant 0 : index
    %30 = vector.load %arg5[%c0_18, %c0_19] : memref<2x7xf32, #tpu.memory_space<vmem>>, vector<2x7xf32>
    tpu.vector_store %arg5[%c0_18, %c0_19], %29 {strides = array<i32>} : memref<2x7xf32, #tpu.memory_space<vmem>>, vector<2x7xf32>,
    return
  }
}

</mosaic_0001>

<bundles_post_ra>
// kernel: _lambda_.7
= control target key start
LH: loop header
LB: loop body
LE: loop exit
PB: predicated region body
PF: predicated region fallthrough
CT: control target
= control target key end

     0   :  { %s612_s0 = inlined_call_operand.vmem [shape: f32[2,2,4,64], index: 0, kind: input, shape index: {}]   ;;  %s613_s1 = inlined_call_operand.hbm [shape: bf16[128,1], index: 1, kind: input, shape index: {}]   ;;  %s614_s2 = inlined_call_operand.<no memory space> [shape: f32[1,1], index: 2, kind: input, shape index: {}]   ;;  %s615_s3 = inlined_call_operand.vmem [shape: bf16[128,7], index: 3, kind: input, shape index: {}]   ;;  %s616_s4 = inlined_call_operand.vmem [shape: f32[1,7], index: 4, kind: input, shape index: {}]   ;;  %s617_s5 = inlined_call_operand.hbm [shape: f32[2,7], index: 5, kind: output, shape index: {}]  }
   0x1   :  { %v10_v0 = vstv %s614_s2 }
   0x2   :  { %11 = vst [vmem:[#allocation2] sm:$0x1] %v10_v0 }
   0x3   :  { %12 = vsyncpa [#allocation4], 0 }
   0x4   :  { %13 = vsyncpa [#allocation5], 0  ;;  %s20_s22 = sshll.u32 %s613_s1, 4  ;;  %s514_s23 = smov [#allocation3]   ;;  %s21_s22 = int_to_ptr.hbm [resolvable:$true] %s20_s22 }
   0x5   :  { %s22_s24 = sshll.u32 %s514_s23, 4  ;;  %s515_s25 = smov 64   ;;  %s23_s24 = int_to_ptr.vmem [resolvable:$true] %s22_s24 }
   0x6   :  { %s516_s26 = smov 4  }
   0x7   :  { %28 = dma.hbm_to_vmem [thread:$0]  %s21_s22, 1024, %s23_s24, [#allocation4], %s515_s25, %s515_s25, %s516_s26  }
   0x8   :  { %510 = dma.done.wait [#allocation4], 1024  }
   0x9   :  { %511 = vsyncadd [#allocation4], 4294966272  ;;  %v362_v1 = vld [vmem:[%s612_s0 + $0x8] sm:$0xf]  ;;  %v434_v3 = vld [vmem:[#allocation3 + $0x30] sm:$0xff]  ;;  %vm52_vm0 = vcmask 523264  }
   0xa   :  { %v435_v2 = vld [vmem:[#allocation3 + $0x38] sm:$0xff]  ;;  %46 = vrot.lane.b32.xlu0 %v362_v1, %s515_s25  ;;  %v363_v4 = vld [vmem:[%s612_s0 + $0xc] sm:$0xf]  ;;  %v433_v5 = vld [vmem:[#allocation3 + $0x28] sm:$0xff]  ;;  %vm152_vm1 = vcmask 3072   ;;  %v517_v35 = vmov 0  }
   0xb   :  { %136 = vmatpush.bf16.msra.mxu0 %v435_v2  ;;  %v432_v6 = vld [vmem:[#allocation3 + $0x20] sm:$0xff]  ;;  %v431_v7 = vld [vmem:[#allocation3 + $0x18] sm:$0xff]  ;;  %v430_v8 = vld [vmem:[#allocation3 + $0x10] sm:$0xff]  ;;  %450 = vset.pattern.permute.xlu1 %v517_v35  ;;  %vm237_vm10 = vcmask 1043456   ;;  %vm278_vm11 = vcmask 1041409   ;;  %s519_s24 = smov [#allocation6]  }
   0xc   :  { %v429_v9 = vld [vmem:[#allocation3 + $0x8] sm:$0xff]  ;;  %v428_v10 = vld [vmem:[#allocation3] sm:$0xff]  ;;  %v39_v11 = vld [vmem:[%s612_s0] sm:$0xf]  ;;  %451 = vset.pattern.permute.xlu0 %v517_v35  ;;  %s352_s28 = sshll.u32 %s617_s5, 4  ;;  %vm343_vm12 = vcmask 50176   ;;  %s353_s28 = int_to_ptr.hbm [resolvable:$true] %s352_s28 }
   0xd   :  { %v40_v15 = vld [vmem:[%s612_s0 + $0x4] sm:$0xf]  ;;  %v452_v19 = vld [vmem:[#allocation2] ss:$0 sm:$0xff] }
   0xf   :  { %137 = vmatpush.bf16.msra.mxu0 %v434_v3 }
  0x12   :  { %48 = vrot.lane.b32.xlu0 %v363_v4, %s515_s25  ;;  %s350_s25 = sshll.u32 %s519_s24, 4  ;;  %s351_s25 = int_to_ptr.vmem [resolvable:$true] %s350_s25 }
  0x13   :  { %138 = vmatpush.bf16.msra.mxu0 %v433_v5 }
  0x17   :  { %139 = vmatpush.bf16.msra.mxu0 %v432_v6 }
  0x1b   :  { %140 = vmatpush.bf16.msra.mxu0 %v431_v7 }
  0x1f   :  { %141 = vmatpush.bf16.msra.mxu0 %v430_v8 }
  0x23   :  { %142 = vmatpush.bf16.msra.mxu0 %v429_v9 }
  0x27   :  { %143 = vmatpush.bf16.msra.mxu0 %v428_v10 }
  0x7c   :  { %v47_v12 = vpop.permute.xlu0 %46 }
  0x7d   :  { %v565_v13 = vsel %vm52_vm0, %v39_v11, %v47_v12 }
  0x7e   :  { %v55_v14 = vpack.c.bf16 %v565_v13, %v565_v13 }
  0x80   :  { %77 = vst [vmem:[#allocation1] ss:$4 sm:$0xff] %v55_v14 }
  0x84   :  { %v49_v16 = vpop.permute.xlu0 %48 }
  0x85   :  { %v572_v17 = vsel %vm52_vm0, %v40_v15, %v49_v16 }
  0x86   :  { %v56_v18 = vpack.c.bf16 %v572_v17, %v572_v17 }
  0x88   :  { %80 = vst [vmem:[#allocation1 + $0x1] ss:$4 sm:$0xff] %v56_v18 }
  0x8f   :  { %v81_v20 = vld.sshfl [vmem:[#allocation1] sm:$0xff pattern:$0x73625140] }
  0x90   :  { %131 = vst [vmem:[#allocation1] ss:$2 sm:$0xff] %v452_v19  ;;  %144 = vmatmul.bf16.vlgmr.msra.gmra.mxu0 %v81_v20 }
  0x91   :  { %133 = vst [vmem:[#allocation1 + $0x1] ss:$2 sm:$0xff] %v452_v19 }
  0x98   :  { %v134_v21 = vld.sshfl [vmem:[#allocation1] sm:$0xff pattern:$0x75316420] }
 0x10d   :  { %v145_v22 = vpop.f32.mrf.mxu0 }
 0x10e   :  { %v146_v23 = vadd.f32 %v145_v22, %v134_v21  ;;  %v443_v21 = vld [vmem:[%s615_s3 + $0x38] sm:$0xff]  ;;  %v442_v22 = vld [vmem:[%s615_s3 + $0x30] sm:$0xff] }
 0x10f   :  { %330 = vmatpush.bf16.msra.mxu1 %v443_v21 }
 0x110   :  { %v150_v24 = vrot.slane %v146_v23, 4  ;;  %v153_v25 = vsel %vm152_vm1, %v146_v23, -inf }
 0x111   :  { %v154_v26 = vrot.slane %v153_v25, 4 }
 0x112   :  { %v160_v27 = vsel %vm152_vm1, %v150_v24, -inf }
 0x113   :  { %v155_v28 = vmax.f32 %v153_v25, %v154_v26  ;;  %v161_v29 = vrot.slane %v160_v27, 4  ;;  %331 = vmatpush.bf16.msra.mxu1 %v442_v22  ;;  %v439_v25 = vld [vmem:[%s615_s3 + $0x18] sm:$0xff]  ;;  %v438_v26 = vld [vmem:[%s615_s3 + $0x10] sm:$0xff] }
 0x115   :  { %v156_v30 = vrot.slane %v155_v28, 2  ;;  %v162_v31 = vmax.f32 %v160_v27, %v161_v29  ;;  %v147_v32 = vpop.f32.mrf.mxu0  ;;  %v437_v27 = vld [vmem:[%s615_s3 + $0x8] sm:$0xff] }
 0x117   :  { %v157_v33 = vmax.f32 %v155_v28, %v156_v30  ;;  %v163_v34 = vrot.slane %v162_v31, 2  ;;  %v518_v28 = vmov 839922192   ;;  %v436_v30 = vld [vmem:[%s615_s3] sm:$0xff] }
 0x118   :  { %v223_v29 = vunpack.c.l.s4 %v518_v28 }
 0x119   :  { %v158_v36 = vrot.slane %v157_v33, 1  ;;  %v164_v37 = vmax.f32 %v162_v31, %v163_v34 }
 0x11a   :  { %v224_v31 = vunpack.c.0.s8 %v223_v29 }
 0x11b   :  { %v159_v38 = vmax.f32 %v157_v33, %v158_v36  ;;  %v165_v39 = vrot.slane %v164_v37, 1 }
 0x11d   :  { %v166_v40 = vmax.f32 %v164_v37, %v165_v39  ;;  %v167_v41 = vsub.f32 %v146_v23, %v159_v38  ;;  %v441_v23 = vld [vmem:[%s615_s3 + $0x28] sm:$0xff] }
 0x11e   :  { %332 = vmatpush.bf16.msra.mxu1 %v441_v23 }
 0x11f   :  { %v168_v42 = vsub.f32 %v150_v24, %v166_v40  ;;  %v169_v43 = vmul.f32 1.442695, %v167_v41  ;;  %v440_v24 = vld [vmem:[%s615_s3 + $0x20] sm:$0xff] }
 0x121   :  { %454 = vpow2.f32 %v169_v43  ;;  %v171_v44 = vmul.f32 1.442695, %v168_v42 }
 0x122   :  { %333 = vmatpush.bf16.msra.mxu1 %v440_v24 }
 0x123   :  { %456 = vpow2.f32 %v171_v44 }
 0x126   :  { %334 = vmatpush.bf16.msra.mxu1 %v439_v25 }
 0x127   :  { %v455_v45 = vpop.eup %454 }
 0x128   :  { %v173_v46 = vsel %vm152_vm1, %v455_v45, 0.0 }
 0x129   :  { %v457_v47 = vpop.eup %456  ;;  %v174_v48 = vrot.slane %v173_v46, 4 }
 0x12a   :  { %v180_v49 = vsel %vm152_vm1, %v457_v47, 0.0  ;;  %335 = vmatpush.bf16.msra.mxu1 %v438_v26 }
 0x12b   :  { %v175_v50 = vadd.f32 %v174_v48, %v173_v46  ;;  %v181_v51 = vrot.slane %v180_v49, 4 }
 0x12d   :  { %v176_v52 = vrot.slane %v175_v50, 2  ;;  %v182_v53 = vadd.f32 %v181_v51, %v180_v49 }
 0x12e   :  { %336 = vmatpush.bf16.msra.mxu1 %v437_v27 }
 0x12f   :  { %v177_v54 = vadd.f32 %v176_v52, %v175_v50  ;;  %v183_v55 = vrot.slane %v182_v53, 2 }
 0x131   :  { %v178_v56 = vrot.slane %v177_v54, 1  ;;  %v184_v57 = vadd.f32 %v183_v55, %v182_v53 }
 0x132   :  { %337 = vmatpush.bf16.msra.mxu1 %v436_v30 }
 0x133   :  { %v185_v58 = vrot.slane %v184_v57, 1  ;;  %v179_v59 = vadd.f32 %v178_v56, %v177_v54 }
 0x135   :  { %v186_v60 = vadd.f32 %v185_v58, %v184_v57  ;;  %458 = vrcp.f32 %v179_v59  ;;  %v198_v2 = vand.u32 2147483648, %v179_v59  ;;  %v196_v4 = vand.u32 2147483647, %v179_v59 }
 0x136   :  { %vm192_vm3 = vweird.f32 %v179_v59 }
 0x137   :  { %460 = vrcp.f32 %v186_v60  ;;  %v199_v8 = vor.u32 1.1754944e-38, %v198_v2  ;;  %vm197_vm5 = vcmp.eq.f32.partialorder %v196_v4, 8.507059e+37  ;;  %v213_v12 = vand.u32 2147483648, %v186_v60 }
 0x138   :  { %vm207_vm7 = vweird.f32 %v186_v60  ;;  %v211_v15 = vand.u32 2147483647, %v186_v60 }
 0x139   :  { %v214_v18 = vor.u32 1.1754944e-38, %v213_v12 }
 0x13a   :  { %vm212_vm9 = vcmp.eq.f32.partialorder %v211_v15, 8.507059e+37 }
 0x13b   :  { %v459_v61 = vpop.eup %458 }
 0x13c   :  { %v188_v62 = vmul.f32 %v459_v61, %v179_v59  ;;  %vm193_vm2 = vweird.f32 %v459_v61 }
 0x13d   :  { %v461_v63 = vpop.eup %460  ;;  %vm194_vm4 = vmor %vm192_vm3, %vm193_vm2 }
 0x13e   :  { %v189_v0 = vsub.f32 1.0, %v188_v62  ;;  %v203_v1 = vmul.f32 %v461_v63, %v186_v60  ;;  %vm208_vm6 = vweird.f32 %v461_v63 }
 0x13f   :  { %vm209_vm8 = vmor %vm207_vm7, %vm208_vm6 }
 0x140   :  { %v190_v3 = vmul.f32 %v459_v61, %v189_v0  ;;  %v204_v5 = vsub.f32 1.0, %v203_v1 }
 0x142   :  { %v191_v6 = vadd.f32 %v459_v61, %v190_v3  ;;  %v205_v7 = vmul.f32 %v461_v63, %v204_v5 }
 0x144   :  { %v195_v9 = vsel %vm194_vm4, %v459_v61, %v191_v6  ;;  %v206_v10 = vadd.f32 %v461_v63, %v205_v7 }
 0x145   :  { %v200_v11 = vsel %vm197_vm5, %v199_v8, %v195_v9 }
 0x146   :  { %v201_v14 = vmul.f32 %v455_v45, %v200_v11  ;;  %v210_v16 = vsel %vm209_vm8, %v461_v63, %v206_v10 }
 0x147   :  { %v215_v19 = vsel %vm212_vm9, %v214_v18, %v210_v16 }
 0x148   :  { %219 = vperm.xlu1 %450, %v201_v14   ;;  %v216_v20 = vmul.f32 %v457_v47, %v215_v19 }
 0x150   :  { %228 = vperm.xlu1 %450, %v216_v20  }
 0x1ba   :  { %v220_v32 = vpop.permute.xlu1 %219 }
 0x1bb   :  { %v225_v33 = vperm.slane %v220_v32, %v224_v31 }
 0x1bd   :  { %v235_v34 = vmul.f32 %v225_v33, %v565_v13 }
 0x1bf   :  { %v238_v35 = vsel %vm237_vm10, %v235_v34, 0.0 }
 0x1c0   :  { %v239_v36 = vrot.slane %v238_v35, 4 }
 0x1c2   :  { %v240_v37 = vadd.f32 %v239_v36, %v238_v35  ;;  %v229_v38 = vpop.permute.xlu1 %228 }
 0x1c3   :  { %v234_v39 = vperm.slane %v229_v38, %v224_v31 }
 0x1c4   :  { %v241_v40 = vrot.slane %v240_v37, 2 }
 0x1c5   :  { %v236_v41 = vmul.f32 %v234_v39, %v572_v17  ;;  %v453_v17 = vld [vmem:[%s616_s4] ss:$0 sm:$0xff] }
 0x1c6   :  { %v242_v42 = vadd.f32 %v241_v40, %v240_v37 }
 0x1c7   :  { %v245_v43 = vsel %vm237_vm10, %v236_v41, 0.0 }
 0x1c8   :  { %v246_v44 = vrot.slane %v245_v43, 4  ;;  %v243_v46 = vrot.slane %v242_v42, 1 }
 0x1ca   :  { %v247_v45 = vadd.f32 %v246_v44, %v245_v43  ;;  %v244_v49 = vadd.f32 %v243_v46, %v242_v42 }
 0x1cc   :  { %v248_v47 = vrot.slane %v247_v45, 2  ;;  %v252_v52 = vpack.c.bf16 %v244_v49, %v244_v49 }
 0x1ce   :  { %v249_v48 = vadd.f32 %v248_v47, %v247_v45  ;;  %v276_v53 = vunpack.c.l.b16 %v252_v52 }
 0x1d0   :  { %v250_v50 = vrot.slane %v249_v48, 1 }
 0x1d2   :  { %v251_v51 = vadd.f32 %v250_v50, %v249_v48 }
 0x1d4   :  { %v253_v13 = vpack.c.bf16 %v251_v51, %v251_v51 }
 0x1d6   :  { %v277_v54 = vunpack.c.l.b16 %v253_v13 }
 0x1d8   :  { %v279_v55 = vsel %vm278_vm11, %v277_v54, %v276_v53 }
 0x1d9   :  { %v280_v56 = vpack.c.b16 %v279_v55, %v279_v55 }
 0x1db   :  { %338 = vmatmul.bf16.vlgmr.msra.gmra.mxu1 %v280_v56 }
 0x258   :  { %v339_v57 = vpop.f32.mrf.mxu1 }
 0x259   :  { %v340_v58 = vadd.f32 %v453_v17, %v339_v57 }
 0x25b   :  { %344 = vst.msk [vmem:[#allocation6] sm:$0x3] %vm343_vm12, %v340_v58 }
 0x25c   :  { %355 = dma.vmem_to_hbm [thread:$0]  %s351_s25, 32, %s353_s28, [#allocation5]  }
 0x260   :  { %v341_v59 = vpop.f32.mrf.mxu1 }
 0x261   :  { %512 = dma.done.wait [#allocation5], 32  }
 0x262   :  { %513 = vsyncadd [#allocation5], 4294967264 }
 0x263   :  { %360 = vsyncpa [#allocation4], 1 }
 0x264   :  { %361 = vsyncpa [#allocation5], 1 }

// kernel: _lambda_.5
= control target key start
LH: loop header
LB: loop body
LE: loop exit
PB: predicated region body
PF: predicated region fallthrough
CT: control target
= control target key end

     0   :  { %9 = vsyncpa [#allocation4], 0  ;;  %s2129_s0 = inlined_call_operand.vmem [shape: f32[1,2,4,128], index: 0, kind: input, shape index: {}]   ;;  %s2130_s1 = inlined_call_operand.hbm [shape: bf16[2,128,256], index: 1, kind: input, shape index: {}]   ;;  %s2131_s2 = inlined_call_operand.hbm [shape: bf16[2,64,256], index: 2, kind: input, shape index: {}]   ;;  %s2132_s3 = inlined_call_operand.vmem [shape: f32[2,1,256], index: 3, kind: input, shape index: {}]   ;;  %s2133_s4 = inlined_call_operand.vmem [shape: f32[2,2,4,64], index: 4, kind: output, shape index: {}]  }
   0x1   :  { %11 = vsyncpa [#allocation4 + $0x1], 0 }
   0x2   :  { %12 = vsyncpa [#allocation6], 0 }
   0x3   :  { %14 = vsyncpa [#allocation6 + $0x1], 0  ;;  %s1798_s15 = smov 0   ;;  %s1800_s16 = smov 0  }
   0x4   :  { %s1802_s17 = smov 0   ;;  %s1804_s18 = smov 0  }
   0x5 LB: > { %s1817_s19 = sadd.s32 4294967295, %s1767_s18   ;;  %s1820_s20 = sadd.s32 1, %s1767_s18   ;;  %s1767_s18 = sphi %s1804_s18, %s2141_s18   ;;  %s1763_s17 = sphi %s1802_s17, %s2140_s17   ;;  %s1759_s16 = sphi %s1800_s16, %s2139_s16   ;;  %s1755_s15 = sphi %s1798_s15, %s2138_s15  }
   0x6   : > { %s45_s21 = ssub.s32 %s1767_s18, %s1820_s20  ;;  %s48_s22 = sadd.s32 1, %s1763_s17 }
   0x7   : > { %p46_p0 = scmp.eq.s32.totalorder %s45_s21, 0  ;;  %p55_p1 = scmp.ne.s32.totalorder %s1763_s17, %s1759_s16 }
   0x8   : > { %p56_p2 = scmp.eq.s32.totalorder %s1767_s18, 0  ;;  %p61_p3 = scmp.ne.s32.totalorder %s1759_s16, %s1755_s15 }
   0x9   : > { %s1830_s23 = scalar_select %p46_p0, %s1763_s17, %s48_s22  }
   0xa   : > { %p1832_p4 = por %p56_p2, %p55_p1  ;;  %p62_p5 = scmp.eq.s32.totalorder %s1817_s19, 0 }
   0xb   : > { %p1536_p6 = scmp.lt.s32.totalorder %s1767_s18, 2  ;;  %s1843_s26 = sand.u32 1, %s1763_s17  }
   0xc   : > { %p1838_p7 = por %p62_p5, %p61_p3  ;;  %s1342_s27 = sshll.u32 %s1843_s26, 7 }
   0xd   : > { %s1494_s28 = sshll.u32 %s1767_s18, 7  ;;  %s170_s6 = scalar_lea.vmem [#allocation3], %s1342_s27 }
   0xe   : > { %s175_s5 = scalar_lea.hbm %s2130_s1, %s1494_s28  ;;  %s178_s7 = sshll.u32 %s170_s6, 4  ;;  %s179_s7 = int_to_ptr.vmem [resolvable:$true] %s178_s7 }
   0xf   : > { %s176_s8 = sshll.u32 %s175_s5, 4  ;;  %p1852_p8 = pnand %p1536_p6, %p1832_p4  ;;  %s177_s8 = int_to_ptr.hbm [resolvable:$true] %s176_s8 }
  0x10   : > { %p1348_p9 = scmp.ge.s32.totalorder %s1767_s18, 1  ;;  %s167_s10 = scalar_lea.sflag [#allocation4], %s1843_s26 }
  0x11   : > { %s1669_s11 = sshra.s32 %s177_s8, 4  ;;  %p1673_p11 = pneg %p1852_p8  ;;  %s1670_s11 = int_to_ptr.hbm [resolvable:$true] %s1669_s11 }
  0x12   : > { %s1671_s12 = scalar_lea.hbm %s1670_s11, 128  ;;  %s1676_s15 = scalar_lea.hbm %s2130_s1, 256 }
  0x13   : > { %p1672_p10 = scmp.ne.s32.totalorder %s1670_s11, %s1671_s12  ;;  %p1677_p0 = scmp.lt.s32.totalorder %s1670_s11, %s2130_s1 }
  0x14   : > { %p1678_p1 = scmp.lt.s32.totalorder %s1676_s15, %s1671_s12 }
  0x15   : > { %p1674_p12 = pnand %p1673_p11, %p1672_p10 }
  0x16   : > { %p1679_p2 = por %p1678_p1, %p1677_p0 }
  0x17   : > { %p1675_p13 = pneg %p1674_p12 }
  0x19   : > { %p1680_p3 = pnand %p1679_p2, %p1675_p13 }
  0x1b   : > { %1683 = shalt.err (!%p1680_p3)
}
  0x1c   : > { %s1769_s24 = smov 128   ;;  %s1770_s27 = smov 8  }
  0x1d   : > { %1532 = dma.hbm_to_vmem [thread:$0]  (!%p1852_p8), %s177_s8, 2048, %s179_s7, %s167_s10, %s1769_s24, %s1769_s24, %s1770_s27  }
  0x1e   : > { %p215_p4 = scmp.lt.s32.totalorder %s1767_s18, 3  ;;  %s1345_s28 = sshll.u32 %s1843_s26, 6 }
  0x1f   : > { %s1495_s29 = sshll.u32 %s1767_s18, 6  ;;  %s192_s12 = scalar_lea.vmem [#allocation5], %s1345_s28 }
  0x20   : > { %p1879_p5 = pnand %p1348_p9, %p215_p4  ;;  %s197_s11 = scalar_lea.hbm %s2131_s2, %s1495_s29 }
  0x21   : > { %s200_s13 = sshll.u32 %s192_s12, 4  ;;  %s198_s14 = sshll.u32 %s197_s11, 4  ;;  %s201_s13 = int_to_ptr.vmem [resolvable:$true] %s200_s13  ;;  %s199_s14 = int_to_ptr.hbm [resolvable:$true] %s198_s14 }
  0x22   : > { %s189_s15 = scalar_lea.sflag [#allocation6], %s1843_s26  ;;  %s1699_s7 = sshra.s32 %s199_s14, 4  ;;  %s1700_s7 = int_to_ptr.hbm [resolvable:$true] %s1699_s7 }
  0x23   : > { %s1701_s8 = scalar_lea.hbm %s1700_s7, 64  ;;  %s1706_s21 = scalar_lea.hbm %s2131_s2, 128 }
  0x24   : > { %p1702_p6 = scmp.ne.s32.totalorder %s1700_s7, %s1701_s8  ;;  %p1707_p12 = scmp.lt.s32.totalorder %s1700_s7, %s2131_s2 }
  0x25   : > { %p1708_p13 = scmp.lt.s32.totalorder %s1706_s21, %s1701_s8 }
  0x26   : > { %p1704_p9 = pnand %p1702_p6, %p1673_p11 }
  0x27   : > { %p1709_p0 = por %p1708_p13, %p1707_p12 }
  0x28   : > { %p1705_p10 = pneg %p1704_p9 }
  0x2a   : > { %p1710_p1 = pnand %p1709_p0, %p1705_p10 }
  0x2c   : > { %1713 = shalt.err (!%p1710_p1)
}
  0x2d   : > { %1535 = dma.hbm_to_vmem [thread:$0]  (!%p1852_p8), %s199_s14, 1024, %s201_s13, %s189_s15, %s1769_s24, %s1769_s24, %s1770_s27  }
  0x2e   : > { %219 = sbr.rel (%p1879_p5) target bundleno = 1737 (0x6c9), region = 36  ;;  %s221_s26 = sand.u32 (!%p1879_p5), 1, %s1759_s16  }
  0x2f   : > { %s1349_s28 = sshll.u32 (!%p1879_p5), %s221_s26, 7  ;;  %s222_s5 = scalar_lea.sflag (!%p1879_p5), [#allocation4], %s221_s26 }
  0x30   : > { %s1904_s6 = scalar_lea.vmem (!%p1879_p5), [#allocation3], %s1349_s28 }
  0x33   : > { %1746 = dma.done.wait (%p1838_p7), %s222_s5, 2048  }
  0x34   : > { %1748 = vsyncadd (%p1838_p7), %s222_s5, 4294965248  ;;  %s1350_s9 = sshll.u32 %s221_s26, 6  ;;  %s232_s11 = scalar_lea.sflag [#allocation6], %s221_s26 }
  0x35   : > { %s1910_s12 = scalar_lea.vmem [#allocation5], %s1350_s9 }
  0x36   : > { %1750 = dma.done.wait (%p1838_p7), %s232_s11, 1024  }
  0x37   : > { %1752 = vsyncadd (%p1838_p7), %s232_s11, 4294966272  ;;  %v1412_v0 = vld [vmem:[%s1904_s6 + $0x70] sm:$0xf]  ;;  %v1512_v1 = vld [vmem:[%s1904_s6 + $0x74] sm:$0xf0]  ;;  %p270_p7 = scmp.lt.s32.totalorder %s1817_s19, 1 }
  0x38   : > { %v1511_v2 = vld [vmem:[%s1904_s6 + $0x74] sm:$0xf]  ;;  %v1413_v3 = vor.u32 %v1512_v1, %v1412_v0  ;;  %v1414_v4 = vld [vmem:[%s1904_s6 + $0x78] sm:$0xf0]  ;;  %v1404_v5 = vld [vmem:[%s1904_s6 + $0x60] sm:$0xf] }
  0x39   : > { %v1510_v6 = vld [vmem:[%s1904_s6 + $0x64] sm:$0xf0]  ;;  %v1417_v7 = vor.u32 %v1511_v2, %v1414_v4  ;;  %v1509_v8 = vld [vmem:[%s1904_s6 + $0x64] sm:$0xf]  ;;  %v1406_v9 = vld [vmem:[%s1904_s6 + $0x68] sm:$0xf0] }
  0x3a   : > { %400 = vmatpush.bf16.msra.mxu0 %v1413_v3  ;;  %v1405_v10 = vor.u32 %v1510_v6, %v1404_v5  ;;  %v1409_v11 = vor.u32 %v1509_v8, %v1406_v9  ;;  %v1396_v12 = vld [vmem:[%s1904_s6 + $0x50] sm:$0xf]  ;;  %v1508_v13 = vld [vmem:[%s1904_s6 + $0x54] sm:$0xf0]  ;;  %v1507_v14 = vld [vmem:[%s1904_s6 + $0x54] sm:$0xf] }
  0x3b   : > { %413 = vmatpush.bf16.msra.mxu1 %v1417_v7  ;;  %v1398_v15 = vld [vmem:[%s1904_s6 + $0x58] sm:$0xf0]  ;;  %v1519_v16 = vld [vmem:[%s1910_s12 + $0x34] sm:$0xf]  ;;  %v1448_v19 = vld [vmem:[%s1910_s12 + $0x30] sm:$0xf]  ;;  %v1397_v21 = vor.u32 %v1508_v13, %v1396_v12 }
  0x3c   : > { %v1450_v17 = vld [vmem:[%s1910_s12 + $0x38] sm:$0xf0]  ;;  %v1520_v20 = vld [vmem:[%s1910_s12 + $0x34] sm:$0xf0]  ;;  %v1388_v22 = vld [vmem:[%s1904_s6 + $0x40] sm:$0xf]  ;;  %v1401_v25 = vor.u32 %v1507_v14, %v1398_v15 }
  0x3d   : > { %v1930_v18 = vor.u32 %v1519_v16, %v1450_v17  ;;  %v1506_v23 = vld [vmem:[%s1904_s6 + $0x44] sm:$0xf0]  ;;  %v1936_v24 = vor.u32 %v1520_v20, %v1448_v19  ;;  %v1517_v26 = vld [vmem:[%s1910_s12 + $0x24] sm:$0xf]  ;;  %v1442_v27 = vld [vmem:[%s1910_s12 + $0x28] sm:$0xf0] }
  0x3e   : > { %401 = vmatpush.bf16.msra.mxu0 %v1405_v10  ;;  %v1440_v28 = vld [vmem:[%s1910_s12 + $0x20] sm:$0xf]  ;;  %v1505_v29 = vld [vmem:[%s1904_s6 + $0x44] sm:$0xf]  ;;  %v1390_v30 = vld [vmem:[%s1904_s6 + $0x48] sm:$0xf0]  ;;  %v1945_v31 = vor.u32 %v1517_v26, %v1442_v27  ;;  %v1389_v35 = vor.u32 %v1506_v23, %v1388_v22 }
  0x3f   : > { %414 = vmatpush.bf16.msra.mxu1 %v1409_v11  ;;  %511 = vmatpush.bf16.msra.mxu3 %v1930_v18  ;;  %v1518_v32 = vld [vmem:[%s1910_s12 + $0x24] sm:$0xf0]  ;;  %v1515_v34 = vld [vmem:[%s1910_s12 + $0x14] sm:$0xf]  ;;  %v1434_v36 = vld [vmem:[%s1910_s12 + $0x18] sm:$0xf0]  ;;  %v1393_v39 = vor.u32 %v1505_v29, %v1390_v30 }
  0x40   : > { %498 = vmatpush.bf16.msra.mxu2 %v1936_v24  ;;  %v1948_v33 = vor.u32 %v1518_v32, %v1440_v28  ;;  %v1432_v37 = vld [vmem:[%s1910_s12 + $0x10] sm:$0xf]  ;;  %v1516_v38 = vld [vmem:[%s1910_s12 + $0x14] sm:$0xf0]  ;;  %v1503_v42 = vld [vmem:[%s1904_s6 + $0x34] sm:$0xf]  ;;  %v1958_v43 = vor.u32 %v1515_v34, %v1434_v36 }
  0x41   : > { %v1380_v40 = vld [vmem:[%s1904_s6 + $0x30] sm:$0xf]  ;;  %v1504_v41 = vld [vmem:[%s1904_s6 + $0x34] sm:$0xf0]  ;;  %v1382_v44 = vld [vmem:[%s1904_s6 + $0x38] sm:$0xf0]  ;;  %v1962_v45 = vor.u32 %v1516_v38, %v1432_v37 }
  0x42   : > { %402 = vmatpush.bf16.msra.mxu0 %v1397_v21  ;;  %v1513_v46 = vld [vmem:[%s1910_s12 + $0x4] sm:$0xf]  ;;  %v1426_v47 = vld [vmem:[%s1910_s12 + $0x8] sm:$0xf0]  ;;  %v1424_v48 = vld [vmem:[%s1910_s12] sm:$0xf]  ;;  %v1381_v50 = vor.u32 %v1504_v41, %v1380_v40  ;;  %v1385_v52 = vor.u32 %v1503_v42, %v1382_v44 }
  0x43   : > { %415 = vmatpush.bf16.msra.mxu1 %v1401_v25  ;;  %512 = vmatpush.bf16.msra.mxu3 %v1945_v31  ;;  %v1514_v49 = vld [vmem:[%s1910_s12 + $0x4] sm:$0xf0]  ;;  %v1372_v51 = vld [vmem:[%s1904_s6 + $0x20] sm:$0xf]  ;;  %v1429_v54 = vor.u32 %v1513_v46, %v1426_v47  ;;  %v281_v56 = vld [vmem:[%s2129_s0 + $0x4] sm:$0xf] }
  0x44   : > { %499 = vmatpush.bf16.msra.mxu2 %v1948_v33  ;;  %v1502_v53 = vld [vmem:[%s1904_s6 + $0x24] sm:$0xf0]  ;;  %v1501_v57 = vld [vmem:[%s1904_s6 + $0x24] sm:$0xf]  ;;  %v1374_v58 = vld [vmem:[%s1904_s6 + $0x28] sm:$0xf0]  ;;  %v1425_v59 = vor.u32 %v1514_v49, %v1424_v48 }
  0x45   : > { %v280_v55 = vld [vmem:[%s2129_s0] sm:$0xf]  ;;  %311 = vst [vmem:[#allocation1 + $0x1] ss:$2 sm:$0xff] %v281_v56  ;;  %v1373_v60 = vor.u32 %v1502_v53, %v1372_v51  ;;  %v1377_v61 = vor.u32 %v1501_v57, %v1374_v58  ;;  %v1364_v62 = vld [vmem:[%s1904_s6 + $0x10] sm:$0xf] }
  0x46   : > { %403 = vmatpush.bf16.msra.mxu0 %v1389_v35  ;;  %309 = vst [vmem:[#allocation1] ss:$2 sm:$0xff] %v280_v55  ;;  %v1500_v63 = vld [vmem:[%s1904_s6 + $0x14] sm:$0xf0]  ;;  %v1499_v0 = vld [vmem:[%s1904_s6 + $0x14] sm:$0xf] }
  0x47   : > { %416 = vmatpush.bf16.msra.mxu1 %v1393_v39  ;;  %513 = vmatpush.bf16.msra.mxu3 %v1958_v43  ;;  %v1366_v1 = vld [vmem:[%s1904_s6 + $0x18] sm:$0xf0]  ;;  %v1365_v2 = vor.u32 %v1500_v63, %v1364_v62  ;;  %v1771_v3 = vmov 0   ;;  %v1356_v5 = vld [vmem:[%s1904_s6] sm:$0xf]  ;;  %s2008_s13 = scalar_select %p270_p7, %s1817_s19, 1 }
  0x48   : > { %500 = vmatpush.bf16.msra.mxu2 %v1962_v45  ;;  %v1369_v4 = vor.u32 %v1499_v0, %v1366_v1  ;;  %v1498_v6 = vld [vmem:[%s1904_s6 + $0x4] sm:$0xf0]  ;;  %v1497_v7 = vld [vmem:[%s1904_s6 + $0x4] sm:$0xf]  ;;  %v1358_v8 = vld [vmem:[%s1904_s6 + $0x8] sm:$0xf0] }
  0x49   : > { %v1357_v9 = vor.u32 %v1498_v6, %v1356_v5  ;;  %v1361_v11 = vor.u32 %v1497_v7, %v1358_v8  ;;  %s1351_s14 = sshll.u32 %s2008_s13, 1  ;;  %s2015_s18 = smul.u32 3, %s1817_s19  ;;  %vm429_vm0 = vcmask 1043456   ;;  %vm525_vm1 = vcmask 1041409  }
  0x4a   : > { %404 = vmatpush.bf16.msra.mxu0 %v1381_v50  ;;  %s273_s8 = scalar_lea.vmem %s2132_s3, %s1351_s14  ;;  %vm523_vm2 = vcmask 1040384   ;;  %s1772_s28 = smov 64   ;;  %vm651_vm15 = vcmask 516096  }
  0x4b   : > { %417 = vmatpush.bf16.msra.mxu1 %v1385_v52  ;;  %514 = vmatpush.bf16.msra.mxu3 %v1429_v54  ;;  %v306_v13 = vld [vmem:[%s273_s8] sm:$0x3]  ;;  %s438_s10 = sshra.s32 %s2015_s18, 2  ;;  %s441_s21 = sand.u32 3, %s2015_s18 }
  0x4c   : > { %501 = vmatpush.bf16.msra.mxu2 %v1425_v59  ;;  %v316_v16 = vperm.slane %v306_v13, 0  ;;  %v317_v17 = vperm.slane %v306_v13, 1  ;;  %s1521_s22 = sshll.u32 %s438_s10, 3  ;;  %s1496_s5 = sshll.u32 %s2008_s13, 3 }
  0x4d   : > { %v312_v10 = vld.sshfl [vmem:[#allocation1] sm:$0xff pattern:$0x75316420]  ;;  %s444_s29 = sadd.s32 %s1521_s22, %s441_s21  ;;  %s2037_s11 = scalar_lea.vmem %s2133_s4, %s1496_s5 }
  0x4e   : > { %405 = vmatpush.bf16.msra.mxu0 %v1373_v60  ;;  %515 = vmatmul.bf16.vlgmr.msra.gmra.mxu3 %v1771_v3  ;;  %v314_v12 = vpack.c.bf16 %v312_v10, %v312_v10  ;;  %s445_s26 = scalar_lea.vmem [#allocation2], %s444_s29  ;;  %s650_s12 = scalar_lea.vmem %s2037_s11, %s2015_s18 }
  0x4f   : > { %696 = vmatpush.bf16.msrb.mxu3 %v1930_v18  ;;  %418 = vmatpush.bf16.msra.mxu1 %v1377_v61  ;;  %s654_s25 = sadd.s32 1, %s1817_s19  ;;  %s1276_s15 = scalar_lea.vmem %s2037_s11, %s1817_s19 }
  0x50   : > { %683 = vmatpush.bf16.msrb.mxu2 %v1936_v24  ;;  %s655_s24 = sshra.s32 %s654_s25, 2  ;;  %s658_s27 = sand.u32 3, %s654_s25 }
  0x51   : > { %502 = vmatmul.bf16.vlgmr.msra.gmra.mxu2 %v1771_v3  ;;  %s1522_s30 = sshll.u32 %s655_s24, 3  ;;  %s2071_s7 = ssub.s32 2, %s1817_s19 }
  0x52   : > { %406 = vmatpush.bf16.msra.mxu0 %v1365_v2  ;;  %s661_s13 = sadd.s32 %s1522_s30, %s658_s27  ;;  %s837_s8 = sshra.s32 %s2071_s7, 2 }
  0x53   : > { %697 = vmatpush.bf16.msrb.mxu3 %v1945_v31  ;;  %419 = vmatpush.bf16.msra.mxu1 %v1369_v4  ;;  %s662_s14 = scalar_lea.vmem [#allocation2], %s661_s13  ;;  %s840_s18 = sand.u32 3, %s2071_s7 }
  0x54   : > { %684 = vmatpush.bf16.msrb.mxu2 %v1948_v33  ;;  %s1523_s10 = sshll.u32 %s837_s8, 3  ;;  %s1015_s29 = scalar_lea.vmem %s2037_s11, %s2071_s7 }
  0x55   : > { %s843_s21 = sadd.s32 %s1523_s10, %s840_s18 }
  0x56   : > { %407 = vmatpush.bf16.msra.mxu0 %v1357_v9  ;;  %s844_s22 = scalar_lea.vmem [#allocation2], %s843_s21 }
  0x57   : > { %698 = vmatpush.bf16.msrb.mxu3 %v1958_v43  ;;  %420 = vmatpush.bf16.msra.mxu1 %v1361_v11 }
  0x58   : > { %685 = vmatpush.bf16.msrb.mxu2 %v1962_v45 }
  0x59   : > { %408 = vmatmul.bf16.vlgmr.msra.gmra.mxu0 %v314_v12 }
  0x5a   : > { %865 = vmatpush.bf16.msrb.mxu0 %v1936_v24  ;;  %421 = vmatmul.bf16.vlgmr.msra.gmra.mxu1 %v314_v12 }
  0x5b   : > { %699 = vmatpush.bf16.msrb.mxu3 %v1429_v54  ;;  %878 = vmatpush.bf16.msrb.mxu1 %v1930_v18 }
  0x5c   : > { %686 = vmatpush.bf16.msrb.mxu2 %v1425_v59 }
  0x5e   : > { %866 = vmatpush.bf16.msrb.mxu0 %v1948_v33 }
  0x5f   : > { %1061 = vmatpush.bf16.msra.mxu3 %v1930_v18  ;;  %879 = vmatpush.bf16.msrb.mxu1 %v1945_v31 }
  0x60   : > { %1048 = vmatpush.bf16.msra.mxu2 %v1936_v24 }
  0x62   : > { %867 = vmatpush.bf16.msrb.mxu0 %v1962_v45 }
  0x63   : > { %1062 = vmatpush.bf16.msra.mxu3 %v1945_v31  ;;  %880 = vmatpush.bf16.msrb.mxu1 %v1958_v43 }
  0x64   : > { %1049 = vmatpush.bf16.msra.mxu2 %v1948_v33 }
  0x66   : > { %868 = vmatpush.bf16.msrb.mxu0 %v1425_v59 }
  0x67   : > { %1063 = vmatpush.bf16.msra.mxu3 %v1958_v43  ;;  %881 = vmatpush.bf16.msrb.mxu1 %v1429_v54 }
  0x68   : > { %1050 = vmatpush.bf16.msra.mxu2 %v1962_v45 }
  0x6b   : > { %1064 = vmatpush.bf16.msra.mxu3 %v1429_v54 }
  0x6c   : > { %1051 = vmatpush.bf16.msra.mxu2 %v1425_v59 }
  0xd1   : > { %v516_v14 = vpop.f32.mrf.mxu3 }
  0xd2   : > { %v522_v27 = vrot.slane %v516_v14, 7 }
  0xd4   : > { %v503_v15 = vpop.f32.mrf.mxu2 }
  0xd5   : > { %v526_v31 = vsel %vm525_vm1, %v503_v15, %v522_v27  ;;  %v524_v34 = vsel %vm523_vm2, %v503_v15, %v522_v27 }
  0xd6   : > { %v409_v18 = vpop.f32.mrf.mxu0  ;;  %v527_v32 = vrot.slane %v526_v31, 1 }
  0xd7   : > { %v422_v19 = vpop.f32.mrf.mxu1  ;;  %v410_v20 = vadd.f32 %v409_v18, %v316_v16 }
  0xd8   : > { %v423_v21 = vadd.f32 %v422_v19, %v317_v17 }
  0xd9   : > { %v518_v22 = vpop.f32.mrf.mxu3 }
  0xda   : > { %v428_v23 = vrot.slane %v423_v21, 4 }
  0xdc   : > { %v505_v24 = vpop.f32.mrf.mxu2  ;;  %v430_v25 = vsel %vm429_vm0, %v410_v20, %v428_v23  ;;  %v431_v26 = vsel %vm429_vm0, %v428_v23, %v410_v20 }
  0xdd   : > { %v432_v28 = vrot.slane %v431_v26, 4  ;;  %435 = vst [vmem:[#allocation2] sm:$0xff] %v430_v25 }
  0xde   : > { %v411_v29 = vpop.f32.mrf.mxu0 }
  0xdf   : > { %436 = vst [vmem:[#allocation2 + $0x8] sm:$0xff] %v432_v28  ;;  %v424_v30 = vpop.f32.mrf.mxu1 }
  0xe6   : > { %v446_v33 = vld [vmem:[%s445_s26] ss:$4 sm:$0x3]  ;;  %v1421_v35 = vld [vmem:[%s445_s26 + $0x8] ss:$4 sm:$0x3] }
  0xe7   : > { %v530_v36 = vadd.f32 %v524_v34, %v446_v33  ;;  %v531_v37 = vadd.f32 %v1421_v35, %v527_v32  ;;  %s1018_s26 = smul.u32 4294967293, %s1817_s19 }
  0xe9   : > { %v1454_v38 = vmul.f32 -1.442695, %v530_v36  ;;  %580 = vrot.lane.b32.xlu1 %v531_v37, %s1772_s28  ;;  %v1455_v39 = vmul.f32 -1.442695, %v531_v37  ;;  %v573_v47 = vrot.slane %v531_v37, 1  ;;  %v572_v56 = vrot.slane %v530_v36, 1 }
  0xea   : > { %s1019_s5 = sadd.s32 3, %s1018_s26 }
  0xeb   : > { %1573 = vpow2.f32 %v1454_v38  ;;  %s1020_s6 = sshra.s32 %s1019_s5, 2  ;;  %s1023_s9 = sand.u32 3, %s1019_s5 }
  0xec   : > { %1575 = vpow2.f32 %v1455_v39 }
  0xf1   : > { %v1574_v40 = vpop.eup %1573  ;;  %578 = vrot.lane.b32.xlu1 %v530_v36, %s1772_s28 }
  0xf2   : > { %v538_v41 = vadd.f32 1.0, %v1574_v40  ;;  %v1576_v42 = vpop.eup %1575 }
  0xf3   : > { %v539_v43 = vadd.f32 1.0, %v1576_v42 }
  0xf4   : > { %1577 = vrcp.f32 %v538_v41  ;;  %v551_v62 = vand.u32 2147483648, %v538_v41  ;;  %vm545_vm8 = vweird.f32 %v538_v41  ;;  %v549_v0 = vand.u32 2147483647, %v538_v41 }
  0xf5   : > { %1579 = vrcp.f32 %v539_v43  ;;  %v566_v51 = vand.u32 2147483648, %v539_v43  ;;  %v564_v53 = vand.u32 2147483647, %v539_v43  ;;  %vm560_vm4 = vweird.f32 %v539_v43 }
  0xf6   : > { %1581 = vtanh.f32 %v573_v47  ;;  %v552_v2 = vor.u32 1.1754944e-38, %v551_v62  ;;  %vm550_vm10 = vcmp.eq.f32.partialorder %v549_v0, 8.507059e+37 }
  0xf7   : > { %v567_v57 = vor.u32 1.1754944e-38, %v566_v51  ;;  %vm565_vm6 = vcmp.eq.f32.partialorder %v564_v53, 8.507059e+37  ;;  %1583 = vtanh.f32 %v572_v56 }
  0xfa   : > { %v1578_v44 = vpop.eup %1577 }
  0xfb   : > { %v541_v45 = vmul.f32 %v1578_v44, %v538_v41  ;;  %v1580_v46 = vpop.eup %1579  ;;  %vm546_vm7 = vweird.f32 %v1578_v44 }
  0xfc   : > { %v556_v48 = vmul.f32 %v1580_v46, %v539_v43  ;;  %vm561_vm3 = vweird.f32 %v1580_v46  ;;  %v1582_v60 = vpop.eup %1581  ;;  %vm547_vm9 = vmor %vm545_vm8, %vm546_vm7 }
  0xfd   : > { %v542_v49 = vsub.f32 1.0, %v541_v45  ;;  %vm562_vm5 = vmor %vm560_vm4, %vm561_vm3  ;;  %v1584_v4 = vpop.eup %1583 }
  0xfe   : > { %v557_v50 = vsub.f32 1.0, %v556_v48 }
  0xff   : > { %v543_v54 = vmul.f32 %v1578_v44, %v542_v49 }
 0x100   : > { %v558_v52 = vmul.f32 %v1580_v46, %v557_v50 }
 0x101   : > { %v544_v59 = vadd.f32 %v1578_v44, %v543_v54 }
 0x102   : > { %v559_v55 = vadd.f32 %v1580_v46, %v558_v52 }
 0x103   : > { %v548_v1 = vsel %vm547_vm9, %v1578_v44, %v544_v59 }
 0x104   : > { %v563_v58 = vsel %vm562_vm5, %v1580_v46, %v559_v55  ;;  %v553_v3 = vsel %vm550_vm10, %v552_v2, %v548_v1 }
 0x105   : > { %v568_v61 = vsel %vm565_vm6, %v567_v57, %v563_v58  ;;  %v626_v5 = vmul.f32 %v1584_v4, %v553_v3  ;;  %v624_v9 = vmul.f32 0.0, %v553_v3  ;;  %vm490_vm6 = vcmask 523264   ;;  %v663_v58 = vld [vmem:[%s662_s14] ss:$4 sm:$0x3] }
 0x106   : > { %v627_v63 = vmul.f32 %v1582_v60, %v568_v61  ;;  %v625_v6 = vmul.f32 0.0, %v568_v61 }
 0x108   : > { %632 = vrot.lane.b32.xlu0 %v627_v63, %s1772_s28  ;;  %v1461_v63 = vld [vmem:[%s662_s14 + $0x8] ss:$4 sm:$0x3] }
 0x110   : > { %630 = vrot.lane.b32.xlu0 %v626_v5, %s1772_s28 }
 0x15b   : > { %v581_v14 = vpop.permute.xlu1 %580 }
 0x15c   : > { %v583_v15 = vrot.slane %v581_v14, 1 }
 0x15e   : > { %v1457_v16 = vmul.f32 -1.442695, %v583_v15 }
 0x163   : > { %v579_v17 = vpop.permute.xlu1 %578 }
 0x164   : > { %v582_v18 = vrot.slane %v579_v17, 1 }
 0x166   : > { %v1456_v19 = vmul.f32 -1.442695, %v582_v18 }
 0x17a   : > { %v633_v7 = vpop.permute.xlu0 %632 }
 0x17b   : > { %v2025_v8 = vadd.f32 %v633_v7, %v625_v6 }
 0x17d   : > { %1585 = vtanh.f32 %v2025_v8 }
 0x182   : > { %v631_v10 = vpop.permute.xlu0 %630 }
 0x183   : > { %v1586_v11 = vpop.eup %1585  ;;  %v2028_v12 = vadd.f32 %v631_v10, %v624_v9 }
 0x184   : > { %644 = vrot.lane.b32.xlu2 %v1586_v11, %s1772_s28 }
 0x185   : > { %1587 = vtanh.f32 %v2028_v12 }
 0x186   : > { %1589 = vpow2.f32 %v1457_v16 }
 0x187   : > { %1591 = vpow2.f32 %v1456_v19 }
 0x18b   : > { %v1588_v13 = vpop.eup %1587 }
 0x18c   : > { %642 = vrot.lane.b32.xlu2 %v1588_v13, %s1772_s28  ;;  %v1590_v20 = vpop.eup %1589 }
 0x18d   : > { %v593_v21 = vadd.f32 1.0, %v1590_v20  ;;  %v1592_v22 = vpop.eup %1591 }
 0x18e   : > { %v592_v23 = vadd.f32 1.0, %v1592_v22 }
 0x18f   : > { %1593 = vrcp.f32 %v593_v21  ;;  %v620_v32 = vand.u32 2147483648, %v593_v21  ;;  %vm614_vm12 = vweird.f32 %v593_v21  ;;  %v618_v33 = vand.u32 2147483647, %v593_v21 }
 0x190   : > { %1595 = vrcp.f32 %v592_v23  ;;  %v605_v41 = vand.u32 2147483648, %v592_v23  ;;  %vm599_vm3 = vweird.f32 %v592_v23  ;;  %v603_v42 = vand.u32 2147483647, %v592_v23 }
 0x191   : > { %v621_v36 = vor.u32 1.1754944e-38, %v620_v32  ;;  %vm619_vm14 = vcmp.eq.f32.partialorder %v618_v33, 8.507059e+37 }
 0x192   : > { %v606_v45 = vor.u32 1.1754944e-38, %v605_v41  ;;  %vm604_vm5 = vcmp.eq.f32.partialorder %v603_v42, 8.507059e+37 }
 0x195   : > { %v1594_v24 = vpop.eup %1593 }
 0x196   : > { %v610_v25 = vmul.f32 %v1594_v24, %v593_v21  ;;  %v1596_v27 = vpop.eup %1595  ;;  %vm615_vm11 = vweird.f32 %v1594_v24 }
 0x197   : > { %v595_v29 = vmul.f32 %v1596_v27, %v592_v23  ;;  %vm616_vm13 = vmor %vm614_vm12, %vm615_vm11  ;;  %vm600_vm0 = vweird.f32 %v1596_v27 }
 0x198   : > { %v611_v26 = vsub.f32 1.0, %v610_v25  ;;  %vm601_vm4 = vmor %vm599_vm3, %vm600_vm0 }
 0x199   : > { %v596_v31 = vsub.f32 1.0, %v595_v29 }
 0x19a   : > { %v612_v28 = vmul.f32 %v1594_v24, %v611_v26 }
 0x19b   : > { %v597_v35 = vmul.f32 %v1596_v27, %v596_v31 }
 0x19c   : > { %v613_v30 = vadd.f32 %v1594_v24, %v612_v28 }
 0x19d   : > { %v598_v40 = vadd.f32 %v1596_v27, %v597_v35 }
 0x19e   : > { %v617_v34 = vsel %vm616_vm13, %v1594_v24, %v613_v30 }
 0x19f   : > { %v622_v37 = vsel %vm619_vm14, %v621_v36, %v617_v34  ;;  %v602_v44 = vsel %vm601_vm4, %v1596_v27, %v598_v40 }
 0x1a0   : > { %v607_v46 = vsel %vm604_vm5, %v606_v45, %v602_v44 }
 0x1de   : > { %v645_v38 = vpop.permute.xlu2 %644 }
 0x1df   : > { %v649_v39 = vmul.f32 %v645_v38, %v622_v37 }
 0x1e1   : > { %653 = vst.msk [vmem:[%s650_s12 + $0x4] sm:$0x1] %vm651_vm15, %v649_v39  ;;  %v668_v43 = vpack.c.bf16 %v649_v39, %v649_v39 }
 0x1e3   : > { %v672_v48 = vunpack.c.l.b16 %v668_v43 }
 0x1e5   : > { %v673_v51 = vrot.slane %v672_v48, 7 }
 0x1e6   : > { %v643_v47 = vpop.permute.xlu2 %642 }
 0x1e7   : > { %v648_v49 = vmul.f32 %v643_v47, %v607_v46 }
 0x1e9   : > { %652 = vst.msk [vmem:[%s650_s12] sm:$0x1] %vm651_vm15, %v648_v49  ;;  %v667_v50 = vpack.c.bf16 %v648_v49, %v648_v49  ;;  %s1524_s12 = sshll.u32 %s1020_s6, 3 }
 0x1ea   : > { %s1026_s25 = sadd.s32 %s1524_s12, %s1023_s9 }
 0x1eb   : > { %v671_v52 = vunpack.c.l.b16 %v667_v50  ;;  %s1027_s24 = scalar_lea.vmem [#allocation2], %s1026_s25 }
 0x1ed   : > { %v674_v53 = vsel %vm525_vm1, %v673_v51, %v671_v52 }
 0x1ee   : > { %v675_v54 = vpack.c.b16 %v674_v53, %v674_v53 }
 0x1f0   : > { %1462 = vmatmul.msk.bf16.vlgmr.msrb.gmra.mxu2 %vm490_vm6, %v675_v54  ;;  %1463 = vmatmul.msk.bf16.vlgmr.msrb.gmra.mxu3 %vm490_vm6, %v675_v54 }
 0x273   : > { %v688_v55 = vpop.f32.mrf.mxu2  ;;  %v701_v56 = vpop.f32.mrf.mxu3 }
 0x274   : > { %v707_v57 = vrot.slane %v701_v56, 7 }
 0x276   : > { %v708_v59 = vsel %vm523_vm2, %v688_v55, %v707_v57  ;;  %v709_v60 = vsel %vm525_vm1, %v688_v55, %v707_v57 }
 0x277   : > { %v710_v61 = vrot.slane %v709_v60, 1  ;;  %v713_v62 = vadd.f32 %v708_v59, %v663_v58 }
 0x279   : > { %v1464_v0 = vmul.f32 -1.442695, %v713_v62  ;;  %v714_v1 = vadd.f32 %v1461_v63, %v710_v61  ;;  %v755_v11 = vrot.slane %v713_v62, 1 }
 0x27b   : > { %1597 = vpow2.f32 %v1464_v0  ;;  %v703_v2 = vpop.f32.mrf.mxu3  ;;  %763 = vrot.lane.b32.xlu2 %v714_v1, %s1772_s28  ;;  %v1465_v3 = vmul.f32 -1.442695, %v714_v1  ;;  %v690_v4 = vpop.f32.mrf.mxu2  ;;  %v756_v15 = vrot.slane %v714_v1, 1 }
 0x27d   : > { %1599 = vpow2.f32 %v1465_v3 }
 0x281   : > { %v1598_v5 = vpop.eup %1597 }
 0x282   : > { %v721_v6 = vadd.f32 1.0, %v1598_v5 }
 0x283   : > { %v1600_v7 = vpop.eup %1599 }
 0x284   : > { %1601 = vrcp.f32 %v721_v6  ;;  %v722_v9 = vadd.f32 1.0, %v1600_v7  ;;  %v734_v18 = vand.u32 2147483648, %v721_v6  ;;  %v732_v20 = vand.u32 2147483647, %v721_v6 }
 0x285   : > { %vm728_vm8 = vweird.f32 %v721_v6 }
 0x286   : > { %1603 = vrcp.f32 %v722_v9  ;;  %v749_v22 = vand.u32 2147483648, %v722_v9  ;;  %v747_v25 = vand.u32 2147483647, %v722_v9  ;;  %v735_v26 = vor.u32 1.1754944e-38, %v734_v18 }
 0x287   : > { %1605 = vtanh.f32 %v755_v11  ;;  %vm733_vm11 = vcmp.eq.f32.partialorder %v732_v20, 8.507059e+37  ;;  %vm743_vm12 = vweird.f32 %v722_v9 }
 0x288   : > { %1607 = vtanh.f32 %v756_v15  ;;  %v750_v31 = vor.u32 1.1754944e-38, %v749_v22  ;;  %vm748_vm14 = vcmp.eq.f32.partialorder %v747_v25, 8.507059e+37  ;;  %v845_v25 = vld [vmem:[%s844_s22] ss:$4 sm:$0x3] }
 0x28a   : > { %v1602_v10 = vpop.eup %1601 }
 0x28b   : > { %v724_v13 = vmul.f32 %v1602_v10, %v721_v6  ;;  %vm729_vm7 = vweird.f32 %v1602_v10 }
 0x28c   : > { %v1604_v14 = vpop.eup %1603  ;;  %vm730_vm10 = vmor %vm728_vm8, %vm729_vm7 }
 0x28d   : > { %v725_v16 = vsub.f32 1.0, %v724_v13  ;;  %v739_v17 = vmul.f32 %v1604_v14, %v722_v9  ;;  %vm744_vm9 = vweird.f32 %v1604_v14  ;;  %v1606_v29 = vpop.eup %1605 }
 0x28e   : > { %vm745_vm13 = vmor %vm743_vm12, %vm744_vm9  ;;  %v1608_v34 = vpop.eup %1607 }
 0x28f   : > { %v726_v19 = vmul.f32 %v1602_v10, %v725_v16  ;;  %v740_v21 = vsub.f32 1.0, %v739_v17 }
 0x291   : > { %v727_v23 = vadd.f32 %v1602_v10, %v726_v19  ;;  %v741_v24 = vmul.f32 %v1604_v14, %v740_v21 }
 0x293   : > { %v731_v27 = vsel %vm730_vm10, %v1602_v10, %v727_v23  ;;  %v742_v28 = vadd.f32 %v1604_v14, %v741_v24 }
 0x294   : > { %v736_v30 = vsel %vm733_vm11, %v735_v26, %v731_v27 }
 0x295   : > { %v809_v32 = vmul.f32 %v1606_v29, %v736_v30  ;;  %v746_v33 = vsel %vm745_vm13, %v1604_v14, %v742_v28  ;;  %v807_v37 = vmul.f32 %v736_v30, %v2028_v12  ;;  %v1473_v30 = vld [vmem:[%s844_s22 + $0x8] ss:$4 sm:$0x3] }
 0x296   : > { %v751_v35 = vsel %vm748_vm14, %v750_v31, %v746_v33 }
 0x297   : > { %813 = vrot.lane.b32.xlu1 %v809_v32, %s1772_s28  ;;  %v810_v36 = vmul.f32 %v1608_v34, %v751_v35  ;;  %v808_v40 = vmul.f32 %v751_v35, %v2025_v8 }
 0x299   : > { %815 = vrot.lane.b32.xlu0 %v810_v36, %s1772_s28 }
 0x2a1   : > { %761 = vrot.lane.b32.xlu0 %v713_v62, %s1772_s28 }
 0x2d5   : > { %v764_v8 = vpop.permute.xlu2 %763 }
 0x2d6   : > { %v766_v49 = vrot.slane %v764_v8, 1 }
 0x2d8   : > { %v1467_v51 = vmul.f32 -1.442695, %v766_v49 }
 0x309   : > { %v814_v38 = vpop.permute.xlu1 %813 }
 0x30a   : > { %v2054_v39 = vadd.f32 %v814_v38, %v807_v37 }
 0x30b   : > { %v816_v41 = vpop.permute.xlu0 %815 }
 0x30c   : > { %1609 = vtanh.f32 %v2054_v39  ;;  %v2058_v42 = vadd.f32 %v816_v41, %v808_v40 }
 0x30e   : > { %1611 = vtanh.f32 %v2058_v42 }
 0x312   : > { %v1610_v43 = vpop.eup %1609 }
 0x313   : > { %825 = vrot.lane.b32.xlu2 %v1610_v43, %s1772_s28  ;;  %v762_v45 = vpop.permute.xlu0 %761 }
 0x314   : > { %v1612_v44 = vpop.eup %1611  ;;  %v765_v12 = vrot.slane %v762_v45, 1 }
 0x315   : > { %827 = vrot.lane.b32.xlu1 %v1612_v44, %s1772_s28 }
 0x316   : > { %v1466_v46 = vmul.f32 -1.442695, %v765_v12 }
 0x318   : > { %1613 = vpow2.f32 %v1466_v46 }
 0x31e   : > { %v1614_v47 = vpop.eup %1613 }
 0x31f   : > { %v775_v48 = vadd.f32 1.0, %v1614_v47 }
 0x321   : > { %1615 = vrcp.f32 %v775_v48  ;;  %v788_v58 = vand.u32 2147483648, %v775_v48  ;;  %vm782_vm3 = vweird.f32 %v775_v48  ;;  %v786_v59 = vand.u32 2147483647, %v775_v48 }
 0x322   : > { %1617 = vpow2.f32 %v1467_v51 }
 0x323   : > { %v789_v61 = vor.u32 1.1754944e-38, %v788_v58  ;;  %vm787_vm5 = vcmp.eq.f32.partialorder %v786_v59, 8.507059e+37 }
 0x327   : > { %v1616_v50 = vpop.eup %1615 }
 0x328   : > { %v778_v52 = vmul.f32 %v1616_v50, %v775_v48  ;;  %v1618_v55 = vpop.eup %1617  ;;  %vm783_vm0 = vweird.f32 %v1616_v50 }
 0x329   : > { %v776_v57 = vadd.f32 1.0, %v1618_v55  ;;  %vm784_vm4 = vmor %vm782_vm3, %vm783_vm0 }
 0x32a   : > { %v779_v53 = vsub.f32 1.0, %v778_v52 }
 0x32b   : > { %1619 = vrcp.f32 %v776_v57  ;;  %v803_v6 = vand.u32 2147483648, %v776_v57  ;;  %vm797_vm8 = vweird.f32 %v776_v57  ;;  %v801_v7 = vand.u32 2147483647, %v776_v57 }
 0x32c   : > { %v780_v54 = vmul.f32 %v1616_v50, %v779_v53 }
 0x32d   : > { %v804_v10 = vor.u32 1.1754944e-38, %v803_v6  ;;  %vm802_vm10 = vcmp.eq.f32.partialorder %v801_v7, 8.507059e+37 }
 0x32e   : > { %v781_v56 = vadd.f32 %v1616_v50, %v780_v54 }
 0x330   : > { %v785_v60 = vsel %vm784_vm4, %v1616_v50, %v781_v56 }
 0x331   : > { %v790_v62 = vsel %vm787_vm5, %v789_v61, %v785_v60  ;;  %v1620_v1 = vpop.eup %1619 }
 0x332   : > { %v793_v2 = vmul.f32 %v1620_v1, %v776_v57  ;;  %vm798_vm7 = vweird.f32 %v1620_v1 }
 0x333   : > { %vm799_vm9 = vmor %vm797_vm8, %vm798_vm7 }
 0x334   : > { %v794_v3 = vsub.f32 1.0, %v793_v2 }
 0x336   : > { %v795_v4 = vmul.f32 %v1620_v1, %v794_v3 }
 0x338   : > { %v796_v5 = vadd.f32 %v1620_v1, %v795_v4 }
 0x33a   : > { %v800_v9 = vsel %vm799_vm9, %v1620_v1, %v796_v5 }
 0x33b   : > { %v805_v11 = vsel %vm802_vm10, %v804_v10, %v800_v9 }
 0x36d   : > { %v826_v63 = vpop.permute.xlu2 %825 }
 0x36e   : > { %v831_v0 = vmul.f32 %v826_v63, %v790_v62 }
 0x370   : > { %1468 = vst.msk [vmem:[%s1276_s15 + $0x1] sm:$0x1] %vm651_vm15, %v831_v0  ;;  %v849_v15 = vpack.c.bf16 %v831_v0, %v831_v0 }
 0x372   : > { %v853_v18 = vunpack.c.l.b16 %v849_v15 }
 0x387   : > { %v828_v13 = vpop.permute.xlu1 %827 }
 0x388   : > { %v832_v14 = vmul.f32 %v828_v13, %v805_v11 }
 0x38a   : > { %1469 = vst.msk [vmem:[%s1276_s15 + $0x5] sm:$0x1] %vm651_vm15, %v832_v14  ;;  %v850_v16 = vpack.c.bf16 %v832_v14, %v832_v14 }
 0x38c   : > { %v854_v17 = vunpack.c.l.b16 %v850_v16 }
 0x38e   : > { %v855_v19 = vrot.slane %v854_v17, 7 }
 0x390   : > { %v856_v20 = vsel %vm525_vm1, %v855_v19, %v853_v18 }
 0x391   : > { %v857_v21 = vpack.c.b16 %v856_v20, %v856_v20 }
 0x393   : > { %1474 = vmatmul.msk.bf16.vlgmr.msrb.gmra.mxu0 %vm490_vm6, %v857_v21  ;;  %1475 = vmatmul.msk.bf16.vlgmr.msrb.gmra.mxu1 %vm490_vm6, %v857_v21 }
 0x410   : > { %v870_v22 = vpop.f32.mrf.mxu0  ;;  %v883_v23 = vpop.f32.mrf.mxu1 }
 0x411   : > { %v889_v24 = vrot.slane %v883_v23, 7 }
 0x413   : > { %v890_v26 = vsel %vm523_vm2, %v870_v22, %v889_v24  ;;  %v891_v27 = vsel %vm525_vm1, %v870_v22, %v889_v24 }
 0x414   : > { %v892_v28 = vrot.slane %v891_v27, 1  ;;  %v895_v29 = vadd.f32 %v890_v26, %v845_v25 }
 0x416   : > { %v1476_v31 = vmul.f32 -1.442695, %v895_v29  ;;  %v896_v32 = vadd.f32 %v1473_v30, %v892_v28  ;;  %v937_v43 = vrot.slane %v895_v29, 1 }
 0x418   : > { %1621 = vpow2.f32 %v1476_v31  ;;  %v885_v33 = vpop.f32.mrf.mxu1  ;;  %945 = vrot.lane.b32.xlu2 %v896_v32, %s1772_s28  ;;  %v1477_v34 = vmul.f32 -1.442695, %v896_v32  ;;  %v872_v35 = vpop.f32.mrf.mxu0  ;;  %v938_v12 = vrot.slane %v896_v32, 1 }
 0x41a   : > { %1623 = vpow2.f32 %v1477_v34 }
 0x41e   : > { %v1622_v36 = vpop.eup %1621 }
 0x41f   : > { %v903_v37 = vadd.f32 1.0, %v1622_v36 }
 0x420   : > { %v1624_v38 = vpop.eup %1623 }
 0x421   : > { %1625 = vrcp.f32 %v903_v37  ;;  %v904_v40 = vadd.f32 1.0, %v1624_v38  ;;  %v916_v48 = vand.u32 2147483648, %v903_v37  ;;  %v914_v49 = vand.u32 2147483647, %v903_v37 }
 0x422   : > { %vm910_vm12 = vweird.f32 %v903_v37 }
 0x423   : > { %1627 = vrcp.f32 %v904_v40  ;;  %v931_v51 = vand.u32 2147483648, %v904_v40  ;;  %v929_v54 = vand.u32 2147483647, %v904_v40  ;;  %v917_v55 = vor.u32 1.1754944e-38, %v916_v48 }
 0x424   : > { %1629 = vtanh.f32 %v937_v43  ;;  %vm915_vm0 = vcmp.eq.f32.partialorder %v914_v49, 8.507059e+37  ;;  %vm925_vm3 = vweird.f32 %v904_v40 }
 0x425   : > { %1631 = vtanh.f32 %v938_v12  ;;  %v932_v60 = vor.u32 1.1754944e-38, %v931_v51  ;;  %vm930_vm5 = vcmp.eq.f32.partialorder %v929_v54, 8.507059e+37 }
 0x427   : > { %v1626_v41 = vpop.eup %1625 }
 0x428   : > { %v906_v44 = vmul.f32 %v1626_v41, %v903_v37  ;;  %vm911_vm11 = vweird.f32 %v1626_v41 }
 0x429   : > { %v1628_v45 = vpop.eup %1627  ;;  %vm912_vm14 = vmor %vm910_vm12, %vm911_vm11 }
 0x42a   : > { %v907_v46 = vsub.f32 1.0, %v906_v44  ;;  %v921_v47 = vmul.f32 %v1628_v45, %v904_v40  ;;  %vm926_vm13 = vweird.f32 %v1628_v45  ;;  %v1630_v58 = vpop.eup %1629 }
 0x42b   : > { %vm927_vm4 = vmor %vm925_vm3, %vm926_vm13  ;;  %v1632_v63 = vpop.eup %1631 }
 0x42c   : > { %v908_v8 = vmul.f32 %v1626_v41, %v907_v46  ;;  %v922_v50 = vsub.f32 1.0, %v921_v47 }
 0x42e   : > { %v909_v52 = vadd.f32 %v1626_v41, %v908_v8  ;;  %v923_v53 = vmul.f32 %v1628_v45, %v922_v50 }
 0x430   : > { %v913_v56 = vsel %vm912_vm14, %v1626_v41, %v909_v52  ;;  %v924_v57 = vadd.f32 %v1628_v45, %v923_v53 }
 0x431   : > { %v918_v59 = vsel %vm915_vm0, %v917_v55, %v913_v56  ;;  %v1028_v55 = vld [vmem:[%s1027_s24] ss:$4 sm:$0x3] }
 0x432   : > { %v991_v61 = vmul.f32 %v1630_v58, %v918_v59  ;;  %v928_v62 = vsel %vm927_vm4, %v1628_v45, %v924_v57  ;;  %v989_v2 = vmul.f32 %v918_v59, %v2054_v39  ;;  %v1483_v59 = vld [vmem:[%s1027_s24 + $0x8] ss:$4 sm:$0x3] }
 0x433   : > { %v933_v0 = vsel %vm930_vm5, %v932_v60, %v928_v62 }
 0x434   : > { %995 = vrot.lane.b32.xlu1 %v991_v61, %s1772_s28  ;;  %v992_v1 = vmul.f32 %v1632_v63, %v933_v0  ;;  %v990_v5 = vmul.f32 %v933_v0, %v2058_v42 }
 0x436   : > { %997 = vrot.lane.b32.xlu0 %v992_v1, %s1772_s28 }
 0x43e   : > { %943 = vrot.lane.b32.xlu0 %v895_v29, %s1772_s28 }
 0x472   : > { %v946_v42 = vpop.permute.xlu2 %945 }
 0x473   : > { %v948_v16 = vrot.slane %v946_v42, 1 }
 0x475   : > { %v1479_v18 = vmul.f32 -1.442695, %v948_v16 }
 0x4a6   : > { %v996_v3 = vpop.permute.xlu1 %995 }
 0x4a7   : > { %v2082_v4 = vadd.f32 %v996_v3, %v989_v2 }
 0x4a8   : > { %v998_v6 = vpop.permute.xlu0 %997 }
 0x4a9   : > { %1633 = vtanh.f32 %v2082_v4  ;;  %v2086_v7 = vadd.f32 %v998_v6, %v990_v5 }
 0x4ab   : > { %1635 = vtanh.f32 %v2086_v7 }
 0x4af   : > { %v1634_v9 = vpop.eup %1633 }
 0x4b0   : > { %1007 = vrot.lane.b32.xlu2 %v1634_v9, %s1772_s28  ;;  %v944_v11 = vpop.permute.xlu0 %943 }
 0x4b1   : > { %v1636_v10 = vpop.eup %1635  ;;  %v947_v39 = vrot.slane %v944_v11, 1 }
 0x4b2   : > { %1009 = vrot.lane.b32.xlu1 %v1636_v10, %s1772_s28 }
 0x4b3   : > { %v1478_v13 = vmul.f32 -1.442695, %v947_v39 }
 0x4b5   : > { %1637 = vpow2.f32 %v1478_v13 }
 0x4bb   : > { %v1638_v14 = vpop.eup %1637 }
 0x4bc   : > { %v957_v15 = vadd.f32 1.0, %v1638_v14 }
 0x4be   : > { %1639 = vrcp.f32 %v957_v15  ;;  %v970_v25 = vand.u32 2147483648, %v957_v15  ;;  %vm964_vm8 = vweird.f32 %v957_v15  ;;  %v968_v26 = vand.u32 2147483647, %v957_v15 }
 0x4bf   : > { %1641 = vpow2.f32 %v1479_v18 }
 0x4c0   : > { %v971_v28 = vor.u32 1.1754944e-38, %v970_v25  ;;  %vm969_vm10 = vcmp.eq.f32.partialorder %v968_v26, 8.507059e+37 }
 0x4c4   : > { %v1640_v17 = vpop.eup %1639 }
 0x4c5   : > { %v960_v19 = vmul.f32 %v1640_v17, %v957_v15  ;;  %v1642_v22 = vpop.eup %1641  ;;  %vm965_vm7 = vweird.f32 %v1640_v17 }
 0x4c6   : > { %v958_v24 = vadd.f32 1.0, %v1642_v22  ;;  %vm966_vm9 = vmor %vm964_vm8, %vm965_vm7 }
 0x4c7   : > { %v961_v20 = vsub.f32 1.0, %v960_v19 }
 0x4c8   : > { %1643 = vrcp.f32 %v958_v24  ;;  %v985_v37 = vand.u32 2147483648, %v958_v24  ;;  %vm979_vm12 = vweird.f32 %v958_v24  ;;  %v983_v38 = vand.u32 2147483647, %v958_v24 }
 0x4c9   : > { %v962_v21 = vmul.f32 %v1640_v17, %v961_v20 }
 0x4ca   : > { %v986_v41 = vor.u32 1.1754944e-38, %v985_v37  ;;  %vm984_vm14 = vcmp.eq.f32.partialorder %v983_v38, 8.507059e+37 }
 0x4cb   : > { %v963_v23 = vadd.f32 %v1640_v17, %v962_v21 }
 0x4cd   : > { %v967_v27 = vsel %vm966_vm9, %v1640_v17, %v963_v23 }
 0x4ce   : > { %v972_v29 = vsel %vm969_vm10, %v971_v28, %v967_v27  ;;  %v1644_v32 = vpop.eup %1643 }
 0x4cf   : > { %v975_v33 = vmul.f32 %v1644_v32, %v958_v24  ;;  %vm980_vm11 = vweird.f32 %v1644_v32 }
 0x4d0   : > { %vm981_vm13 = vmor %vm979_vm12, %vm980_vm11 }
 0x4d1   : > { %v976_v34 = vsub.f32 1.0, %v975_v33 }
 0x4d3   : > { %v977_v35 = vmul.f32 %v1644_v32, %v976_v34 }
 0x4d5   : > { %v978_v36 = vadd.f32 %v1644_v32, %v977_v35 }
 0x4d7   : > { %v982_v40 = vsel %vm981_vm13, %v1644_v32, %v978_v36 }
 0x4d8   : > { %v987_v43 = vsel %vm984_vm14, %v986_v41, %v982_v40 }
 0x50a   : > { %v1008_v30 = vpop.permute.xlu2 %1007 }
 0x50b   : > { %v1013_v31 = vmul.f32 %v1008_v30, %v972_v29 }
 0x50d   : > { %1016 = vst.msk [vmem:[%s1015_s29] sm:$0x1] %vm651_vm15, %v1013_v31  ;;  %v1032_v12 = vpack.c.bf16 %v1013_v31, %v1013_v31 }
 0x50f   : > { %v1036_v48 = vunpack.c.l.b16 %v1032_v12 }
 0x524   : > { %v1010_v44 = vpop.permute.xlu1 %1009 }
 0x525   : > { %v1014_v45 = vmul.f32 %v1010_v44, %v987_v43 }
 0x527   : > { %1017 = vst.msk [vmem:[%s1015_s29 + $0x4] sm:$0x1] %vm651_vm15, %v1014_v45  ;;  %v1033_v46 = vpack.c.bf16 %v1014_v45, %v1014_v45 }
 0x529   : > { %v1037_v47 = vunpack.c.l.b16 %v1033_v46 }
 0x52b   : > { %v1038_v8 = vrot.slane %v1037_v47, 7 }
 0x52d   : > { %v1039_v49 = vsel %vm525_vm1, %v1038_v8, %v1036_v48 }
 0x52e   : > { %v1040_v50 = vpack.c.b16 %v1039_v49, %v1039_v49 }
 0x530   : > { %1484 = vmatmul.msk.bf16.vlgmr.msra.gmra.mxu2 %vm490_vm6, %v1040_v50  ;;  %1485 = vmatmul.msk.bf16.vlgmr.msra.gmra.mxu3 %vm490_vm6, %v1040_v50 }
 0x5b3   : > { %v1053_v51 = vpop.f32.mrf.mxu2  ;;  %v1066_v52 = vpop.f32.mrf.mxu3 }
 0x5b4   : > { %v1072_v53 = vrot.slane %v1066_v52, 7 }
 0x5b6   : > { %v1074_v54 = vsel %vm525_vm1, %v1053_v51, %v1072_v53  ;;  %v1073_v56 = vsel %vm523_vm2, %v1053_v51, %v1072_v53 }
 0x5b7   : > { %v1075_v57 = vrot.slane %v1074_v54, 1  ;;  %v1078_v58 = vadd.f32 %v1073_v56, %v1028_v55 }
 0x5b9   : > { %v1079_v60 = vadd.f32 %v1483_v59, %v1075_v57  ;;  %1126 = vrot.lane.b32.xlu2 %v1078_v58, %s1772_s28  ;;  %v1486_v61 = vmul.f32 -1.442695, %v1078_v58  ;;  %v1120_v9 = vrot.slane %v1078_v58, 1 }
 0x5bb   : > { %v1487_v62 = vmul.f32 -1.442695, %v1079_v60  ;;  %1645 = vpow2.f32 %v1486_v61  ;;  %v1055_v63 = vpop.f32.mrf.mxu2  ;;  %v1068_v0 = vpop.f32.mrf.mxu3  ;;  %v1121_v39 = vrot.slane %v1079_v60, 1 }
 0x5bd   : > { %1647 = vpow2.f32 %v1487_v62 }
 0x5c1   : > { %v1646_v1 = vpop.eup %1645 }
 0x5c2   : > { %v1086_v2 = vadd.f32 1.0, %v1646_v1 }
 0x5c3   : > { %v1648_v3 = vpop.eup %1647 }
 0x5c4   : > { %v1087_v5 = vadd.f32 1.0, %v1648_v3  ;;  %1649 = vrcp.f32 %v1086_v2  ;;  %v1099_v15 = vand.u32 2147483648, %v1086_v2  ;;  %v1097_v16 = vand.u32 2147483647, %v1086_v2 }
 0x5c5   : > { %vm1093_vm2 = vweird.f32 %v1086_v2 }
 0x5c6   : > { %1651 = vrcp.f32 %v1087_v5  ;;  %v1114_v18 = vand.u32 2147483648, %v1087_v5  ;;  %v1112_v21 = vand.u32 2147483647, %v1087_v5  ;;  %v1100_v22 = vor.u32 1.1754944e-38, %v1099_v15 }
 0x5c7   : > { %1653 = vtanh.f32 %v1120_v9  ;;  %vm1098_vm3 = vcmp.eq.f32.partialorder %v1097_v16, 8.507059e+37  ;;  %vm1108_vm4 = vweird.f32 %v1087_v5 }
 0x5c8   : > { %1655 = vtanh.f32 %v1121_v39  ;;  %v1115_v27 = vor.u32 1.1754944e-38, %v1114_v18  ;;  %vm1113_vm7 = vcmp.eq.f32.partialorder %v1112_v21, 8.507059e+37 }
 0x5ca   : > { %v1650_v6 = vpop.eup %1649 }
 0x5cb   : > { %v1089_v10 = vmul.f32 %v1650_v6, %v1086_v2  ;;  %vm1094_vm1 = vweird.f32 %v1650_v6 }
 0x5cc   : > { %v1652_v11 = vpop.eup %1651  ;;  %vm1095_vm0 = vmor %vm1093_vm2, %vm1094_vm1 }
 0x5cd   : > { %v1090_v13 = vsub.f32 1.0, %v1089_v10  ;;  %v1104_v14 = vmul.f32 %v1652_v11, %v1087_v5  ;;  %vm1109_vm6 = vweird.f32 %v1652_v11  ;;  %v1654_v25 = vpop.eup %1653 }
 0x5ce   : > { %vm1110_vm5 = vmor %vm1108_vm4, %vm1109_vm6  ;;  %v1656_v30 = vpop.eup %1655 }
 0x5cf   : > { %v1091_v42 = vmul.f32 %v1650_v6, %v1090_v13  ;;  %v1105_v17 = vsub.f32 1.0, %v1104_v14 }
 0x5d1   : > { %v1092_v19 = vadd.f32 %v1650_v6, %v1091_v42  ;;  %v1106_v20 = vmul.f32 %v1652_v11, %v1105_v17 }
 0x5d3   : > { %v1096_v23 = vsel %vm1095_vm0, %v1650_v6, %v1092_v19  ;;  %v1107_v24 = vadd.f32 %v1652_v11, %v1106_v20 }
 0x5d4   : > { %v1101_v26 = vsel %vm1098_vm3, %v1100_v22, %v1096_v23 }
 0x5d5   : > { %v1174_v28 = vmul.f32 %v1654_v25, %v1101_v26  ;;  %v1111_v29 = vsel %vm1110_vm5, %v1652_v11, %v1107_v24  ;;  %v1172_v33 = vmul.f32 %v1101_v26, %v2082_v4 }
 0x5d6   : > { %v1116_v31 = vsel %vm1113_vm7, %v1115_v27, %v1111_v29 }
 0x5d7   : > { %1178 = vrot.lane.b32.xlu0 %v1174_v28, %s1772_s28  ;;  %v1175_v32 = vmul.f32 %v1656_v30, %v1116_v31  ;;  %v1173_v36 = vmul.f32 %v1116_v31, %v2086_v7 }
 0x5d9   : > { %1180 = vrot.lane.b32.xlu1 %v1175_v32, %s1772_s28 }
 0x5df   : > { %1128 = vrot.lane.b32.xlu0 %v1079_v60, %s1772_s28 }
 0x613   : > { %v1127_v46 = vpop.permute.xlu2 %1126 }
 0x614   : > { %v1130_v47 = vrot.slane %v1127_v46, 1 }
 0x616   : > { %v1488_v7 = vmul.f32 -1.442695, %v1130_v47 }
 0x649   : > { %v1179_v34 = vpop.permute.xlu0 %1178 }
 0x64a   : > { %v1184_v35 = vadd.f32 %v1179_v34, %v1172_v33 }
 0x64b   : > { %v1181_v37 = vpop.permute.xlu1 %1180 }
 0x64c   : > { %1657 = vtanh.f32 %v1184_v35  ;;  %v1185_v38 = vadd.f32 %v1181_v37, %v1173_v36 }
 0x64e   : > { %1659 = vtanh.f32 %v1185_v38 }
 0x651   : > { %v1129_v43 = vpop.permute.xlu0 %1128 }
 0x652   : > { %v1658_v40 = vpop.eup %1657  ;;  %v1131_v44 = vrot.slane %v1129_v43, 1 }
 0x653   : > { %1190 = vrot.lane.b32.xlu1 %v1658_v40, %s1772_s28 }
 0x654   : > { %v1660_v41 = vpop.eup %1659  ;;  %v1489_v45 = vmul.f32 -1.442695, %v1131_v44 }
 0x655   : > { %1192 = vrot.lane.b32.xlu2 %v1660_v41, %s1772_s28  ;;  %s1294_s28 = scalar_lea.vmem %s2037_s11, %s1018_s26 }
 0x656   : > { %1661 = vpow2.f32 %v1489_v45 }
 0x65c   : > { %v1662_v12 = vpop.eup %1661 }
 0x65d   : > { %v1141_v4 = vadd.f32 1.0, %v1662_v12 }
 0x65f   : > { %1663 = vrcp.f32 %v1141_v4  ;;  %v1168_v54 = vand.u32 2147483648, %v1141_v4  ;;  %vm1162_vm9 = vweird.f32 %v1141_v4  ;;  %v1166_v55 = vand.u32 2147483647, %v1141_v4 }
 0x660   : > { %1665 = vpow2.f32 %v1488_v7 }
 0x661   : > { %v1169_v57 = vor.u32 1.1754944e-38, %v1168_v54  ;;  %vm1167_vm11 = vcmp.eq.f32.partialorder %v1166_v55, 8.507059e+37 }
 0x665   : > { %v1664_v48 = vpop.eup %1663 }
 0x666   : > { %v1158_v8 = vmul.f32 %v1664_v48, %v1141_v4  ;;  %v1666_v50 = vpop.eup %1665  ;;  %vm1163_vm8 = vweird.f32 %v1664_v48 }
 0x667   : > { %v1140_v52 = vadd.f32 1.0, %v1666_v50  ;;  %vm1164_vm10 = vmor %vm1162_vm9, %vm1163_vm8 }
 0x668   : > { %v1159_v49 = vsub.f32 1.0, %v1158_v8 }
 0x669   : > { %1667 = vrcp.f32 %v1140_v52  ;;  %v1153_v2 = vand.u32 2147483648, %v1140_v52  ;;  %vm1147_vm13 = vweird.f32 %v1140_v52  ;;  %v1151_v3 = vand.u32 2147483647, %v1140_v52 }
 0x66a   : > { %v1160_v51 = vmul.f32 %v1664_v48, %v1159_v49 }
 0x66b   : > { %v1154_v6 = vor.u32 1.1754944e-38, %v1153_v2  ;;  %vm1152_vm1 = vcmp.eq.f32.partialorder %v1151_v3, 8.507059e+37 }
 0x66c   : > { %v1161_v53 = vadd.f32 %v1664_v48, %v1160_v51 }
 0x66e   : > { %v1165_v56 = vsel %vm1164_vm10, %v1664_v48, %v1161_v53 }
 0x66f   : > { %v1668_v58 = vpop.eup %1667  ;;  %v1170_v60 = vsel %vm1167_vm11, %v1169_v57, %v1165_v56 }
 0x670   : > { %v1143_v62 = vmul.f32 %v1668_v58, %v1140_v52  ;;  %vm1148_vm12 = vweird.f32 %v1668_v58 }
 0x671   : > { %vm1149_vm14 = vmor %vm1147_vm13, %vm1148_vm12 }
 0x672   : > { %v1144_v63 = vsub.f32 1.0, %v1143_v62 }
 0x674   : > { %v1145_v0 = vmul.f32 %v1668_v58, %v1144_v63 }
 0x676   : > { %v1146_v1 = vadd.f32 %v1668_v58, %v1145_v0 }
 0x678   : > { %v1150_v5 = vsel %vm1149_vm14, %v1668_v58, %v1146_v1 }
 0x679   : > { %v1155_v9 = vsel %vm1152_vm1, %v1154_v6, %v1150_v5 }
 0x6af   : > { %v1193_v59 = vpop.permute.xlu2 %1192 }
 0x6b0   : > { %v1197_v61 = vmul.f32 %v1193_v59, %v1170_v60 }
 0x6b2   : > { %1491 = vst.msk [vmem:[%s1294_s28 + $0x7] sm:$0x1] %vm651_vm15, %v1197_v61 }
 0x6c5   : > { %v1191_v10 = vpop.permute.xlu1 %1190 }
 0x6c6   : > { %v1196_v11 = vmul.f32 %v1191_v10, %v1155_v9 }
 0x6c8   : > { %1490 = vst.msk [vmem:[%s1294_s28 + $0x3] sm:$0x1] %vm651_vm15, %v1196_v11 }
 0x6c9 PF: > { %p17_p8 = scmp.ge.s32.totalorder %s1820_s20, 4   ;;  %s2138_s15 = smov %s1759_s16 }
 0x6ca   : > { %s2139_s16 = smov %s1763_s17  ;;  %s2140_s17 = smov %s1830_s23 }
 0x6cb   : > { %s2141_s18 = smov %s1820_s20  ;;  %19 = sbr.rel (!%p17_p8) target bundleno = 5 (0x5), region = 105 }
 0x6d0   :  { %1222 = vsyncpa [#allocation4], 1 }
 0x6d1   :  { %1224 = vsyncpa [#allocation4 + $0x1], 1 }
 0x6d2   :  { %1225 = vsyncpa [#allocation6], 1 }
 0x6d3   :  { %1227 = vsyncpa [#allocation6 + $0x1], 1 }

// kernel: _lambda_.6
= control target key start
LH: loop header
LB: loop body
LE: loop exit
PB: predicated region body
PF: predicated region fallthrough
CT: control target
= control target key end

     0   :  { %9 = vsyncpa [#allocation4], 0  ;;  %s2142_s0 = inlined_call_operand.vmem [shape: f32[2,2,4,64], index: 0, kind: input, shape index: {}]   ;;  %s2143_s1 = inlined_call_operand.hbm [shape: bf16[2,128,256], index: 1, kind: input, shape index: {}]   ;;  %s2144_s2 = inlined_call_operand.hbm [shape: bf16[2,64,256], index: 2, kind: input, shape index: {}]   ;;  %s2145_s3 = inlined_call_operand.vmem [shape: f32[2,1,256], index: 3, kind: input, shape index: {}]   ;;  %s2146_s4 = inlined_call_operand.vmem [shape: f32[2,2,4,64], index: 4, kind: output, shape index: {}]  }
   0x1   :  { %11 = vsyncpa [#allocation4 + $0x1], 0 }
   0x2   :  { %12 = vsyncpa [#allocation6], 0 }
   0x3   :  { %14 = vsyncpa [#allocation6 + $0x1], 0  ;;  %s1813_s15 = smov 0   ;;  %s1815_s16 = smov 0  }
   0x4   :  { %s1817_s17 = smov 0   ;;  %s1819_s18 = smov 0  }
   0x5 LB: > { %s1832_s19 = sadd.s32 4294967295, %s1782_s18   ;;  %s1835_s20 = sadd.s32 1, %s1782_s18   ;;  %s1782_s18 = sphi %s1819_s18, %s2154_s18   ;;  %s1778_s17 = sphi %s1817_s17, %s2153_s17   ;;  %s1774_s16 = sphi %s1815_s16, %s2152_s16   ;;  %s1770_s15 = sphi %s1813_s15, %s2151_s15  }
   0x6   : > { %s45_s21 = ssub.s32 %s1782_s18, %s1835_s20  ;;  %s48_s22 = sadd.s32 1, %s1778_s17 }
   0x7   : > { %p46_p0 = scmp.eq.s32.totalorder %s45_s21, 0  ;;  %p55_p1 = scmp.ne.s32.totalorder %s1778_s17, %s1774_s16 }
   0x8   : > { %p56_p2 = scmp.eq.s32.totalorder %s1782_s18, 0  ;;  %p61_p3 = scmp.ne.s32.totalorder %s1774_s16, %s1770_s15 }
   0x9   : > { %s1845_s23 = scalar_select %p46_p0, %s1778_s17, %s48_s22  }
   0xa   : > { %p1847_p4 = por %p56_p2, %p55_p1  ;;  %p62_p5 = scmp.eq.s32.totalorder %s1832_s19, 0 }
   0xb   : > { %p1551_p6 = scmp.lt.s32.totalorder %s1782_s18, 2  ;;  %s1858_s26 = sand.u32 1, %s1778_s17  }
   0xc   : > { %p1853_p7 = por %p62_p5, %p61_p3  ;;  %s1355_s27 = sshll.u32 %s1858_s26, 7 }
   0xd   : > { %s1509_s28 = sshll.u32 %s1782_s18, 7  ;;  %s170_s6 = scalar_lea.vmem [#allocation3], %s1355_s27 }
   0xe   : > { %s175_s5 = scalar_lea.hbm %s2143_s1, %s1509_s28  ;;  %s178_s7 = sshll.u32 %s170_s6, 4  ;;  %s179_s7 = int_to_ptr.vmem [resolvable:$true] %s178_s7 }
   0xf   : > { %s176_s8 = sshll.u32 %s175_s5, 4  ;;  %p1867_p8 = pnand %p1551_p6, %p1847_p4  ;;  %s177_s8 = int_to_ptr.hbm [resolvable:$true] %s176_s8 }
  0x10   : > { %p1361_p9 = scmp.ge.s32.totalorder %s1782_s18, 1  ;;  %s167_s10 = scalar_lea.sflag [#allocation4], %s1858_s26 }
  0x11   : > { %s1684_s11 = sshra.s32 %s177_s8, 4  ;;  %p1688_p11 = pneg %p1867_p8  ;;  %s1685_s11 = int_to_ptr.hbm [resolvable:$true] %s1684_s11 }
  0x12   : > { %s1686_s12 = scalar_lea.hbm %s1685_s11, 128  ;;  %s1691_s15 = scalar_lea.hbm %s2143_s1, 256 }
  0x13   : > { %p1687_p10 = scmp.ne.s32.totalorder %s1685_s11, %s1686_s12  ;;  %p1692_p0 = scmp.lt.s32.totalorder %s1685_s11, %s2143_s1 }
  0x14   : > { %p1693_p1 = scmp.lt.s32.totalorder %s1691_s15, %s1686_s12 }
  0x15   : > { %p1689_p12 = pnand %p1688_p11, %p1687_p10 }
  0x16   : > { %p1694_p2 = por %p1693_p1, %p1692_p0 }
  0x17   : > { %p1690_p13 = pneg %p1689_p12 }
  0x19   : > { %p1695_p3 = pnand %p1694_p2, %p1690_p13 }
  0x1b   : > { %1698 = shalt.err (!%p1695_p3)
}
  0x1c   : > { %s1784_s24 = smov 128   ;;  %s1785_s27 = smov 8  }
  0x1d   : > { %1547 = dma.hbm_to_vmem [thread:$0]  (!%p1867_p8), %s177_s8, 2048, %s179_s7, %s167_s10, %s1784_s24, %s1784_s24, %s1785_s27  }
  0x1e   : > { %p215_p4 = scmp.lt.s32.totalorder %s1782_s18, 3  ;;  %s1358_s28 = sshll.u32 %s1858_s26, 6 }
  0x1f   : > { %s1510_s29 = sshll.u32 %s1782_s18, 6  ;;  %s192_s12 = scalar_lea.vmem [#allocation5], %s1358_s28 }
  0x20   : > { %p1894_p5 = pnand %p1361_p9, %p215_p4  ;;  %s197_s11 = scalar_lea.hbm %s2144_s2, %s1510_s29 }
  0x21   : > { %s200_s13 = sshll.u32 %s192_s12, 4  ;;  %s198_s14 = sshll.u32 %s197_s11, 4  ;;  %s201_s13 = int_to_ptr.vmem [resolvable:$true] %s200_s13  ;;  %s199_s14 = int_to_ptr.hbm [resolvable:$true] %s198_s14 }
  0x22   : > { %s189_s15 = scalar_lea.sflag [#allocation6], %s1858_s26  ;;  %s1714_s7 = sshra.s32 %s199_s14, 4  ;;  %s1715_s7 = int_to_ptr.hbm [resolvable:$true] %s1714_s7 }
  0x23   : > { %s1716_s8 = scalar_lea.hbm %s1715_s7, 64  ;;  %s1721_s21 = scalar_lea.hbm %s2144_s2, 128 }
  0x24   : > { %p1717_p6 = scmp.ne.s32.totalorder %s1715_s7, %s1716_s8  ;;  %p1722_p12 = scmp.lt.s32.totalorder %s1715_s7, %s2144_s2 }
  0x25   : > { %p1723_p13 = scmp.lt.s32.totalorder %s1721_s21, %s1716_s8 }
  0x26   : > { %p1719_p9 = pnand %p1717_p6, %p1688_p11 }
  0x27   : > { %p1724_p0 = por %p1723_p13, %p1722_p12 }
  0x28   : > { %p1720_p10 = pneg %p1719_p9 }
  0x2a   : > { %p1725_p1 = pnand %p1724_p0, %p1720_p10 }
  0x2c   : > { %1728 = shalt.err (!%p1725_p1)
}
  0x2d   : > { %1550 = dma.hbm_to_vmem [thread:$0]  (!%p1867_p8), %s199_s14, 1024, %s201_s13, %s189_s15, %s1784_s24, %s1784_s24, %s1785_s27  }
  0x2e   : > { %219 = sbr.rel (%p1894_p5) target bundleno = 1855 (0x73f), region = 36  ;;  %s221_s26 = sand.u32 (!%p1894_p5), 1, %s1774_s16  }
  0x2f   : > { %s1362_s28 = sshll.u32 (!%p1894_p5), %s221_s26, 7  ;;  %s222_s5 = scalar_lea.sflag (!%p1894_p5), [#allocation4], %s221_s26 }
  0x30   : > { %s1919_s6 = scalar_lea.vmem (!%p1894_p5), [#allocation3], %s1362_s28 }
  0x33   : > { %1761 = dma.done.wait (%p1853_p7), %s222_s5, 2048  }
  0x34   : > { %1763 = vsyncadd (%p1853_p7), %s222_s5, 4294965248  ;;  %s1363_s9 = sshll.u32 %s221_s26, 6  ;;  %s232_s11 = scalar_lea.sflag [#allocation6], %s221_s26 }
  0x35   : > { %s1925_s12 = scalar_lea.vmem [#allocation5], %s1363_s9 }
  0x36   : > { %1765 = dma.done.wait (%p1853_p7), %s232_s11, 1024  }
  0x37   : > { %1767 = vsyncadd (%p1853_p7), %s232_s11, 4294966272  ;;  %v1367_v0 = vld [vmem:[%s2142_s0 + $0x8] sm:$0xf]  ;;  %s1786_s30 = smov 64   ;;  %v1527_v2 = vld [vmem:[%s1919_s6 + $0x74] sm:$0xf0] }
  0x38   : > { %v1427_v1 = vld [vmem:[%s1919_s6 + $0x70] sm:$0xf]  ;;  %287 = vrot.lane.b32.xlu0 %v1367_v0, %s1786_s30  ;;  %v1526_v3 = vld [vmem:[%s1919_s6 + $0x74] sm:$0xf]  ;;  %v1429_v4 = vld [vmem:[%s1919_s6 + $0x78] sm:$0xf0] }
  0x39   : > { %v1428_v5 = vor.u32 %v1527_v2, %v1427_v1  ;;  %v1432_v6 = vor.u32 %v1526_v3, %v1429_v4  ;;  %v1419_v7 = vld [vmem:[%s1919_s6 + $0x60] sm:$0xf]  ;;  %v1525_v8 = vld [vmem:[%s1919_s6 + $0x64] sm:$0xf0]  ;;  %v1524_v9 = vld [vmem:[%s1919_s6 + $0x64] sm:$0xf] }
  0x3a   : > { %v1421_v10 = vld [vmem:[%s1919_s6 + $0x68] sm:$0xf0]  ;;  %v1420_v11 = vor.u32 %v1525_v8, %v1419_v7  ;;  %v1411_v13 = vld [vmem:[%s1919_s6 + $0x50] sm:$0xf]  ;;  %v1523_v14 = vld [vmem:[%s1919_s6 + $0x54] sm:$0xf0] }
  0x3b   : > { %414 = vmatpush.bf16.msra.mxu0 %v1428_v5  ;;  %427 = vmatpush.bf16.msra.mxu1 %v1432_v6  ;;  %v1424_v12 = vor.u32 %v1524_v9, %v1421_v10  ;;  %v1522_v15 = vld [vmem:[%s1919_s6 + $0x54] sm:$0xf]  ;;  %v1413_v16 = vld [vmem:[%s1919_s6 + $0x58] sm:$0xf0]  ;;  %v1412_v18 = vor.u32 %v1523_v14, %v1411_v13  ;;  %v1403_v20 = vld [vmem:[%s1919_s6 + $0x40] sm:$0xf] }
  0x3c   : > { %v1368_v17 = vld [vmem:[%s2142_s0 + $0xc] sm:$0xf]  ;;  %v1416_v19 = vor.u32 %v1522_v15, %v1413_v16  ;;  %v1521_v21 = vld [vmem:[%s1919_s6 + $0x44] sm:$0xf0]  ;;  %v1520_v22 = vld [vmem:[%s1919_s6 + $0x44] sm:$0xf] }
  0x3d   : > { %v1404_v23 = vor.u32 %v1521_v21, %v1403_v20  ;;  %v1405_v24 = vld [vmem:[%s1919_s6 + $0x48] sm:$0xf0]  ;;  %v1534_v25 = vld [vmem:[%s1925_s12 + $0x34] sm:$0xf]  ;;  %v1465_v26 = vld [vmem:[%s1925_s12 + $0x38] sm:$0xf0] }
  0x3e   : > { %v1408_v27 = vor.u32 %v1520_v22, %v1405_v24  ;;  %v1957_v28 = vor.u32 %v1534_v25, %v1465_v26  ;;  %v1463_v29 = vld [vmem:[%s1925_s12 + $0x30] sm:$0xf]  ;;  %v1535_v30 = vld [vmem:[%s1925_s12 + $0x34] sm:$0xf0]  ;;  %v1518_v34 = vld [vmem:[%s1919_s6 + $0x34] sm:$0xf] }
  0x3f   : > { %415 = vmatpush.bf16.msra.mxu0 %v1420_v11  ;;  %428 = vmatpush.bf16.msra.mxu1 %v1424_v12  ;;  %v1961_v31 = vor.u32 %v1535_v30, %v1463_v29  ;;  %v1395_v32 = vld [vmem:[%s1919_s6 + $0x30] sm:$0xf]  ;;  %v1519_v33 = vld [vmem:[%s1919_s6 + $0x34] sm:$0xf0]  ;;  %v1397_v36 = vld [vmem:[%s1919_s6 + $0x38] sm:$0xf0] }
  0x40   : > { %289 = vrot.lane.b32.xlu0 %v1368_v17, %s1786_s30  ;;  %524 = vmatpush.bf16.msra.mxu3 %v1957_v28  ;;  %v1396_v35 = vor.u32 %v1519_v33, %v1395_v32  ;;  %v1532_v37 = vld [vmem:[%s1925_s12 + $0x24] sm:$0xf]  ;;  %v1457_v38 = vld [vmem:[%s1925_s12 + $0x28] sm:$0xf0]  ;;  %v1400_v39 = vor.u32 %v1518_v34, %v1397_v36  ;;  %v1455_v41 = vld [vmem:[%s1925_s12 + $0x20] sm:$0xf] }
  0x41   : > { %511 = vmatpush.bf16.msra.mxu2 %v1961_v31  ;;  %v1971_v40 = vor.u32 %v1532_v37, %v1457_v38  ;;  %v1533_v42 = vld [vmem:[%s1925_s12 + $0x24] sm:$0xf0]  ;;  %v1387_v44 = vld [vmem:[%s1919_s6 + $0x20] sm:$0xf]  ;;  %v1516_v46 = vld [vmem:[%s1919_s6 + $0x24] sm:$0xf] }
  0x42   : > { %v1975_v43 = vor.u32 %v1533_v42, %v1455_v41  ;;  %v1517_v45 = vld [vmem:[%s1919_s6 + $0x24] sm:$0xf0]  ;;  %v1389_v48 = vld [vmem:[%s1919_s6 + $0x28] sm:$0xf0]  ;;  %v1530_v49 = vld [vmem:[%s1925_s12 + $0x14] sm:$0xf] }
  0x43   : > { %416 = vmatpush.bf16.msra.mxu0 %v1412_v18  ;;  %429 = vmatpush.bf16.msra.mxu1 %v1416_v19  ;;  %v1388_v47 = vor.u32 %v1517_v45, %v1387_v44  ;;  %v1449_v50 = vld [vmem:[%s1925_s12 + $0x18] sm:$0xf0]  ;;  %v1392_v51 = vor.u32 %v1516_v46, %v1389_v48  ;;  %v1447_v53 = vld [vmem:[%s1925_s12 + $0x10] sm:$0xf]  ;;  %v1531_v54 = vld [vmem:[%s1925_s12 + $0x14] sm:$0xf0] }
  0x44   : > { %525 = vmatpush.bf16.msra.mxu3 %v1971_v40  ;;  %v1452_v52 = vor.u32 %v1530_v49, %v1449_v50  ;;  %v1448_v55 = vor.u32 %v1531_v54, %v1447_v53  ;;  %v1379_v56 = vld [vmem:[%s1919_s6 + $0x10] sm:$0xf]  ;;  %v1515_v57 = vld [vmem:[%s1919_s6 + $0x14] sm:$0xf0]  ;;  %v1514_v58 = vld [vmem:[%s1919_s6 + $0x14] sm:$0xf] }
  0x45   : > { %512 = vmatpush.bf16.msra.mxu2 %v1975_v43  ;;  %v1380_v59 = vor.u32 %v1515_v57, %v1379_v56  ;;  %v1381_v60 = vld [vmem:[%s1919_s6 + $0x18] sm:$0xf0]  ;;  %v1528_v61 = vld [vmem:[%s1925_s12 + $0x4] sm:$0xf]  ;;  %v1441_v62 = vld [vmem:[%s1925_s12 + $0x8] sm:$0xf0] }
  0x46   : > { %v1384_v63 = vor.u32 %v1514_v58, %v1381_v60  ;;  %v1444_v0 = vor.u32 %v1528_v61, %v1441_v62  ;;  %v1439_v1 = vld [vmem:[%s1925_s12] sm:$0xf]  ;;  %v1529_v2 = vld [vmem:[%s1925_s12 + $0x4] sm:$0xf0]  ;;  %v1512_v6 = vld [vmem:[%s1919_s6 + $0x4] sm:$0xf] }
  0x47   : > { %417 = vmatpush.bf16.msra.mxu0 %v1404_v23  ;;  %430 = vmatpush.bf16.msra.mxu1 %v1408_v27  ;;  %v1440_v3 = vor.u32 %v1529_v2, %v1439_v1  ;;  %v1371_v4 = vld [vmem:[%s1919_s6] sm:$0xf]  ;;  %v1513_v5 = vld [vmem:[%s1919_s6 + $0x4] sm:$0xf0]  ;;  %v1373_v8 = vld [vmem:[%s1919_s6 + $0x8] sm:$0xf0] }
  0x48   : > { %526 = vmatpush.bf16.msra.mxu3 %v1452_v52  ;;  %v1372_v7 = vor.u32 %v1513_v5, %v1371_v4  ;;  %v1376_v9 = vor.u32 %v1512_v6, %v1373_v8  ;;  %v1787_v10 = vmov 0   ;;  %vm293_vm0 = vcmask 523264   ;;  %v280_v11 = vld [vmem:[%s2142_s0] sm:$0xf]  ;;  %v281_v14 = vld [vmem:[%s2142_s0 + $0x4] sm:$0xf] }
  0x49   : > { %513 = vmatpush.bf16.msra.mxu2 %v1448_v55  ;;  %p270_p7 = scmp.lt.s32.totalorder %s1832_s19, 1  ;;  %s2028_s26 = smul.u32 3, %s1832_s19  ;;  %vm443_vm1 = vcmask 1043456   ;;  %vm538_vm2 = vcmask 1041409   ;;  %vm536_vm3 = vcmask 1040384  }
  0x4a   : > { %s667_s14 = sadd.s32 1, %s1832_s19  ;;  %s2084_s22 = ssub.s32 2, %s1832_s19 }
  0x4b   : > { %418 = vmatpush.bf16.msra.mxu0 %v1396_v35  ;;  %431 = vmatpush.bf16.msra.mxu1 %v1400_v39  ;;  %s2021_s18 = scalar_select %p270_p7, %s1832_s19, 1 }
  0x4c   : > { %527 = vmatpush.bf16.msra.mxu3 %v1444_v0  ;;  %s452_s28 = sshra.s32 %s2028_s26, 2  ;;  %s455_s5 = sand.u32 3, %s2028_s26 }
  0x4d   : > { %514 = vmatpush.bf16.msra.mxu2 %v1440_v3  ;;  %s1364_s10 = sshll.u32 %s2021_s18, 1  ;;  %s1536_s6 = sshll.u32 %s452_s28, 3 }
  0x4e   : > { %s273_s29 = scalar_lea.vmem %s2145_s3, %s1364_s10  ;;  %s458_s9 = sadd.s32 %s1536_s6, %s455_s5 }
  0x4f   : > { %419 = vmatpush.bf16.msra.mxu0 %v1388_v47  ;;  %432 = vmatpush.bf16.msra.mxu1 %v1392_v51  ;;  %v320_v23 = vld [vmem:[%s273_s29] sm:$0x3]  ;;  %s459_s11 = scalar_lea.vmem [#allocation2], %s458_s9  ;;  %s1511_s12 = sshll.u32 %s2021_s18, 3 }
  0x50   : > { %709 = vmatpush.bf16.msrb.mxu3 %v1957_v28  ;;  %515 = vmatmul.bf16.vlgmr.msra.gmra.mxu2 %v1787_v10  ;;  %v331_v24 = vperm.slane %v320_v23, 1  ;;  %v330_v25 = vperm.slane %v320_v23, 0  ;;  %s2050_s25 = scalar_lea.vmem %s2146_s4, %s1511_s12  ;;  %s668_s15 = sshra.s32 %s667_s14, 2 }
  0x51   : > { %696 = vmatpush.bf16.msrb.mxu2 %v1961_v31  ;;  %528 = vmatmul.bf16.vlgmr.msra.gmra.mxu3 %v1787_v10  ;;  %s663_s13 = scalar_lea.vmem %s2050_s25, %s2028_s26  ;;  %s671_s7 = sand.u32 3, %s667_s14 }
  0x52   : > { %s1537_s8 = sshll.u32 %s668_s15, 3  ;;  %s1289_s21 = scalar_lea.vmem %s2050_s25, %s1832_s19 }
  0x53   : > { %420 = vmatpush.bf16.msra.mxu0 %v1380_v59  ;;  %433 = vmatpush.bf16.msra.mxu1 %v1384_v63  ;;  %s674_s18 = sadd.s32 %s1537_s8, %s671_s7  ;;  %s850_s29 = sshra.s32 %s2084_s22, 2 }
  0x54   : > { %710 = vmatpush.bf16.msrb.mxu3 %v1971_v40  ;;  %s675_s10 = scalar_lea.vmem [#allocation2], %s674_s18  ;;  %s853_s26 = sand.u32 3, %s2084_s22 }
  0x55   : > { %697 = vmatpush.bf16.msrb.mxu2 %v1975_v43  ;;  %s1538_s28 = sshll.u32 %s850_s29, 3  ;;  %s1028_s9 = scalar_lea.vmem %s2050_s25, %s2084_s22 }
  0x56   : > { %s856_s5 = sadd.s32 %s1538_s28, %s853_s26 }
  0x57   : > { %421 = vmatpush.bf16.msra.mxu0 %v1372_v7  ;;  %434 = vmatpush.bf16.msra.mxu1 %v1376_v9  ;;  %s857_s6 = scalar_lea.vmem [#allocation2], %s856_s5 }
  0x58   : > { %711 = vmatpush.bf16.msrb.mxu3 %v1452_v52 }
  0x59   : > { %698 = vmatpush.bf16.msrb.mxu2 %v1448_v55 }
  0x5b   : > { %891 = vmatpush.bf16.msrb.mxu1 %v1957_v28  ;;  %878 = vmatpush.bf16.msrb.mxu0 %v1961_v31 }
  0x5c   : > { %712 = vmatpush.bf16.msrb.mxu3 %v1444_v0 }
  0x5d   : > { %699 = vmatpush.bf16.msrb.mxu2 %v1440_v3 }
  0x5f   : > { %892 = vmatpush.bf16.msrb.mxu1 %v1971_v40  ;;  %879 = vmatpush.bf16.msrb.mxu0 %v1975_v43 }
  0x60   : > { %1074 = vmatpush.bf16.msra.mxu3 %v1957_v28 }
  0x61   : > { %1061 = vmatpush.bf16.msra.mxu2 %v1961_v31 }
  0x63   : > { %893 = vmatpush.bf16.msrb.mxu1 %v1452_v52  ;;  %880 = vmatpush.bf16.msrb.mxu0 %v1448_v55 }
  0x64   : > { %1075 = vmatpush.bf16.msra.mxu3 %v1971_v40 }
  0x65   : > { %1062 = vmatpush.bf16.msra.mxu2 %v1975_v43 }
  0x67   : > { %894 = vmatpush.bf16.msrb.mxu1 %v1444_v0  ;;  %881 = vmatpush.bf16.msrb.mxu0 %v1440_v3 }
  0x68   : > { %1076 = vmatpush.bf16.msra.mxu3 %v1452_v52 }
  0x69   : > { %1063 = vmatpush.bf16.msra.mxu2 %v1448_v55 }
  0x6c   : > { %1077 = vmatpush.bf16.msra.mxu3 %v1444_v0 }
  0x6d   : > { %1064 = vmatpush.bf16.msra.mxu2 %v1440_v3 }
  0xaa   : > { %v288_v12 = vpop.permute.xlu0 %287 }
  0xab   : > { %v294_v13 = vsel %vm293_vm0, %v280_v11, %v288_v12 }
  0xac   : > { %323 = vst [vmem:[#allocation1] ss:$2 sm:$0xff] %v294_v13 }
  0xb2   : > { %v290_v15 = vpop.permute.xlu0 %289 }
  0xb3   : > { %v295_v16 = vsel %vm293_vm0, %v281_v14, %v290_v15 }
  0xb4   : > { %325 = vst [vmem:[#allocation1 + $0x1] ss:$2 sm:$0xff] %v295_v16 }
  0xbb   : > { %v326_v17 = vld.sshfl [vmem:[#allocation1] sm:$0xff pattern:$0x75316420] }
  0xbc   : > { %v328_v18 = vpack.c.bf16 %v326_v17, %v326_v17 }
  0xbe   : > { %422 = vmatmul.bf16.vlgmr.msra.gmra.mxu0 %v328_v18  ;;  %435 = vmatmul.bf16.vlgmr.msra.gmra.mxu1 %v328_v18 }
  0xd3   : > { %v516_v20 = vpop.f32.mrf.mxu2 }
  0xd4   : > { %v529_v19 = vpop.f32.mrf.mxu3 }
  0xd5   : > { %v535_v33 = vrot.slane %v529_v19, 7 }
  0xd7   : > { %v539_v37 = vsel %vm538_vm2, %v516_v20, %v535_v33  ;;  %v537_v40 = vsel %vm536_vm3, %v516_v20, %v535_v33 }
  0xd8   : > { %v540_v38 = vrot.slane %v539_v37, 1 }
  0xdb   : > { %v518_v22 = vpop.f32.mrf.mxu2 }
  0xdc   : > { %v531_v21 = vpop.f32.mrf.mxu3 }
 0x13b   : > { %v423_v26 = vpop.f32.mrf.mxu0  ;;  %v436_v27 = vpop.f32.mrf.mxu1 }
 0x13c   : > { %v437_v28 = vadd.f32 %v436_v27, %v331_v24  ;;  %v424_v29 = vadd.f32 %v423_v26, %v330_v25 }
 0x13e   : > { %v442_v30 = vrot.slane %v437_v28, 4 }
 0x140   : > { %v444_v31 = vsel %vm443_vm1, %v424_v29, %v442_v30  ;;  %v445_v32 = vsel %vm443_vm1, %v442_v30, %v424_v29  ;;  %vm664_vm1 = vcmask 516096  }
 0x141   : > { %v446_v34 = vrot.slane %v445_v32, 4  ;;  %449 = vst [vmem:[#allocation2] sm:$0xff] %v444_v31 }
 0x143   : > { %450 = vst [vmem:[#allocation2 + $0x8] sm:$0xff] %v446_v34  ;;  %v425_v35 = vpop.f32.mrf.mxu0  ;;  %v438_v36 = vpop.f32.mrf.mxu1 }
 0x14a   : > { %v460_v39 = vld [vmem:[%s459_s11] ss:$4 sm:$0x3]  ;;  %v1436_v41 = vld [vmem:[%s459_s11 + $0x8] ss:$4 sm:$0x3] }
 0x14b   : > { %v543_v42 = vadd.f32 %v537_v40, %v460_v39  ;;  %v544_v43 = vadd.f32 %v1436_v41, %v540_v38  ;;  %s1031_s11 = smul.u32 4294967293, %s1832_s19 }
 0x14d   : > { %v1469_v44 = vmul.f32 -1.442695, %v543_v42  ;;  %593 = vrot.lane.b32.xlu2 %v544_v43, %s1786_s30  ;;  %v1470_v45 = vmul.f32 -1.442695, %v544_v43  ;;  %v586_v53 = vrot.slane %v544_v43, 1  ;;  %v585_v62 = vrot.slane %v543_v42, 1 }
 0x14e   : > { %s1032_s12 = sadd.s32 3, %s1031_s11 }
 0x14f   : > { %1588 = vpow2.f32 %v1469_v44  ;;  %s1033_s24 = sshra.s32 %s1032_s12, 2  ;;  %s1036_s27 = sand.u32 3, %s1032_s12 }
 0x150   : > { %1590 = vpow2.f32 %v1470_v45 }
 0x155   : > { %v1589_v46 = vpop.eup %1588  ;;  %591 = vrot.lane.b32.xlu2 %v543_v42, %s1786_s30 }
 0x156   : > { %v551_v47 = vadd.f32 1.0, %v1589_v46  ;;  %v1591_v48 = vpop.eup %1590 }
 0x157   : > { %v552_v49 = vadd.f32 1.0, %v1591_v48 }
 0x158   : > { %1592 = vrcp.f32 %v551_v47  ;;  %v564_v4 = vand.u32 2147483648, %v551_v47  ;;  %vm558_vm9 = vweird.f32 %v551_v47  ;;  %v562_v6 = vand.u32 2147483647, %v551_v47 }
 0x159   : > { %1594 = vrcp.f32 %v552_v49  ;;  %v579_v57 = vand.u32 2147483648, %v552_v49  ;;  %v577_v59 = vand.u32 2147483647, %v552_v49  ;;  %vm573_vm5 = vweird.f32 %v552_v49 }
 0x15a   : > { %1596 = vtanh.f32 %v586_v53  ;;  %v565_v8 = vor.u32 1.1754944e-38, %v564_v4  ;;  %vm563_vm11 = vcmp.eq.f32.partialorder %v562_v6, 8.507059e+37 }
 0x15b   : > { %v580_v63 = vor.u32 1.1754944e-38, %v579_v57  ;;  %vm578_vm7 = vcmp.eq.f32.partialorder %v577_v59, 8.507059e+37  ;;  %1598 = vtanh.f32 %v585_v62 }
 0x15e   : > { %v1593_v50 = vpop.eup %1592 }
 0x15f   : > { %v554_v51 = vmul.f32 %v1593_v50, %v551_v47  ;;  %v1595_v52 = vpop.eup %1594  ;;  %vm559_vm8 = vweird.f32 %v1593_v50 }
 0x160   : > { %v569_v54 = vmul.f32 %v1595_v52, %v552_v49  ;;  %vm574_vm4 = vweird.f32 %v1595_v52  ;;  %v1597_v2 = vpop.eup %1596  ;;  %vm560_vm10 = vmor %vm558_vm9, %vm559_vm8 }
 0x161   : > { %v555_v55 = vsub.f32 1.0, %v554_v51  ;;  %vm575_vm6 = vmor %vm573_vm5, %vm574_vm4  ;;  %v1599_v10 = vpop.eup %1598 }
 0x162   : > { %v570_v56 = vsub.f32 1.0, %v569_v54 }
 0x163   : > { %v556_v60 = vmul.f32 %v1593_v50, %v555_v55 }
 0x164   : > { %v571_v58 = vmul.f32 %v1595_v52, %v570_v56 }
 0x165   : > { %v557_v1 = vadd.f32 %v1593_v50, %v556_v60 }
 0x166   : > { %v572_v61 = vadd.f32 %v1595_v52, %v571_v58 }
 0x167   : > { %v561_v7 = vsel %vm560_vm10, %v1593_v50, %v557_v1 }
 0x168   : > { %v576_v0 = vsel %vm575_vm6, %v1595_v52, %v572_v61  ;;  %v566_v9 = vsel %vm563_vm11, %v565_v8, %v561_v7 }
 0x169   : > { %v581_v3 = vsel %vm578_vm7, %v580_v63, %v576_v0  ;;  %v639_v11 = vmul.f32 %v1599_v10, %v566_v9  ;;  %v637_v15 = vmul.f32 0.0, %v566_v9  ;;  %v676_v0 = vld [vmem:[%s675_s10] ss:$4 sm:$0x3] }
 0x16a   : > { %v640_v5 = vmul.f32 %v1597_v2, %v581_v3  ;;  %v638_v12 = vmul.f32 0.0, %v581_v3 }
 0x16c   : > { %645 = vrot.lane.b32.xlu1 %v640_v5, %s1786_s30  ;;  %v1476_v5 = vld [vmem:[%s675_s10 + $0x8] ss:$4 sm:$0x3] }
 0x174   : > { %643 = vrot.lane.b32.xlu1 %v639_v11, %s1786_s30 }
 0x1a7   : > { %v594_v20 = vpop.permute.xlu2 %593 }
 0x1a8   : > { %v596_v21 = vrot.slane %v594_v20, 1 }
 0x1aa   : > { %v1472_v22 = vmul.f32 -1.442695, %v596_v21 }
 0x1af   : > { %v592_v23 = vpop.permute.xlu2 %591 }
 0x1b0   : > { %v595_v24 = vrot.slane %v592_v23, 1 }
 0x1b2   : > { %v1471_v25 = vmul.f32 -1.442695, %v595_v24 }
 0x1de   : > { %v646_v13 = vpop.permute.xlu1 %645 }
 0x1df   : > { %v2038_v14 = vadd.f32 %v646_v13, %v638_v12 }
 0x1e1   : > { %1600 = vtanh.f32 %v2038_v14 }
 0x1e6   : > { %v644_v16 = vpop.permute.xlu1 %643 }
 0x1e7   : > { %v1601_v17 = vpop.eup %1600  ;;  %v2041_v18 = vadd.f32 %v644_v16, %v637_v15 }
 0x1e8   : > { %657 = vrot.lane.b32.xlu0 %v1601_v17, %s1786_s30 }
 0x1e9   : > { %1602 = vtanh.f32 %v2041_v18 }
 0x1ea   : > { %1604 = vpow2.f32 %v1472_v22 }
 0x1eb   : > { %1606 = vpow2.f32 %v1471_v25 }
 0x1ef   : > { %v1603_v19 = vpop.eup %1602 }
 0x1f0   : > { %655 = vrot.lane.b32.xlu1 %v1603_v19, %s1786_s30  ;;  %v1605_v26 = vpop.eup %1604 }
 0x1f1   : > { %v606_v27 = vadd.f32 1.0, %v1605_v26  ;;  %v1607_v28 = vpop.eup %1606 }
 0x1f2   : > { %v605_v29 = vadd.f32 1.0, %v1607_v28 }
 0x1f3   : > { %1608 = vrcp.f32 %v606_v27  ;;  %v633_v38 = vand.u32 2147483648, %v606_v27  ;;  %vm627_vm13 = vweird.f32 %v606_v27  ;;  %v631_v39 = vand.u32 2147483647, %v606_v27 }
 0x1f4   : > { %1610 = vrcp.f32 %v605_v29  ;;  %v618_v47 = vand.u32 2147483648, %v605_v29  ;;  %vm612_vm5 = vweird.f32 %v605_v29  ;;  %v616_v48 = vand.u32 2147483647, %v605_v29 }
 0x1f5   : > { %v634_v42 = vor.u32 1.1754944e-38, %v633_v38  ;;  %vm632_vm15 = vcmp.eq.f32.partialorder %v631_v39, 8.507059e+37 }
 0x1f6   : > { %v619_v51 = vor.u32 1.1754944e-38, %v618_v47  ;;  %vm617_vm7 = vcmp.eq.f32.partialorder %v616_v48, 8.507059e+37 }
 0x1f9   : > { %v1609_v30 = vpop.eup %1608 }
 0x1fa   : > { %v623_v31 = vmul.f32 %v1609_v30, %v606_v27  ;;  %v1611_v33 = vpop.eup %1610  ;;  %vm628_vm12 = vweird.f32 %v1609_v30 }
 0x1fb   : > { %v608_v35 = vmul.f32 %v1611_v33, %v605_v29  ;;  %vm629_vm14 = vmor %vm627_vm13, %vm628_vm12  ;;  %vm613_vm4 = vweird.f32 %v1611_v33 }
 0x1fc   : > { %v624_v32 = vsub.f32 1.0, %v623_v31  ;;  %vm614_vm6 = vmor %vm612_vm5, %vm613_vm4 }
 0x1fd   : > { %v609_v37 = vsub.f32 1.0, %v608_v35 }
 0x1fe   : > { %v625_v34 = vmul.f32 %v1609_v30, %v624_v32 }
 0x1ff   : > { %v610_v41 = vmul.f32 %v1611_v33, %v609_v37 }
 0x200   : > { %v626_v36 = vadd.f32 %v1609_v30, %v625_v34 }
 0x201   : > { %v611_v46 = vadd.f32 %v1611_v33, %v610_v41 }
 0x202   : > { %v630_v40 = vsel %vm629_vm14, %v1609_v30, %v626_v36 }
 0x203   : > { %v635_v43 = vsel %vm632_vm15, %v634_v42, %v630_v40  ;;  %v615_v50 = vsel %vm614_vm6, %v1611_v33, %v611_v46 }
 0x204   : > { %v620_v52 = vsel %vm617_vm7, %v619_v51, %v615_v50 }
 0x25a   : > { %v658_v44 = vpop.permute.xlu0 %657 }
 0x25b   : > { %v662_v45 = vmul.f32 %v658_v44, %v635_v43 }
 0x25d   : > { %666 = vst.msk [vmem:[%s663_s13 + $0x4] sm:$0x1] %vm664_vm1, %v662_v45  ;;  %v681_v49 = vpack.c.bf16 %v662_v45, %v662_v45 }
 0x25f   : > { %v685_v54 = vunpack.c.l.b16 %v681_v49 }
 0x261   : > { %v686_v57 = vrot.slane %v685_v54, 7 }
 0x262   : > { %v656_v53 = vpop.permute.xlu1 %655 }
 0x263   : > { %v661_v55 = vmul.f32 %v656_v53, %v620_v52 }
 0x265   : > { %665 = vst.msk [vmem:[%s663_s13] sm:$0x1] %vm664_vm1, %v661_v55  ;;  %v680_v56 = vpack.c.bf16 %v661_v55, %v661_v55  ;;  %s1539_s13 = sshll.u32 %s1033_s24, 3 }
 0x266   : > { %s1039_s14 = sadd.s32 %s1539_s13, %s1036_s27 }
 0x267   : > { %v684_v58 = vunpack.c.l.b16 %v680_v56  ;;  %s1040_s15 = scalar_lea.vmem [#allocation2], %s1039_s14 }
 0x269   : > { %v687_v59 = vsel %vm538_vm2, %v686_v57, %v684_v58 }
 0x26a   : > { %v688_v60 = vpack.c.b16 %v687_v59, %v687_v59 }
 0x26c   : > { %1477 = vmatmul.msk.bf16.vlgmr.msrb.gmra.mxu2 %vm293_vm0, %v688_v60  ;;  %1478 = vmatmul.msk.bf16.vlgmr.msrb.gmra.mxu3 %vm293_vm0, %v688_v60 }
 0x2ef   : > { %v701_v61 = vpop.f32.mrf.mxu2  ;;  %v714_v62 = vpop.f32.mrf.mxu3 }
 0x2f0   : > { %v720_v63 = vrot.slane %v714_v62, 7 }
 0x2f2   : > { %v721_v1 = vsel %vm536_vm3, %v701_v61, %v720_v63  ;;  %v722_v2 = vsel %vm538_vm2, %v701_v61, %v720_v63 }
 0x2f3   : > { %v723_v3 = vrot.slane %v722_v2, 1  ;;  %v726_v4 = vadd.f32 %v721_v1, %v676_v0 }
 0x2f5   : > { %v1479_v6 = vmul.f32 -1.442695, %v726_v4  ;;  %v727_v7 = vadd.f32 %v1476_v5, %v723_v3  ;;  %v768_v17 = vrot.slane %v726_v4, 1 }
 0x2f7   : > { %1612 = vpow2.f32 %v1479_v6  ;;  %v716_v8 = vpop.f32.mrf.mxu3  ;;  %776 = vrot.lane.b32.xlu1 %v727_v7, %s1786_s30  ;;  %v1480_v9 = vmul.f32 -1.442695, %v727_v7  ;;  %v703_v10 = vpop.f32.mrf.mxu2  ;;  %v769_v21 = vrot.slane %v727_v7, 1 }
 0x2f9   : > { %1614 = vpow2.f32 %v1480_v9 }
 0x2fd   : > { %v1613_v11 = vpop.eup %1612 }
 0x2fe   : > { %v734_v12 = vadd.f32 1.0, %v1613_v11 }
 0x2ff   : > { %v1615_v13 = vpop.eup %1614 }
 0x300   : > { %1616 = vrcp.f32 %v734_v12  ;;  %v735_v15 = vadd.f32 1.0, %v1615_v13  ;;  %v747_v24 = vand.u32 2147483648, %v734_v12  ;;  %v745_v26 = vand.u32 2147483647, %v734_v12 }
 0x301   : > { %vm741_vm9 = vweird.f32 %v734_v12 }
 0x302   : > { %1618 = vrcp.f32 %v735_v15  ;;  %v762_v28 = vand.u32 2147483648, %v735_v15  ;;  %v760_v31 = vand.u32 2147483647, %v735_v15  ;;  %v748_v32 = vor.u32 1.1754944e-38, %v747_v24 }
 0x303   : > { %1620 = vtanh.f32 %v768_v17  ;;  %vm746_vm12 = vcmp.eq.f32.partialorder %v745_v26, 8.507059e+37  ;;  %vm756_vm13 = vweird.f32 %v735_v15 }
 0x304   : > { %1622 = vtanh.f32 %v769_v21  ;;  %v763_v37 = vor.u32 1.1754944e-38, %v762_v28  ;;  %vm761_vm15 = vcmp.eq.f32.partialorder %v760_v31, 8.507059e+37  ;;  %v858_v31 = vld [vmem:[%s857_s6] ss:$4 sm:$0x3] }
 0x306   : > { %v1617_v16 = vpop.eup %1616 }
 0x307   : > { %v737_v19 = vmul.f32 %v1617_v16, %v734_v12  ;;  %vm742_vm8 = vweird.f32 %v1617_v16 }
 0x308   : > { %v1619_v20 = vpop.eup %1618  ;;  %vm743_vm11 = vmor %vm741_vm9, %vm742_vm8 }
 0x309   : > { %v738_v22 = vsub.f32 1.0, %v737_v19  ;;  %v752_v23 = vmul.f32 %v1619_v20, %v735_v15  ;;  %vm757_vm10 = vweird.f32 %v1619_v20  ;;  %v1621_v35 = vpop.eup %1620 }
 0x30a   : > { %vm758_vm14 = vmor %vm756_vm13, %vm757_vm10  ;;  %v1623_v40 = vpop.eup %1622 }
 0x30b   : > { %v739_v25 = vmul.f32 %v1617_v16, %v738_v22  ;;  %v753_v27 = vsub.f32 1.0, %v752_v23 }
 0x30d   : > { %v740_v29 = vadd.f32 %v1617_v16, %v739_v25  ;;  %v754_v30 = vmul.f32 %v1619_v20, %v753_v27 }
 0x30f   : > { %v744_v33 = vsel %vm743_vm11, %v1617_v16, %v740_v29  ;;  %v755_v34 = vadd.f32 %v1619_v20, %v754_v30 }
 0x310   : > { %v749_v36 = vsel %vm746_vm12, %v748_v32, %v744_v33 }
 0x311   : > { %v822_v38 = vmul.f32 %v1621_v35, %v749_v36  ;;  %v759_v39 = vsel %vm758_vm14, %v1619_v20, %v755_v34  ;;  %v820_v47 = vmul.f32 %v749_v36, %v2041_v18  ;;  %v1488_v36 = vld [vmem:[%s857_s6 + $0x8] ss:$4 sm:$0x3] }
 0x312   : > { %v764_v41 = vsel %vm761_vm15, %v763_v37, %v759_v39 }
 0x313   : > { %826 = vrot.lane.b32.xlu0 %v822_v38, %s1786_s30  ;;  %v823_v42 = vmul.f32 %v1623_v40, %v764_v41  ;;  %v821_v43 = vmul.f32 %v764_v41, %v2038_v14 }
 0x315   : > { %828 = vrot.lane.b32.xlu2 %v823_v42, %s1786_s30 }
 0x31d   : > { %774 = vrot.lane.b32.xlu2 %v726_v4, %s1786_s30 }
 0x369   : > { %v777_v51 = vpop.permute.xlu1 %776 }
 0x36a   : > { %v779_v14 = vrot.slane %v777_v51, 1 }
 0x36c   : > { %v1482_v52 = vmul.f32 -1.442695, %v779_v14 }
 0x36f   : > { %v829_v44 = vpop.permute.xlu2 %828 }
 0x370   : > { %v2067_v45 = vadd.f32 %v829_v44, %v821_v43 }
 0x372   : > { %1624 = vtanh.f32 %v2067_v45 }
 0x377   : > { %v775_v55 = vpop.permute.xlu2 %774 }
 0x378   : > { %v1625_v46 = vpop.eup %1624  ;;  %v778_v56 = vrot.slane %v775_v55, 1 }
 0x379   : > { %840 = vrot.lane.b32.xlu0 %v1625_v46, %s1786_s30 }
 0x37a   : > { %v1481_v57 = vmul.f32 -1.442695, %v778_v56 }
 0x385   : > { %v827_v48 = vpop.permute.xlu0 %826 }
 0x386   : > { %v2072_v49 = vadd.f32 %v827_v48, %v820_v47 }
 0x388   : > { %1626 = vtanh.f32 %v2072_v49 }
 0x389   : > { %1628 = vpow2.f32 %v1482_v52 }
 0x38e   : > { %v1627_v50 = vpop.eup %1626 }
 0x38f   : > { %838 = vrot.lane.b32.xlu1 %v1627_v50, %s1786_s30  ;;  %v1629_v53 = vpop.eup %1628 }
 0x390   : > { %v789_v54 = vadd.f32 1.0, %v1629_v53 }
 0x392   : > { %1630 = vrcp.f32 %v789_v54  ;;  %v816_v0 = vand.u32 2147483648, %v789_v54  ;;  %vm810_vm5 = vweird.f32 %v789_v54  ;;  %v814_v1 = vand.u32 2147483647, %v789_v54 }
 0x393   : > { %1632 = vpow2.f32 %v1481_v57 }
 0x394   : > { %v817_v3 = vor.u32 1.1754944e-38, %v816_v0  ;;  %vm815_vm7 = vcmp.eq.f32.partialorder %v814_v1, 8.507059e+37 }
 0x398   : > { %v1631_v58 = vpop.eup %1630 }
 0x399   : > { %v806_v18 = vmul.f32 %v1631_v58, %v789_v54  ;;  %v1633_v60 = vpop.eup %1632  ;;  %vm811_vm4 = vweird.f32 %v1631_v58 }
 0x39a   : > { %v788_v62 = vadd.f32 1.0, %v1633_v60  ;;  %vm812_vm6 = vmor %vm810_vm5, %vm811_vm4 }
 0x39b   : > { %v807_v59 = vsub.f32 1.0, %v806_v18 }
 0x39c   : > { %1634 = vrcp.f32 %v788_v62  ;;  %v801_v12 = vand.u32 2147483648, %v788_v62  ;;  %vm795_vm9 = vweird.f32 %v788_v62  ;;  %v799_v13 = vand.u32 2147483647, %v788_v62 }
 0x39d   : > { %v808_v61 = vmul.f32 %v1631_v58, %v807_v59 }
 0x39e   : > { %v802_v17 = vor.u32 1.1754944e-38, %v801_v12  ;;  %vm800_vm11 = vcmp.eq.f32.partialorder %v799_v13, 8.507059e+37 }
 0x39f   : > { %v809_v63 = vadd.f32 %v1631_v58, %v808_v61 }
 0x3a1   : > { %v813_v2 = vsel %vm812_vm6, %v1631_v58, %v809_v63 }
 0x3a2   : > { %v1635_v4 = vpop.eup %1634  ;;  %v818_v5 = vsel %vm815_vm7, %v817_v3, %v813_v2 }
 0x3a3   : > { %v791_v8 = vmul.f32 %v1635_v4, %v788_v62  ;;  %vm796_vm8 = vweird.f32 %v1635_v4 }
 0x3a4   : > { %vm797_vm10 = vmor %vm795_vm9, %vm796_vm8 }
 0x3a5   : > { %v792_v9 = vsub.f32 1.0, %v791_v8 }
 0x3a7   : > { %v793_v10 = vmul.f32 %v1635_v4, %v792_v9 }
 0x3a9   : > { %v794_v11 = vadd.f32 %v1635_v4, %v793_v10 }
 0x3ab   : > { %v798_v16 = vsel %vm797_vm10, %v1635_v4, %v794_v11 }
 0x3ac   : > { %v803_v19 = vsel %vm800_vm11, %v802_v17, %v798_v16 }
 0x3eb   : > { %v841_v6 = vpop.permute.xlu0 %840 }
 0x3ec   : > { %v845_v7 = vmul.f32 %v841_v6, %v818_v5 }
 0x3ee   : > { %1484 = vst.msk [vmem:[%s1289_s21 + $0x5] sm:$0x1] %vm664_vm1, %v845_v7  ;;  %v863_v15 = vpack.c.bf16 %v845_v7, %v845_v7 }
 0x3f0   : > { %v867_v21 = vunpack.c.l.b16 %v863_v15 }
 0x3f2   : > { %v868_v24 = vrot.slane %v867_v21, 7 }
 0x401   : > { %v839_v20 = vpop.permute.xlu1 %838 }
 0x402   : > { %v844_v22 = vmul.f32 %v839_v20, %v803_v19 }
 0x404   : > { %1483 = vst.msk [vmem:[%s1289_s21 + $0x1] sm:$0x1] %vm664_vm1, %v844_v22  ;;  %v862_v23 = vpack.c.bf16 %v844_v22, %v844_v22 }
 0x406   : > { %v866_v25 = vunpack.c.l.b16 %v862_v23 }
 0x408   : > { %v869_v26 = vsel %vm538_vm2, %v868_v24, %v866_v25 }
 0x409   : > { %v870_v27 = vpack.c.b16 %v869_v26, %v869_v26 }
 0x40b   : > { %1489 = vmatmul.msk.bf16.vlgmr.msrb.gmra.mxu0 %vm293_vm0, %v870_v27  ;;  %1490 = vmatmul.msk.bf16.vlgmr.msrb.gmra.mxu1 %vm293_vm0, %v870_v27 }
 0x488   : > { %v883_v28 = vpop.f32.mrf.mxu0  ;;  %v896_v29 = vpop.f32.mrf.mxu1 }
 0x489   : > { %v902_v30 = vrot.slane %v896_v29, 7 }
 0x48b   : > { %v903_v32 = vsel %vm536_vm3, %v883_v28, %v902_v30  ;;  %v904_v33 = vsel %vm538_vm2, %v883_v28, %v902_v30 }
 0x48c   : > { %v905_v34 = vrot.slane %v904_v33, 1  ;;  %v908_v35 = vadd.f32 %v903_v32, %v858_v31 }
 0x48e   : > { %v1491_v37 = vmul.f32 -1.442695, %v908_v35  ;;  %v909_v38 = vadd.f32 %v1488_v36, %v905_v34  ;;  %v950_v48 = vrot.slane %v908_v35, 1 }
 0x490   : > { %1636 = vpow2.f32 %v1491_v37  ;;  %v898_v39 = vpop.f32.mrf.mxu1  ;;  %958 = vrot.lane.b32.xlu1 %v909_v38, %s1786_s30  ;;  %v1492_v40 = vmul.f32 -1.442695, %v909_v38  ;;  %v885_v41 = vpop.f32.mrf.mxu0  ;;  %v951_v14 = vrot.slane %v909_v38, 1 }
 0x492   : > { %1638 = vpow2.f32 %v1492_v40 }
 0x496   : > { %v1637_v42 = vpop.eup %1636 }
 0x497   : > { %v916_v43 = vadd.f32 1.0, %v1637_v42 }
 0x498   : > { %v1639_v44 = vpop.eup %1638 }
 0x499   : > { %1640 = vrcp.f32 %v916_v43  ;;  %v917_v46 = vadd.f32 1.0, %v1639_v44  ;;  %v929_v54 = vand.u32 2147483648, %v916_v43  ;;  %v927_v56 = vand.u32 2147483647, %v916_v43 }
 0x49a   : > { %vm923_vm13 = vweird.f32 %v916_v43 }
 0x49b   : > { %1642 = vrcp.f32 %v917_v46  ;;  %v944_v58 = vand.u32 2147483648, %v917_v46  ;;  %v942_v60 = vand.u32 2147483647, %v917_v46  ;;  %v930_v61 = vor.u32 1.1754944e-38, %v929_v54 }
 0x49c   : > { %1644 = vtanh.f32 %v950_v48  ;;  %vm928_vm4 = vcmp.eq.f32.partialorder %v927_v56, 8.507059e+37  ;;  %vm938_vm5 = vweird.f32 %v917_v46 }
 0x49d   : > { %1646 = vtanh.f32 %v951_v14  ;;  %v945_v2 = vor.u32 1.1754944e-38, %v944_v58  ;;  %vm943_vm7 = vcmp.eq.f32.partialorder %v942_v60, 8.507059e+37 }
 0x49f   : > { %v1641_v47 = vpop.eup %1640 }
 0x4a0   : > { %v919_v50 = vmul.f32 %v1641_v47, %v916_v43  ;;  %vm924_vm12 = vweird.f32 %v1641_v47 }
 0x4a1   : > { %v1643_v51 = vpop.eup %1642  ;;  %vm925_vm15 = vmor %vm923_vm13, %vm924_vm12 }
 0x4a2   : > { %v920_v52 = vsub.f32 1.0, %v919_v50  ;;  %v934_v53 = vmul.f32 %v1643_v51, %v917_v46  ;;  %vm939_vm14 = vweird.f32 %v1643_v51  ;;  %v1645_v0 = vpop.eup %1644 }
 0x4a3   : > { %vm940_vm6 = vmor %vm938_vm5, %vm939_vm14  ;;  %v1647_v5 = vpop.eup %1646 }
 0x4a4   : > { %v921_v55 = vmul.f32 %v1641_v47, %v920_v52  ;;  %v935_v57 = vsub.f32 1.0, %v934_v53 }
 0x4a6   : > { %v922_v18 = vadd.f32 %v1641_v47, %v921_v55  ;;  %v936_v59 = vmul.f32 %v1643_v51, %v935_v57 }
 0x4a8   : > { %v926_v62 = vsel %vm925_vm15, %v1641_v47, %v922_v18  ;;  %v937_v63 = vadd.f32 %v1643_v51, %v936_v59 }
 0x4a9   : > { %v931_v1 = vsel %vm928_vm4, %v930_v61, %v926_v62  ;;  %v1041_v61 = vld [vmem:[%s1040_s15] ss:$4 sm:$0x3] }
 0x4aa   : > { %v1004_v3 = vmul.f32 %v1645_v0, %v931_v1  ;;  %v941_v4 = vsel %vm940_vm6, %v1643_v51, %v937_v63  ;;  %v1002_v12 = vmul.f32 %v931_v1, %v2072_v49  ;;  %v1498_v1 = vld [vmem:[%s1040_s15 + $0x8] ss:$4 sm:$0x3] }
 0x4ab   : > { %v946_v6 = vsel %vm943_vm7, %v945_v2, %v941_v4 }
 0x4ac   : > { %1008 = vrot.lane.b32.xlu0 %v1004_v3, %s1786_s30  ;;  %v1005_v7 = vmul.f32 %v1647_v5, %v946_v6  ;;  %v1003_v8 = vmul.f32 %v946_v6, %v2067_v45 }
 0x4ae   : > { %1010 = vrot.lane.b32.xlu2 %v1005_v7, %s1786_s30 }
 0x4b6   : > { %956 = vrot.lane.b32.xlu2 %v908_v35, %s1786_s30 }
 0x502   : > { %v959_v17 = vpop.permute.xlu1 %958 }
 0x503   : > { %v961_v45 = vrot.slane %v959_v17, 1 }
 0x505   : > { %v1494_v19 = vmul.f32 -1.442695, %v961_v45 }
 0x508   : > { %v1011_v9 = vpop.permute.xlu2 %1010 }
 0x509   : > { %v2095_v10 = vadd.f32 %v1011_v9, %v1003_v8 }
 0x50b   : > { %1648 = vtanh.f32 %v2095_v10 }
 0x510   : > { %v957_v22 = vpop.permute.xlu2 %956 }
 0x511   : > { %v1649_v11 = vpop.eup %1648  ;;  %v960_v23 = vrot.slane %v957_v22, 1 }
 0x512   : > { %1022 = vrot.lane.b32.xlu0 %v1649_v11, %s1786_s30 }
 0x513   : > { %v1493_v24 = vmul.f32 -1.442695, %v960_v23 }
 0x51e   : > { %v1009_v13 = vpop.permute.xlu0 %1008 }
 0x51f   : > { %v2100_v15 = vadd.f32 %v1009_v13, %v1002_v12 }
 0x521   : > { %1650 = vtanh.f32 %v2100_v15 }
 0x522   : > { %1652 = vpow2.f32 %v1494_v19 }
 0x527   : > { %v1651_v16 = vpop.eup %1650 }
 0x528   : > { %1020 = vrot.lane.b32.xlu1 %v1651_v16, %s1786_s30  ;;  %v1653_v20 = vpop.eup %1652 }
 0x529   : > { %v971_v21 = vadd.f32 1.0, %v1653_v20 }
 0x52b   : > { %1654 = vrcp.f32 %v971_v21  ;;  %v998_v31 = vand.u32 2147483648, %v971_v21  ;;  %vm992_vm9 = vweird.f32 %v971_v21  ;;  %v996_v32 = vand.u32 2147483647, %v971_v21 }
 0x52c   : > { %1656 = vpow2.f32 %v1493_v24 }
 0x52d   : > { %v999_v34 = vor.u32 1.1754944e-38, %v998_v31  ;;  %vm997_vm11 = vcmp.eq.f32.partialorder %v996_v32, 8.507059e+37 }
 0x531   : > { %v1655_v25 = vpop.eup %1654 }
 0x532   : > { %v988_v49 = vmul.f32 %v1655_v25, %v971_v21  ;;  %v1657_v27 = vpop.eup %1656  ;;  %vm993_vm8 = vweird.f32 %v1655_v25 }
 0x533   : > { %v970_v29 = vadd.f32 1.0, %v1657_v27  ;;  %vm994_vm10 = vmor %vm992_vm9, %vm993_vm8 }
 0x534   : > { %v989_v26 = vsub.f32 1.0, %v988_v49 }
 0x535   : > { %1658 = vrcp.f32 %v970_v29  ;;  %v983_v43 = vand.u32 2147483648, %v970_v29  ;;  %vm977_vm13 = vweird.f32 %v970_v29  ;;  %v981_v44 = vand.u32 2147483647, %v970_v29 }
 0x536   : > { %v990_v28 = vmul.f32 %v1655_v25, %v989_v26 }
 0x537   : > { %v984_v48 = vor.u32 1.1754944e-38, %v983_v43  ;;  %vm982_vm15 = vcmp.eq.f32.partialorder %v981_v44, 8.507059e+37 }
 0x538   : > { %v991_v30 = vadd.f32 %v1655_v25, %v990_v28 }
 0x53a   : > { %v995_v33 = vsel %vm994_vm10, %v1655_v25, %v991_v30 }
 0x53b   : > { %v1659_v35 = vpop.eup %1658  ;;  %v1000_v36 = vsel %vm997_vm11, %v999_v34, %v995_v33 }
 0x53c   : > { %v973_v39 = vmul.f32 %v1659_v35, %v970_v29  ;;  %vm978_vm12 = vweird.f32 %v1659_v35 }
 0x53d   : > { %vm979_vm14 = vmor %vm977_vm13, %vm978_vm12 }
 0x53e   : > { %v974_v40 = vsub.f32 1.0, %v973_v39 }
 0x540   : > { %v975_v41 = vmul.f32 %v1659_v35, %v974_v40 }
 0x542   : > { %v976_v42 = vadd.f32 %v1659_v35, %v975_v41 }
 0x544   : > { %v980_v47 = vsel %vm979_vm14, %v1659_v35, %v976_v42 }
 0x545   : > { %v985_v50 = vsel %vm982_vm15, %v984_v48, %v980_v47 }
 0x584   : > { %v1023_v37 = vpop.permute.xlu0 %1022 }
 0x585   : > { %v1027_v38 = vmul.f32 %v1023_v37, %v1000_v36 }
 0x587   : > { %1030 = vst.msk [vmem:[%s1028_s9 + $0x4] sm:$0x1] %vm664_vm1, %v1027_v38  ;;  %v1046_v46 = vpack.c.bf16 %v1027_v38, %v1027_v38 }
 0x589   : > { %v1050_v14 = vunpack.c.l.b16 %v1046_v46 }
 0x58b   : > { %v1051_v54 = vrot.slane %v1050_v14, 7 }
 0x59a   : > { %v1021_v51 = vpop.permute.xlu1 %1020 }
 0x59b   : > { %v1026_v52 = vmul.f32 %v1021_v51, %v985_v50 }
 0x59d   : > { %1029 = vst.msk [vmem:[%s1028_s9] sm:$0x1] %vm664_vm1, %v1026_v52  ;;  %v1045_v53 = vpack.c.bf16 %v1026_v52, %v1026_v52 }
 0x59f   : > { %v1049_v55 = vunpack.c.l.b16 %v1045_v53 }
 0x5a1   : > { %v1052_v56 = vsel %vm538_vm2, %v1051_v54, %v1049_v55 }
 0x5a2   : > { %v1053_v57 = vpack.c.b16 %v1052_v56, %v1052_v56 }
 0x5a4   : > { %1499 = vmatmul.msk.bf16.vlgmr.msra.gmra.mxu2 %vm293_vm0, %v1053_v57  ;;  %1500 = vmatmul.msk.bf16.vlgmr.msra.gmra.mxu3 %vm293_vm0, %v1053_v57 }
 0x627   : > { %v1066_v58 = vpop.f32.mrf.mxu2  ;;  %v1079_v18 = vpop.f32.mrf.mxu3 }
 0x628   : > { %v1085_v59 = vrot.slane %v1079_v18, 7 }
 0x62a   : > { %v1087_v60 = vsel %vm538_vm2, %v1066_v58, %v1085_v59  ;;  %v1086_v62 = vsel %vm536_vm3, %v1066_v58, %v1085_v59 }
 0x62b   : > { %v1088_v63 = vrot.slane %v1087_v60, 1  ;;  %v1091_v0 = vadd.f32 %v1086_v62, %v1041_v61 }
 0x62d   : > { %v1092_v2 = vadd.f32 %v1498_v1, %v1088_v63  ;;  %1139 = vrot.lane.b32.xlu1 %v1091_v0, %s1786_s30  ;;  %v1501_v3 = vmul.f32 -1.442695, %v1091_v0  ;;  %v1133_v13 = vrot.slane %v1091_v0, 1 }
 0x62f   : > { %v1502_v4 = vmul.f32 -1.442695, %v1092_v2  ;;  %1660 = vpow2.f32 %v1501_v3  ;;  %v1068_v5 = vpop.f32.mrf.mxu2  ;;  %v1081_v6 = vpop.f32.mrf.mxu3  ;;  %v1134_v45 = vrot.slane %v1092_v2, 1 }
 0x631   : > { %1662 = vpow2.f32 %v1502_v4 }
 0x635   : > { %v1661_v7 = vpop.eup %1660 }
 0x636   : > { %v1099_v8 = vadd.f32 1.0, %v1661_v7 }
 0x637   : > { %v1663_v9 = vpop.eup %1662 }
 0x638   : > { %v1100_v11 = vadd.f32 1.0, %v1663_v9  ;;  %1664 = vrcp.f32 %v1099_v8  ;;  %v1112_v21 = vand.u32 2147483648, %v1099_v8  ;;  %v1110_v23 = vand.u32 2147483647, %v1099_v8 }
 0x639   : > { %vm1106_vm2 = vweird.f32 %v1099_v8 }
 0x63a   : > { %1666 = vrcp.f32 %v1100_v11  ;;  %v1127_v25 = vand.u32 2147483648, %v1100_v11  ;;  %v1125_v27 = vand.u32 2147483647, %v1100_v11  ;;  %v1113_v28 = vor.u32 1.1754944e-38, %v1112_v21 }
 0x63b   : > { %1668 = vtanh.f32 %v1133_v13  ;;  %vm1111_vm5 = vcmp.eq.f32.partialorder %v1110_v23, 8.507059e+37  ;;  %vm1121_vm6 = vweird.f32 %v1100_v11 }
 0x63c   : > { %1670 = vtanh.f32 %v1134_v45  ;;  %v1128_v33 = vor.u32 1.1754944e-38, %v1127_v25  ;;  %vm1126_vm8 = vcmp.eq.f32.partialorder %v1125_v27, 8.507059e+37 }
 0x63e   : > { %v1665_v12 = vpop.eup %1664 }
 0x63f   : > { %v1102_v16 = vmul.f32 %v1665_v12, %v1099_v8  ;;  %vm1107_vm0 = vweird.f32 %v1665_v12 }
 0x640   : > { %v1667_v17 = vpop.eup %1666  ;;  %vm1108_vm4 = vmor %vm1106_vm2, %vm1107_vm0 }
 0x641   : > { %v1103_v19 = vsub.f32 1.0, %v1102_v16  ;;  %v1117_v20 = vmul.f32 %v1667_v17, %v1100_v11  ;;  %vm1122_vm3 = vweird.f32 %v1667_v17  ;;  %v1669_v31 = vpop.eup %1668 }
 0x642   : > { %vm1123_vm7 = vmor %vm1121_vm6, %vm1122_vm3  ;;  %v1671_v36 = vpop.eup %1670 }
 0x643   : > { %v1104_v22 = vmul.f32 %v1665_v12, %v1103_v19  ;;  %v1118_v24 = vsub.f32 1.0, %v1117_v20 }
 0x645   : > { %v1105_v49 = vadd.f32 %v1665_v12, %v1104_v22  ;;  %v1119_v26 = vmul.f32 %v1667_v17, %v1118_v24 }
 0x647   : > { %v1109_v29 = vsel %vm1108_vm4, %v1665_v12, %v1105_v49  ;;  %v1120_v30 = vadd.f32 %v1667_v17, %v1119_v26 }
 0x648   : > { %v1114_v32 = vsel %vm1111_vm5, %v1113_v28, %v1109_v29 }
 0x649   : > { %v1187_v34 = vmul.f32 %v1669_v31, %v1114_v32  ;;  %v1124_v35 = vsel %vm1123_vm7, %v1667_v17, %v1120_v30  ;;  %v1185_v39 = vmul.f32 %v1114_v32, %v2100_v15 }
 0x64a   : > { %v1129_v37 = vsel %vm1126_vm8, %v1128_v33, %v1124_v35 }
 0x64b   : > { %1191 = vrot.lane.b32.xlu2 %v1187_v34, %s1786_s30  ;;  %v1188_v38 = vmul.f32 %v1671_v36, %v1129_v37  ;;  %v1186_v43 = vmul.f32 %v1129_v37, %v2095_v10 }
 0x64d   : > { %1193 = vrot.lane.b32.xlu0 %v1188_v38, %s1786_s30 }
 0x653   : > { %1141 = vrot.lane.b32.xlu2 %v1092_v2, %s1786_s30 }
 0x69f   : > { %v1140_v48 = vpop.permute.xlu1 %1139 }
 0x6a0   : > { %v1143_v50 = vrot.slane %v1140_v48, 1 }
 0x6a2   : > { %v1503_v51 = vmul.f32 -1.442695, %v1143_v50 }
 0x6a5   : > { %v1192_v40 = vpop.permute.xlu2 %1191 }
 0x6a6   : > { %v1197_v41 = vadd.f32 %v1192_v40, %v1185_v39 }
 0x6a8   : > { %1672 = vtanh.f32 %v1197_v41 }
 0x6ad   : > { %v1142_v52 = vpop.permute.xlu2 %1141 }
 0x6ae   : > { %v1673_v42 = vpop.eup %1672  ;;  %v1144_v53 = vrot.slane %v1142_v52, 1 }
 0x6af   : > { %1203 = vrot.lane.b32.xlu0 %v1673_v42, %s1786_s30 }
 0x6b0   : > { %v1504_v55 = vmul.f32 -1.442695, %v1144_v53 }
 0x6bf   : > { %v1194_v44 = vpop.permute.xlu0 %1193 }
 0x6c0   : > { %v1198_v46 = vadd.f32 %v1194_v44, %v1186_v43 }
 0x6c2   : > { %1674 = vtanh.f32 %v1198_v46 }
 0x6c3   : > { %1676 = vpow2.f32 %v1503_v51 }
 0x6c8   : > { %v1675_v47 = vpop.eup %1674 }
 0x6c9   : > { %1205 = vrot.lane.b32.xlu1 %v1675_v47, %s1786_s30  ;;  %v1677_v14 = vpop.eup %1676  ;;  %s1307_s30 = scalar_lea.vmem %s2050_s25, %s1031_s11 }
 0x6ca   : > { %v1153_v15 = vadd.f32 1.0, %v1677_v14 }
 0x6cc   : > { %1678 = vrcp.f32 %v1153_v15  ;;  %v1166_v60 = vand.u32 2147483648, %v1153_v15  ;;  %vm1160_vm10 = vweird.f32 %v1153_v15  ;;  %v1164_v61 = vand.u32 2147483647, %v1153_v15 }
 0x6cd   : > { %1680 = vpow2.f32 %v1504_v55 }
 0x6ce   : > { %v1167_v63 = vor.u32 1.1754944e-38, %v1166_v60  ;;  %vm1165_vm12 = vcmp.eq.f32.partialorder %v1164_v61, 8.507059e+37 }
 0x6d2   : > { %v1679_v54 = vpop.eup %1678 }
 0x6d3   : > { %v1156_v56 = vmul.f32 %v1679_v54, %v1153_v15  ;;  %v1681_v58 = vpop.eup %1680  ;;  %vm1161_vm9 = vweird.f32 %v1679_v54 }
 0x6d4   : > { %v1154_v59 = vadd.f32 1.0, %v1681_v58  ;;  %vm1162_vm11 = vmor %vm1160_vm10, %vm1161_vm9 }
 0x6d5   : > { %v1157_v10 = vsub.f32 1.0, %v1156_v56 }
 0x6d6   : > { %1682 = vrcp.f32 %v1154_v59  ;;  %v1181_v8 = vand.u32 2147483648, %v1154_v59  ;;  %vm1175_vm14 = vweird.f32 %v1154_v59  ;;  %v1179_v9 = vand.u32 2147483647, %v1154_v59 }
 0x6d7   : > { %v1158_v57 = vmul.f32 %v1679_v54, %v1157_v10 }
 0x6d8   : > { %v1182_v12 = vor.u32 1.1754944e-38, %v1181_v8  ;;  %vm1180_vm0 = vcmp.eq.f32.partialorder %v1179_v9, 8.507059e+37 }
 0x6d9   : > { %v1159_v18 = vadd.f32 %v1679_v54, %v1158_v57 }
 0x6db   : > { %v1163_v62 = vsel %vm1162_vm11, %v1679_v54, %v1159_v18 }
 0x6dc   : > { %v1168_v0 = vsel %vm1165_vm12, %v1167_v63, %v1163_v62  ;;  %v1683_v3 = vpop.eup %1682 }
 0x6dd   : > { %v1171_v4 = vmul.f32 %v1683_v3, %v1154_v59  ;;  %vm1176_vm13 = vweird.f32 %v1683_v3 }
 0x6de   : > { %vm1177_vm15 = vmor %vm1175_vm14, %vm1176_vm13 }
 0x6df   : > { %v1172_v5 = vsub.f32 1.0, %v1171_v4 }
 0x6e1   : > { %v1173_v6 = vmul.f32 %v1683_v3, %v1172_v5 }
 0x6e3   : > { %v1174_v7 = vadd.f32 %v1683_v3, %v1173_v6 }
 0x6e5   : > { %v1178_v11 = vsel %vm1177_vm15, %v1683_v3, %v1174_v7 }
 0x6e6   : > { %v1183_v16 = vsel %vm1180_vm0, %v1182_v12, %v1178_v11 }
 0x721   : > { %v1204_v1 = vpop.permute.xlu0 %1203 }
 0x722   : > { %v1209_v2 = vmul.f32 %v1204_v1, %v1168_v0 }
 0x724   : > { %1505 = vst.msk [vmem:[%s1307_s30 + $0x3] sm:$0x1] %vm664_vm1, %v1209_v2 }
 0x73b   : > { %v1206_v13 = vpop.permute.xlu1 %1205 }
 0x73c   : > { %v1210_v17 = vmul.f32 %v1206_v13, %v1183_v16 }
 0x73e   : > { %1506 = vst.msk [vmem:[%s1307_s30 + $0x7] sm:$0x1] %vm664_vm1, %v1210_v17 }
 0x73f PF: > { %p17_p8 = scmp.ge.s32.totalorder %s1835_s20, 4   ;;  %s2151_s15 = smov %s1774_s16 }
 0x740   : > { %s2152_s16 = smov %s1778_s17  ;;  %s2153_s17 = smov %s1845_s23 }
 0x741   : > { %s2154_s18 = smov %s1835_s20  ;;  %19 = sbr.rel (!%p17_p8) target bundleno = 5 (0x5), region = 106 }
 0x746   :  { %1235 = vsyncpa [#allocation4], 1 }
 0x747   :  { %1237 = vsyncpa [#allocation4 + $0x1], 1 }
 0x748   :  { %1238 = vsyncpa [#allocation6], 1 }
 0x749   :  { %1240 = vsyncpa [#allocation6 + $0x1], 1 }

// kernel: _lambda_.4
= control target key start
LH: loop header
LB: loop body
LE: loop exit
PB: predicated region body
PF: predicated region fallthrough
CT: control target
= control target key end

     0   :  { %12 = vsyncpa [#allocation6], 0  ;;  %s1950_s0 = inlined_call_operand.vmem [shape: f32[2,32,13], index: 0, kind: input, shape index: {}]   ;;  %s1951_s1 = inlined_call_operand.hbm [shape: bf16[5,13,64], index: 1, kind: input, shape index: {}]   ;;  %s1952_s2 = inlined_call_operand.vmem [shape: f32[2,64], index: 2, kind: input, shape index: {}]   ;;  %s1953_s3 = inlined_call_operand.hbm [shape: bf16[320,64], index: 3, kind: input, shape index: {}]   ;;  %s1954_s4 = inlined_call_operand.vmem [shape: f32[2,64], index: 4, kind: input, shape index: {}]   ;;  %s1955_s5 = inlined_call_operand.hbm [shape: bf16[320,128], index: 5, kind: input, shape index: {}]   ;;  %s1956_s6 = inlined_call_operand.vmem [shape: f32[2,128], index: 6, kind: input, shape index: {}]   ;;  %s1957_s7 = inlined_call_operand.vmem [shape: f32[2,4,128], index: 7, kind: output, shape index: {}]  }
   0x1   :  { %13 = vsyncpa [#allocation8], 0  ;;  %s1749_s24 = smov 0  }
   0x2 LB: > { %s1755_s25 = sadd.s32 4294967295, %s1700_s24   ;;  %p1279_p0 = scmp.ge.s32.totalorder %s1700_s24, 1  ;;  %s1700_s24 = sphi %s1749_s24, %s19_s24  }
   0x3   : > { %p202_p1 = scmp.lt.s32.totalorder %s1700_s24, 3  ;;  %p1554_p2 = scmp.eq.s32.totalorder %s1755_s25, 0 }
   0x4   : > { %s230_s28 = sshll.u32 %s1953_s3, 4  ;;  %s213_s9 = sshll.u32 %s1951_s1, 4  ;;  %s231_s28 = int_to_ptr.hbm [resolvable:$true] %s230_s28  ;;  %s214_s9 = int_to_ptr.hbm [resolvable:$true] %s213_s9 }
   0x5   : > { %p1763_p3 = pnand %p1279_p0, %p202_p1  ;;  %s1702_s10 = smov [#allocation7]  }
   0x6   : > { %s232_s11 = sshll.u32 %s1702_s10, 4  ;;  %s1703_s12 = smov [#allocation5]   ;;  %s233_s11 = int_to_ptr.vmem [resolvable:$true] %s232_s11 }
   0x7   : > { %p1544_p4 = pneg %p1763_p3  ;;  %s215_s13 = sshll.u32 %s1703_s12, 4  ;;  %s216_s13 = int_to_ptr.vmem [resolvable:$true] %s215_s13 }
   0x8   : > { %s247_s16 = sshll.u32 %s1955_s5, 4  ;;  %s1704_s17 = smov 64   ;;  %s248_s16 = int_to_ptr.hbm [resolvable:$true] %s247_s16 }
   0x9   : > { %p1545_p5 = pnand %p1554_p2, %p1544_p4  ;;  %s1705_s18 = smov 4  }
   0xa   : > { %s1706_s19 = smov [#allocation9]   ;;  %276 = sbr.rel (%p1763_p3) target bundleno = 783 (0x30f), region = 48 }
   0xb   : > { %1550 = dma.hbm_to_vmem [thread:$0]  (!%p1545_p5), %s231_s28, 2560, %s233_s11, [#allocation8], %s1704_s17, %s1704_s17, %s1705_s18  }
   0xc   : > { %1547 = dma.hbm_to_vmem [thread:$0]  (!%p1545_p5), %s214_s9, 640, %s216_s13, [#allocation6], %s1704_s17, %s1704_s17, %s1705_s18  }
   0xd   : > { %s249_s20 = sshll.u32 %s1706_s19, 4  ;;  %s250_s20 = int_to_ptr.vmem [resolvable:$true] %s249_s20 }
   0xe   : > { %1553 = dma.hbm_to_vmem [thread:$0]  (!%p1545_p5), %s248_s16, 2560, %s250_s20, [#allocation8], %s1704_s17, %s1704_s17, %s1705_s18  }
   0xf   : > { %1691 = dma.done.wait (%p1554_p2), [#allocation6], 640  }
  0x10   : > { %1693 = vsyncadd (%p1554_p2), [#allocation6], 4294966656 }
  0x11   : > { %1695 = dma.done.wait (%p1554_p2), [#allocation8], 5120  }
  0x12   : > { %1697 = vsyncadd (%p1554_p2), [#allocation8], 4294962176  ;;  %vm353_vm0 = vcmask 1045504   ;;  %p318_p6 = scmp.lt.s32.totalorder %s1755_s25, 1  ;;  %vm354_vm1 = vcmask 1046528   ;;  %v1707_v0 = vmov 65535   ;;  %v334_v35 = vlaneseq }
  0x13   : > { %v355_v1 = vsel %vm353_vm0, 4294967295, %v1707_v0  ;;  %v1293_v3 = vld [vmem:[#allocation5] sm:$0xf]  ;;  %v1486_v4 = vld [vmem:[#allocation5] sm:$0x70]  ;;  %vm346_vm2 = vcmask 105472  }
  0x14   : > { %s1960_s25 = smov (!%p318_p6, %s1755_s25), 1  ;;  %v356_v2 = vsel %vm354_vm1, %v355_v1, 0  ;;  %v1299_v5 = vld [vmem:[#allocation5 + $0x8] sm:$0xf]  ;;  %v1294_v6 = vor.u32 %v1486_v4, %v1293_v3  ;;  %v1487_v7 = vld [vmem:[#allocation5 + $0x8] sm:$0x70] }
  0x15   : > { %s1485_s21 = sshll.u32 %s1960_s25, 5  ;;  %v1305_v8 = vld [vmem:[#allocation5 + $0x10] sm:$0xf]  ;;  %v1488_v9 = vld [vmem:[#allocation5 + $0x10] sm:$0x70]  ;;  %v1300_v10 = vor.u32 %v1487_v7, %v1299_v5  ;;  %v1817_v39 = vshrl.u32 %v334_v35, 7 }
  0x16   : > { %s322_s26 = scalar_lea.vmem %s1950_s0, %s1485_s21  ;;  %v1306_v11 = vor.u32 %v1488_v9, %v1305_v8  ;;  %v358_v15 = vand.u32 %v1294_v6, %v356_v2  ;;  %v1311_v18 = vld [vmem:[#allocation5 + $0x18] sm:$0xf]  ;;  %v1489_v19 = vld [vmem:[#allocation5 + $0x18] sm:$0x70]  ;;  %v1317_v24 = vld [vmem:[#allocation5 + $0x20] sm:$0xf] }
  0x17   : > { %v328_v12 = vld [vmem:[%s322_s26] sm:$0xff]  ;;  %v329_v13 = vld [vmem:[%s322_s26 + $0x8] sm:$0xff]  ;;  %v330_v14 = vld [vmem:[%s322_s26 + $0x10] sm:$0xff]  ;;  %v421_v20 = vand.u32 %v1300_v10, %v356_v2  ;;  %v1312_v23 = vor.u32 %v1489_v19, %v1311_v18  ;;  %v1820_v40 = vadd.s32 4294967294, %v1817_v39  ;;  %v1826_v43 = vadd.s32 4294967295, %v1817_v39  ;;  %s1708_s8 = smov 64  }
  0x18   : > { %v332_v16 = vpack.c.bf16 %v329_v13, %v328_v12  ;;  %v331_v17 = vld [vmem:[%s322_s26 + $0x18] sm:$0xff]  ;;  %v484_v21 = vand.u32 %v1306_v11, %v356_v2  ;;  %367 = vmatpush.bf16.msra.mxu0 %v358_v15  ;;  %1531 = vmatpush.bf16.msra.mxu3 %v358_v15  ;;  %vm383_vm3 = vcmp.lt.s32.totalorder %v1817_v39, 2  ;;  %vm446_vm6 = vcmp.lt.s32.totalorder %v1817_v39, 1  ;;  %v1509_v63 = vld [vmem:[#allocation7 + $0x90] sm:$0xff]  ;;  %v1590_v6 = vld [vmem:[%s1952_s2] ss:$0 sm:$0xff] }
  0x19   : > { %v333_v22 = vpack.c.bf16 %v331_v17, %v330_v14  ;;  %v1490_v25 = vld [vmem:[#allocation5 + $0x20] sm:$0x70]  ;;  %430 = vmatpush.bf16.msra.mxu1 %v421_v20  ;;  %v518_v27 = vand.u32 %v1312_v23, %v356_v2  ;;  %vm392_vm4 = vcmp.ge.s32.totalorder %v1820_v40, 0  ;;  %vm455_vm5 = vcmp.ge.s32.totalorder %v1826_v43, 0  ;;  %v1508_v8 = vld [vmem:[#allocation7 + $0x88] sm:$0xff]  ;;  %v1507_v18 = vld [vmem:[#allocation7 + $0x80] sm:$0xff] }
  0x1a   : > { %v1318_v26 = vor.u32 %v1490_v25, %v1317_v24  ;;  %493 = vmatpush.bf16.msra.mxu2 %v484_v21  ;;  %v1510_v56 = vld [vmem:[#allocation7 + $0x98] sm:$0xff]  ;;  %vm543_vm7 = vcmp.lt.s32.totalorder %v1817_v39, 7  ;;  %vm606_vm8 = vcmp.lt.s32.totalorder %v1817_v39, 6  ;;  %v1591_v12 = vld [vmem:[%s1952_s2 + $0x1] ss:$0 sm:$0xff]  ;;  %v338_v21 = vadd.s32 24, %v1817_v39 }
  0x1b   : > { %1295 = vmatmul.msk.bf16.vlgmr.msra.gmra.mxu0 %vm346_vm2, %v332_v16  ;;  %1296 = vmatmul.msk.bf16.vlgmr.msra.gmra.mxu3 %vm346_vm2, %v333_v22  ;;  %vm651_vm9 = vcmask 523264   ;;  %s1290_s17 = sshll.u32 %s1960_s25, 2 }
  0x1c   : > { %v581_v28 = vand.u32 %v1318_v26, %v356_v2  ;;  %1301 = vmatmul.msk.bf16.vlgmr.msra.gmra.mxu1 %vm346_vm2, %v332_v16  ;;  %527 = vmatpush.bf16.msrb.mxu3 %v518_v27  ;;  %s326_s20 = scalar_lea.vmem %s1957_s7, %s1290_s17 }
  0x1d   : > { %1307 = vmatmul.msk.bf16.vlgmr.msra.gmra.mxu2 %vm346_vm2, %v332_v16 }
  0x1e   : > { %590 = vmatpush.bf16.msrb.mxu0 %v581_v28 }
  0x20   : > { %923 = vmatpush.bf16.msra.mxu3 %v1510_v56 }
  0x24   : > { %924 = vmatpush.bf16.msra.mxu3 %v1509_v63 }
  0x28   : > { %925 = vmatpush.bf16.msra.mxu3 %v1508_v8  ;;  %v336_v8 = vadd.s32 8, %v1817_v39 }
  0x2b   : > { %1313 = vmatmul.msk.bf16.vlgmr.msrb.gmra.mxu3 %vm346_vm2, %v332_v16  ;;  %1319 = vmatmul.msk.bf16.vlgmr.msrb.gmra.mxu0 %vm346_vm2, %v332_v16 }
  0x2c   : > { %1302 = vmatmul.msk.bf16.gmra.mxu1 %vm346_vm2, %v333_v22  ;;  %926 = vmatpush.bf16.msra.mxu3 %v1507_v18 }
  0x2d   : > { %1308 = vmatmul.msk.bf16.gmra.mxu2 %vm346_vm2, %v333_v22 }
  0x3b   : > { %1314 = vmatmul.msk.bf16.gmra.mxu3 %vm346_vm2, %v333_v22  ;;  %1320 = vmatmul.msk.bf16.gmra.mxu0 %vm346_vm2, %v333_v22 }
  0x98   : > { %v369_v29 = vpop.f32.mrf.mxu0 }
  0x99   : > { %v432_v30 = vpop.f32.mrf.mxu1  ;;  %v379_v44 = vrot.slane %v369_v29, 6 }
  0x9a   : > { %v442_v47 = vrot.slane %v432_v30, 7 }
  0x9e   : > { %v1805_v31 = vpop.f32.mrf.mxu3 }
  0x9f   : > { %v381_v22 = vrot.slane %v1805_v31, 6  ;;  %v551_v31 = vadd.s32 1, %v338_v21 }
  0xa0   : > { %v1807_v32 = vpop.f32.mrf.mxu0  ;;  %v495_v36 = vpop.f32.mrf.mxu2 }
  0xa1   : > { %v1809_v33 = vpop.f32.mrf.mxu1  ;;  %v380_v52 = vrot.slane %v1807_v32, 6  ;;  %vm559_vm10 = vcmp.le.s32.totalorder %v551_v31, 31 }
  0xa2   : > { %v443_v53 = vrot.slane %v1809_v33, 7 }
  0xa3   : > { %v386_v2 = vsel %vm383_vm3, %v379_v44, %v380_v52  ;;  %v385_v29 = vsel %vm383_vm3, %v380_v52, %v381_v22 }
  0xa4   : > { %v449_v3 = vsel %vm446_vm6, %v442_v47, %v443_v53 }
  0xa5   : > { %v472_v9 = vadd.f32 %v449_v3, %v386_v2 }
  0xa6   : > { %v1811_v34 = vpop.f32.mrf.mxu3 }
  0xa7   : > { %v382_v41 = vrot.slane %v1811_v34, 6 }
  0xa8   : > { %v1813_v37 = vpop.f32.mrf.mxu0  ;;  %v497_v49 = vpop.f32.mrf.mxu2 }
  0xa9   : > { %v1815_v38 = vpop.f32.mrf.mxu1  ;;  %v387_v48 = vsel %vm383_vm3, %v382_v41, %v379_v44  ;;  %v602_v59 = vrot.slane %v1813_v37, 2  ;;  %v506_v19 = vadd.f32 %v497_v49, %v472_v9  ;;  %v384_v33 = vsel %vm383_vm3, %v381_v22, %v382_v41  ;;  %v1495_v9 = vld [vmem:[#allocation7 + $0x20] sm:$0xff] }
  0xaa   : > { %v404_v54 = vsel %vm392_vm4, %v387_v48, 0.0  ;;  %v444_v13 = vrot.slane %v1815_v38, 7 }
  0xac   : > { %v448_v23 = vsel %vm446_vm6, %v443_v53, %v444_v13 }
  0xad   : > { %v473_v32 = vadd.f32 %v448_v23, %v385_v29 }
  0xae   : > { %v1823_v42 = vpop.f32.mrf.mxu3 }
  0xaf   : > { %v539_v60 = vrot.slane %v1823_v42, 1 }
  0xb0   : > { %v594_v45 = vpop.f32.mrf.mxu0  ;;  %v500_v10 = vpop.f32.mrf.mxu2 }
  0xb1   : > { %v439_v46 = vpop.f32.mrf.mxu1  ;;  %v603_v61 = vrot.slane %v594_v45, 2 }
  0xb2   : > { %v445_v50 = vrot.slane %v439_v46, 7 }
  0xb3   : > { %v609_v7 = vsel %vm606_vm8, %v602_v59, %v603_v61 }
  0xb4   : > { %v450_v51 = vsel %vm446_vm6, %v445_v50, %v442_v47  ;;  %v447_v25 = vsel %vm446_vm6, %v444_v13, %v445_v50  ;;  %v507_v47 = vadd.f32 %v500_v10, %v473_v32  ;;  %v612_v13 = vadd.s32 2, %v336_v8 }
  0xb5   : > { %v467_v55 = vsel %vm455_vm5, %v450_v51, 0.0  ;;  %v474_v37 = vadd.f32 %v447_v25, %v384_v33 }
  0xb6   : > { %v471_v57 = vadd.f32 %v467_v55, %v404_v54  ;;  %v531_v58 = vpop.f32.mrf.mxu3  ;;  %vm700_vm12 = vcmp.le.s32.totalorder %v612_v13, 15  ;;  %v1593_v13 = vld [vmem:[%s1954_s4 + $0x1] ss:$0 sm:$0xff] }
  0xb7   : > { %v540_v62 = vrot.slane %v531_v58, 1 }
  0xb8   : > { %v505_v0 = vadd.f32 %v495_v36, %v471_v57  ;;  %v597_v1 = vpop.f32.mrf.mxu0  ;;  %v614_v36 = vadd.s32 2, %v338_v21  ;;  %v502_v42 = vpop.f32.mrf.mxu2 }
  0xb9   : > { %v546_v4 = vsel %vm543_vm7, %v539_v60, %v540_v62  ;;  %v604_v16 = vrot.slane %v597_v1, 2  ;;  %v508_v49 = vadd.f32 %v502_v42, %v474_v37 }
  0xba   : > { %v568_v5 = vadd.f32 %v546_v4, %v505_v0  ;;  %vm622_vm11 = vcmp.le.s32.totalorder %v614_v36, 31  ;;  %v1505_v0 = vld [vmem:[#allocation7 + $0x70] sm:$0xff]  ;;  %v1500_v36 = vld [vmem:[#allocation7 + $0x48] sm:$0xff] }
  0xbb   : > { %v608_v30 = vsel %vm606_vm8, %v603_v61, %v604_v16  ;;  %v1506_v61 = vld [vmem:[#allocation7 + $0x78] sm:$0xff] }
  0xbc   : > { %v631_v11 = vadd.f32 %v609_v7, %v568_v5  ;;  %905 = vmatpush.bf16.msrb.mxu2 %v1506_v61  ;;  %v1504_v5 = vld [vmem:[#allocation7 + $0x68] sm:$0xff] }
  0xbd   : > { %v1496_v7 = vld [vmem:[#allocation7 + $0x28] sm:$0xff] }
  0xbe   : > { %v637_v14 = vmul.f32 %v1590_v6, %v631_v11  ;;  %v534_v15 = vpop.f32.mrf.mxu3 }
  0xbf   : > { %v541_v17 = vrot.slane %v534_v15, 1  ;;  %v1502_v15 = vld [vmem:[#allocation7 + $0x58] sm:$0xff] }
  0xc0   : > { %v643_v20 = vadd.f32 %v1591_v12, %v637_v14  ;;  %v599_v28 = vpop.f32.mrf.mxu0  ;;  %906 = vmatpush.bf16.msrb.mxu2 %v1505_v0 }
  0xc1   : > { %v545_v24 = vsel %vm543_vm7, %v540_v62, %v541_v17  ;;  %v605_v38 = vrot.slane %v599_v28, 2 }
  0xc2   : > { %v647_v26 = vmax.f32 %v643_v20, 0.0  ;;  %v569_v27 = vadd.f32 %v545_v24, %v506_v19  ;;  %v1501_v24 = vld [vmem:[#allocation7 + $0x50] sm:$0xff] }
  0xc3   : > { %v610_v34 = vsel %vm606_vm8, %v605_v38, %v602_v59  ;;  %v607_v54 = vsel %vm606_vm8, %v604_v16, %v605_v38  ;;  %v1498_v59 = vld [vmem:[#allocation7 + $0x38] sm:$0xff] }
  0xc4   : > { %652 = vst.msk [vmem:[#allocation2] sm:$0xff] %vm651_vm9, %v647_v26  ;;  %v632_v35 = vadd.f32 %v608_v30, %v569_v27  ;;  %v630_v56 = vsel %vm622_vm11, %v610_v34, 0.0  ;;  %891 = vmatpush.bf16.msrb.mxu1 %v1498_v59  ;;  %907 = vmatpush.bf16.msrb.mxu2 %v1504_v5  ;;  %v1494_v16 = vld [vmem:[#allocation7 + $0x18] sm:$0xff] }
  0xc6   : > { %v638_v44 = vmul.f32 %v1590_v6, %v632_v35  ;;  %v536_v45 = vpop.f32.mrf.mxu3 }
  0xc7   : > { %v542_v46 = vrot.slane %v536_v45, 1  ;;  %v1493_v45 = vld [vmem:[#allocation7 + $0x10] sm:$0xff] }
  0xc8   : > { %v644_v48 = vadd.f32 %v1591_v12, %v638_v44 }
  0xc9   : > { %v544_v41 = vsel %vm543_vm7, %v541_v17, %v542_v46  ;;  %v547_v50 = vsel %vm543_vm7, %v542_v46, %v539_v60  ;;  %v1497_v60 = vld [vmem:[#allocation7 + $0x30] sm:$0xff]  ;;  %v1499_v46 = vld [vmem:[#allocation7 + $0x40] sm:$0xff] }
  0xca   : > { %v648_v51 = vmax.f32 %v644_v48, 0.0  ;;  %v567_v52 = vsel %vm559_vm10, %v547_v50, 0.0  ;;  %v570_v53 = vadd.f32 %v544_v41, %v507_v47  ;;  %892 = vmatpush.bf16.msrb.mxu1 %v1497_v60  ;;  %v1492_v47 = vld [vmem:[#allocation7 + $0x8] sm:$0xff]  ;;  %v1491_v48 = vld [vmem:[#allocation7] sm:$0xff]  ;;  %v1530_v60 = vld [vmem:[#allocation9 + $0x98] sm:$0xff] }
  0xcb   : > { %v571_v55 = vadd.f32 %v567_v52, %v508_v49 }
  0xcc   : > { %653 = vst.msk [vmem:[#allocation2 + $0x8] sm:$0xff] %vm651_vm9, %v648_v51  ;;  %v633_v57 = vadd.f32 %v607_v54, %v570_v53 }
  0xcd   : > { %v634_v58 = vadd.f32 %v630_v56, %v571_v55 }
  0xce   : > { %v639_v62 = vmul.f32 %v1590_v6, %v633_v57  ;;  %893 = vmatpush.bf16.msrb.mxu1 %v1496_v7 }
  0xcf   : > { %v640_v63 = vmul.f32 %v1590_v6, %v634_v58  ;;  %v1503_v6 = vld [vmem:[#allocation7 + $0x60] sm:$0xff] }
  0xd0   : > { %v645_v1 = vadd.f32 %v1591_v12, %v639_v62  ;;  %908 = vmatpush.bf16.msrb.mxu2 %v1503_v6  ;;  %v1592_v6 = vld [vmem:[%s1954_s4] ss:$0 sm:$0xff] }
  0xd1   : > { %v646_v2 = vadd.f32 %v1591_v12, %v640_v63  ;;  %v549_v12 = vadd.s32 1, %v336_v8 }
  0xd2   : > { %v649_v3 = vmax.f32 %v645_v1, 0.0  ;;  %894 = vmatpush.bf16.msrb.mxu1 %v1495_v9  ;;  %v1529_v1 = vld [vmem:[#allocation9 + $0x90] sm:$0xff]  ;;  %v1518_v9 = vld [vmem:[#allocation9 + $0x38] sm:$0xff] }
  0xd3   : > { %v650_v4 = vmax.f32 %v646_v2, 0.0  ;;  %v656_v10 = vld [vmem:[#allocation2] ss:$2 sm:$0xff]  ;;  %v660_v11 = vld [vmem:[#allocation2 + $0x1] ss:$2 sm:$0xff]  ;;  %vm690_vm13 = vcmp.le.s32.totalorder %v549_v12, 15  ;;  %1141 = vmatpush.bf16.msra.mxu0 %v1518_v9 }
  0xd4   : > { %654 = vst.msk [vmem:[#allocation2 + $0x10] sm:$0xff] %vm651_vm9, %v649_v3  ;;  %v663_v14 = vmax.f32 %v656_v10, %v660_v11  ;;  %909 = vmatpush.bf16.msrb.mxu2 %v1502_v15  ;;  %v1528_v2 = vld [vmem:[#allocation9 + $0x88] sm:$0xff]  ;;  %v1527_v3 = vld [vmem:[#allocation9 + $0x80] sm:$0xff]  ;;  %v1526_v10 = vld [vmem:[#allocation9 + $0x78] sm:$0xff] }
  0xd5   : > { %655 = vst.msk [vmem:[#allocation2 + $0x18] sm:$0xff] %vm651_vm9, %v650_v4  ;;  %v1517_v12 = vld [vmem:[#allocation9 + $0x30] sm:$0xff] }
  0xd6   : > { %v695_v20 = vrot.slane %v663_v14, 2  ;;  %v685_v22 = vrot.slane %v663_v14, 1  ;;  %895 = vmatpush.bf16.msrb.mxu1 %v1494_v16  ;;  %v675_v35 = vrot.slane %v663_v14, 7  ;;  %v665_v54 = vrot.slane %v663_v14, 6 }
  0xd7   : > { %1142 = vmatpush.bf16.msra.mxu0 %v1517_v12 }
  0xd8   : > { %910 = vmatpush.bf16.msrb.mxu2 %v1501_v24 }
  0xda   : > { %896 = vmatpush.bf16.msrb.mxu1 %v1493_v45 }
  0xdc   : > { %v658_v17 = vld [vmem:[#allocation2 + $0x10] ss:$2 sm:$0xff]  ;;  %v662_v18 = vld [vmem:[#allocation2 + $0x11] ss:$2 sm:$0xff]  ;;  %911 = vmatpush.bf16.msrb.mxu2 %v1500_v36  ;;  %v548_v36 = vadd.s32 1, %v1817_v39 }
  0xdd   : > { %v664_v19 = vmax.f32 %v658_v17, %v662_v18 }
  0xde   : > { %897 = vmatpush.bf16.msrb.mxu1 %v1492_v47  ;;  %vm958_vm15 = vcmp.le.s32.totalorder %v548_v36, 7 }
  0xdf   : > { %v696_v21 = vrot.slane %v664_v19, 2  ;;  %v686_v23 = vrot.slane %v664_v19, 1  ;;  %v676_v25 = vrot.slane %v664_v19, 7  ;;  %v666_v52 = vrot.slane %v664_v19, 6 }
  0xe0   : > { %912 = vmatpush.bf16.msrb.mxu2 %v1499_v46 }
  0xe1   : > { %v697_v26 = vsel %vm606_vm8, %v695_v20, %v696_v21  ;;  %v698_v27 = vsel %vm606_vm8, %v696_v21, %v695_v20  ;;  %v687_v28 = vsel %vm543_vm7, %v685_v22, %v686_v23  ;;  %v688_v29 = vsel %vm543_vm7, %v686_v23, %v685_v22  ;;  %v1524_v20 = vld [vmem:[#allocation9 + $0x68] sm:$0xff] }
  0xe2   : > { %v704_v30 = vsel %vm700_vm12, %v698_v27, 0.0  ;;  %v694_v31 = vsel %vm690_vm13, %v688_v29, 0.0  ;;  %v678_v37 = vsel %vm446_vm6, %v676_v25, %v675_v35  ;;  %v677_v38 = vsel %vm446_vm6, %v675_v35, %v676_v25  ;;  %898 = vmatpush.bf16.msrb.mxu1 %v1491_v48  ;;  %v1515_v25 = vld [vmem:[#allocation9 + $0x20] sm:$0xff]  ;;  %v1514_v29 = vld [vmem:[#allocation9 + $0x18] sm:$0xff] }
  0xe3   : > { %v727_v32 = vpack.c.bf16 %v704_v30, %v697_v26  ;;  %v1575_v33 = vpack.i.bf16 %v694_v31, %v687_v28  ;;  %v683_v42 = vsel %vm455_vm5, %v678_v37, 0.0  ;;  %v668_v55 = vsel %vm383_vm3, %v666_v52, %v665_v54  ;;  %v1523_v26 = vld [vmem:[#allocation9 + $0x60] sm:$0xff]  ;;  %v1522_v30 = vld [vmem:[#allocation9 + $0x58] sm:$0xff]  ;;  %v1512_v37 = vld [vmem:[#allocation9 + $0x8] sm:$0xff] }
  0xe4   : > { %v1580_v44 = vpack.i.bf16 %v677_v38, %v683_v42  ;;  %v667_v61 = vsel %vm383_vm3, %v665_v54, %v666_v52  ;;  %v673_v59 = vsel %vm392_vm4, %v668_v55, 0.0  ;;  %1171 = vmatpush.bf16.msra.mxu2 %v1530_v60  ;;  %v611_v35 = vadd.s32 2, %v1817_v39  ;;  %v1520_v38 = vld [vmem:[#allocation9 + $0x48] sm:$0xff]  ;;  %v1519_v52 = vld [vmem:[#allocation9 + $0x40] sm:$0xff] }
  0xe5   : > { %1401 = vmatmul.msk.bf16.vlgmr.msra.gmra.mxu3 %vm651_vm9, %v727_v32  ;;  %1576 = vrot.lane.b32.xlu0 %v1575_v33, %s1708_s8  ;;  %v1513_v32 = vld [vmem:[#allocation9 + $0x10] sm:$0xff] }
  0xe6   : > { %1154 = vmatpush.bf16.msra.mxu1 %v1526_v10  ;;  %v1521_v33 = vld [vmem:[#allocation9 + $0x50] sm:$0xff]  ;;  %vm962_vm14 = vcmp.le.s32.totalorder %v611_v35, 7 }
  0xe8   : > { %1172 = vmatpush.bf16.msra.mxu2 %v1529_v1 }
  0xec   : > { %1173 = vmatpush.bf16.msra.mxu2 %v1528_v2  ;;  %v1594_v2 = vld [vmem:[%s1956_s6] ss:$0 sm:$0xff] }
  0xed   : > { %1581 = vrot.lane.b32.xlu0 %v1580_v44, %s1708_s8 }
  0xf0   : > { %1174 = vmatpush.bf16.msra.mxu2 %v1527_v3  ;;  %v1595_v3 = vld [vmem:[%s1956_s6 + $0x1] ss:$0 sm:$0xff] }
 0x157   : > { %v1577_v49 = vpop.permute.xlu0 %1576 }
 0x158   : > { %v1579_v34 = vunpack.i.h.bf16 %v1577_v49  ;;  %v1578_v41 = vunpack.i.l.bf16 %v1577_v49 }
 0x15a   : > { %v723_v50 = vsel %vm651_vm9, %v663_v14, %v1578_v41  ;;  %v724_v51 = vsel %vm651_vm9, %v664_v19, %v1579_v34  ;;  %v1525_v14 = vld [vmem:[#allocation9 + $0x70] sm:$0xff]  ;;  %v1516_v19 = vld [vmem:[#allocation9 + $0x28] sm:$0xff] }
 0x15b   : > { %v726_v53 = vpack.c.bf16 %v724_v51, %v723_v50  ;;  %1155 = vmatpush.bf16.msra.mxu1 %v1525_v14  ;;  %1143 = vmatpush.bf16.msra.mxu0 %v1516_v19  ;;  %v1511_v51 = vld [vmem:[#allocation9] sm:$0xff] }
 0x15d   : > { %913 = vmatmul.bf16.vlgmr.msrb.gmra.mxu2 %v726_v53 }
 0x15f   : > { %v1582_v56 = vpop.permute.xlu0 %1581  ;;  %1156 = vmatpush.bf16.msra.mxu1 %v1524_v20  ;;  %1144 = vmatpush.bf16.msra.mxu0 %v1515_v25 }
 0x160   : > { %v1584_v57 = vunpack.i.h.bf16 %v1582_v56  ;;  %v1583_v58 = vunpack.i.l.bf16 %v1582_v56 }
 0x162   : > { %v721_v62 = vsel %vm651_vm9, %v673_v59, %v1583_v58  ;;  %v722_v63 = vsel %vm651_vm9, %v667_v61, %v1584_v57 }
 0x163   : > { %v725_v0 = vpack.c.bf16 %v722_v63, %v721_v62  ;;  %1157 = vmatpush.bf16.msra.mxu1 %v1523_v26  ;;  %1145 = vmatpush.bf16.msra.mxu0 %v1514_v29 }
 0x165   : > { %899 = vmatmul.bf16.vlgmr.msrb.gmra.mxu1 %v725_v0 }
 0x167   : > { %1158 = vmatpush.bf16.msra.mxu1 %v1522_v30  ;;  %1146 = vmatpush.bf16.msra.mxu0 %v1513_v32 }
 0x168   : > { %v928_v5 = vpop.f32.mrf.mxu3 }
 0x16b   : > { %1159 = vmatpush.bf16.msra.mxu1 %v1521_v33  ;;  %1147 = vmatpush.bf16.msra.mxu0 %v1512_v37 }
 0x16f   : > { %1160 = vmatpush.bf16.msra.mxu1 %v1520_v38  ;;  %1148 = vmatpush.bf16.msra.mxu0 %v1511_v51 }
 0x170   : > { %v930_v23 = vpop.f32.mrf.mxu3 }
 0x173   : > { %1161 = vmatpush.bf16.msra.mxu1 %v1519_v52 }
 0x1e0   : > { %v914_v4 = vpop.f32.mrf.mxu2 }
 0x1e2   : > { %v900_v7 = vpop.f32.mrf.mxu1 }
 0x1e3   : > { %v915_v8 = vadd.f32 %v914_v4, %v900_v7 }
 0x1e5   : > { %v929_v11 = vadd.f32 %v928_v5, %v915_v8 }
 0x1e7   : > { %v935_v15 = vmul.f32 %v1592_v6, %v929_v11 }
 0x1e8   : > { %v916_v17 = vpop.f32.mrf.mxu2 }
 0x1e9   : > { %v939_v16 = vadd.f32 %v1593_v13, %v935_v15 }
 0x1ea   : > { %v902_v18 = vpop.f32.mrf.mxu1 }
 0x1eb   : > { %v941_v21 = vmax.f32 %v939_v16, 0.0  ;;  %v917_v22 = vadd.f32 %v916_v17, %v902_v18 }
 0x1ed   : > { %943 = vst.msk [vmem:[#allocation3] sm:$0xff] %vm651_vm9, %v941_v21  ;;  %v931_v24 = vadd.f32 %v930_v23, %v917_v22 }
 0x1ef   : > { %v936_v27 = vmul.f32 %v1592_v6, %v931_v24 }
 0x1f1   : > { %v940_v28 = vadd.f32 %v1593_v13, %v936_v27 }
 0x1f3   : > { %v942_v31 = vmax.f32 %v940_v28, 0.0 }
 0x1f5   : > { %944 = vst.msk [vmem:[#allocation3 + $0x8] sm:$0xff] %vm651_vm9, %v942_v31 }
 0x1fc   : > { %v945_v42 = vld [vmem:[#allocation3] ss:$2 sm:$0xff]  ;;  %v947_v44 = vld [vmem:[#allocation3 + $0x1] ss:$2 sm:$0xff] }
 0x1fd   : > { %v948_v45 = vmax.f32 %v945_v42, %v947_v44 }
 0x1ff   : > { %v961_v46 = vrot.slane %v948_v45, 2  ;;  %v953_v47 = vrot.slane %v948_v45, 7  ;;  %v957_v48 = vrot.slane %v948_v45, 1  ;;  %v949_v53 = vrot.slane %v948_v45, 6 }
 0x201   : > { %v964_v49 = vsel %vm962_vm14, %v961_v46, 0.0  ;;  %v956_v34 = vsel %vm455_vm5, %v953_v47, 0.0  ;;  %v960_v41 = vsel %vm958_vm15, %v957_v48, 0.0  ;;  %v952_v57 = vsel %vm392_vm4, %v949_v53, 0.0 }
 0x202   : > { %v977_v39 = vpack.c.bf16 %v964_v49, %v964_v49  ;;  %v1585_v50 = vpack.i.bf16 %v960_v41, %v956_v34 }
 0x204   : > { %1482 = vmatmul.msk.bf16.vlgmr.msra.gmra.mxu2 %vm651_vm9, %v977_v39  ;;  %1586 = vrot.lane.b32.xlu1 %v1585_v50, %s1708_s8 }
 0x276   : > { %v1587_v54 = vpop.permute.xlu1 %1586 }
 0x277   : > { %v1589_v55 = vunpack.i.h.bf16 %v1587_v54  ;;  %v1588_v56 = vunpack.i.l.bf16 %v1587_v54 }
 0x279   : > { %v974_v43 = vsel %vm651_vm9, %v948_v45, %v1589_v55  ;;  %v973_v58 = vsel %vm651_vm9, %v952_v57, %v1588_v56 }
 0x27a   : > { %v976_v61 = vpack.c.bf16 %v974_v43, %v974_v43  ;;  %v975_v59 = vpack.c.bf16 %v973_v58, %v973_v58 }
 0x27c   : > { %1149 = vmatmul.bf16.vlgmr.msra.gmra.mxu0 %v975_v59  ;;  %1162 = vmatmul.bf16.vlgmr.msra.gmra.mxu1 %v976_v61 }
 0x287   : > { %v1176_v62 = vpop.f32.mrf.mxu2 }
 0x28f   : > { %v1178_v63 = vpop.f32.mrf.mxu2 }
 0x2f9   : > { %v1150_v0 = vpop.f32.mrf.mxu0  ;;  %v1163_v60 = vpop.f32.mrf.mxu1 }
 0x2fa   : > { %v1164_v1 = vadd.f32 %v1163_v60, %v1150_v0 }
 0x2fc   : > { %v1177_v40 = vadd.f32 %v1176_v62, %v1164_v1 }
 0x2fe   : > { %v1182_v4 = vmul.f32 %v1594_v2, %v1177_v40 }
 0x300   : > { %v1185_v5 = vadd.f32 %v1595_v3, %v1182_v4 }
 0x301   : > { %v1152_v7 = vpop.f32.mrf.mxu0  ;;  %v1165_v8 = vpop.f32.mrf.mxu1 }
 0x302   : > { %v1186_v6 = vmax.f32 %v1185_v5, 0.0 }
 0x304   : > { %1187 = vst [vmem:[#allocation4] sm:$0xff] %v1186_v6 }
 0x30b   : > { %v1188_v9 = vld [vmem:[#allocation4] ss:$2 sm:$0xf]  ;;  %v1190_v10 = vld [vmem:[#allocation4 + $0x1] ss:$2 sm:$0xf] }
 0x30c   : > { %v1191_v11 = vmax.f32 %v1188_v9, %v1190_v10 }
 0x30e   : > { %1192 = vst [vmem:[%s326_s20] sm:$0xf] %v1191_v11 }
 0x30f PF: > { %s19_s24 = sadd.s32 1, %s1700_s24  }
 0x310   : > { %p16_p7 = scmp.ge.s32.totalorder %s19_s24, 4  }
 0x312   :  { %18 = sbr.rel (!%p16_p7) target bundleno = 2 (0x2), region = 100 }
 0x317   :  { %1212 = vsyncpa [#allocation6], 1 }
 0x318   :  { %1214 = vsyncpa [#allocation6 + $0x1], 1 }
 0x319   :  { %1215 = vsyncpa [#allocation8], 1 }

</bundles_post_ra>
